<compile_context>
chip_gen: v5e
topology: v5e:2x2
jax: 0.10.0
libtpu: 0.0.40
codegen_flags: <defaults>
</compile_context>

<pallas_src>
import numpy as np
import jax
import jax.numpy as jnp
from jax import lax
from jax.experimental import pallas as pl
from jax.experimental.pallas import tpu as pltpu

LANE = 128
SUB = 8


def _round_up(x, m):
    return ((x + m - 1) // m) * m


# ----------------------------------------------------------------------------
# Pallas kernel
# ----------------------------------------------------------------------------
def make_lstm_kernel(num_layers, T, Tc, BB, Hp, matmul_dtype,
                     unroll_limit=16, fori_unroll=4):
    """Kernel over one batch block of BB rows, time-major row layout.

    Refs (all feature dims are 128-padded):
      x_ref     : (T*BB, In_p)   row = t*BB + b
      per layer : W_ih^T (in_p, 4*Hp), W_hh^T (Hp, 4*Hp)  [matmul_dtype],
                  b (1, 4*Hp) [f32]; gate blocks i|f|g|o on 128-aligned blocks
      lin_w_ref : (Hp, Op) [matmul_dtype], lin_b_ref : (1, Op) [f32]
      out_ref   : (T*BB, Op)
      scratch   : gates_ref (Tc*BB, 4*Hp), seq_ref (T*BB, Hp)  [matmul_dtype]
    """
    n_w = 3 * num_layers
    f32 = jnp.float32

    def kernel(*args):
        x_ref = args[0]
        w_refs = args[1:1 + n_w]
        lin_w_ref = args[1 + n_w]
        lin_b_ref = args[2 + n_w]
        out_ref = args[3 + n_w]
        gates_ref = args[4 + n_w]      # scratch: chunked gate pre-activations
        seq_ref = args[5 + n_w]        # scratch: per-timestep layer outputs

        def mm(a, w):
            return jnp.dot(a.astype(matmul_dtype), w.astype(matmul_dtype),
                           preferred_element_type=f32)

        def gate_math(g, h, c):
            # 128-lane-aligned gate slices (padded lanes stay exactly 0).
            i_g = jax.nn.sigmoid(g[:, 0:Hp])
            f_g = jax.nn.sigmoid(g[:, Hp:2 * Hp])
            g_g = jnp.tanh(g[:, 2 * Hp:3 * Hp])
            o_g = jax.nn.sigmoid(g[:, 3 * Hp:4 * Hp])
            c = f_g * c + i_g * g_g
            h = o_g * jnp.tanh(c)
            return h, c

        for l in range(num_layers):
            # Hoisted weight / bias loads: once per layer, not per timestep.
            wih = w_refs[3 * l][...]
            whh = w_refs[3 * l + 1][...].astype(matmul_dtype)
            b = w_refs[3 * l + 2][...]

            h = jnp.zeros((BB, Hp), f32)
            c = jnp.zeros((BB, Hp), f32)

            src = x_ref if l == 0 else seq_ref

            for c0 in range(0, T, Tc):
                tc = min(Tc, T - c0)
                # Input projection + bias for a chunk of tc timesteps: one big
                # lane-dense matmul off the recurrence critical path.
                gates_ref[pl.ds(0, tc * BB), :] = (
                    mm(src[pl.ds(c0 * BB, tc * BB), :], wih) + b
                ).astype(gates_ref.dtype)

                if T <= unroll_limit:
                    # Small static T: fully unrolled, h/c carried in vregs.
                    # Next step's gate slice is loaded one iteration ahead so
                    # the vld is off the h@W_hh / EUP dependency chain.
                    g_pre = gates_ref[pl.ds(0, BB), :].astype(f32)
                    for t in range(tc):
                        g = g_pre + jnp.dot(h.astype(matmul_dtype), whh,
                                            preferred_element_type=f32)
                        if t + 1 < tc:
                            g_pre = gates_ref[pl.ds((t + 1) * BB, BB), :].astype(f32)
                        h, c = gate_math(g, h, c)
                        seq_ref[pl.ds((c0 + t) * BB, BB), :] = h.astype(seq_ref.dtype)
                else:
                    # Large T: bounded-unroll fori_loop keeps vreg live ranges
                    # and compile time under control.
                    def body(t, carry, c0=c0):
                        h, c = carry
                        row0 = pl.multiple_of(t * BB, SUB)
                        g = (gates_ref[pl.ds(row0, BB), :].astype(f32)
                             + jnp.dot(h.astype(matmul_dtype), whh,
                                       preferred_element_type=f32))
                        h, c = gate_math(g, h, c)
                        srow0 = pl.multiple_of((c0 + t) * BB, SUB)
                        seq_ref[pl.ds(srow0, BB), :] = h.astype(seq_ref.dtype)
                        return h, c

                    h, c = lax.fori_loop(0, tc, body, (h, c),
                                         unroll=min(fori_unroll, tc))

        # Inter-layer & output dropout are identity at eval.
        # Final Linear over all timesteps: one matmul, one lane-dense store.
        out_ref[...] = (mm(seq_ref[...], lin_w_ref[...])
                        + lin_b_ref[...]).astype(out_ref.dtype)

    return kernel


# ----------------------------------------------------------------------------
# Wrapper: padding / layout plumbing + pallas_call
# ----------------------------------------------------------------------------
def _choose_batch_block(B, max_bb=128):
    """Per-grid-step batch rows: as large as B allows (MXU M-dim utilization),
    but keep >= 2 grid blocks when possible so both v7x TensorCores get work."""
    bb = min(max_bb, _round_up(B, SUB))
    if bb > SUB and _round_up(B, bb) // bb < 2:
        bb = max(SUB, min(bb, _round_up((B + 1) // 2, SUB)))
    return bb


def _pad_lstm_layer(wih_t, whh_t, b, in_dim, in_p, H, Hp, w_dtype):
    """Zero-pad and scatter gate blocks [i|f|g|o] onto 128-aligned Hp-wide blocks."""
    wih_p = jnp.zeros((in_p, 4 * Hp), jnp.float32)
    whh_p = jnp.zeros((Hp, 4 * Hp), jnp.float32)
    b_p = jnp.zeros((1, 4 * Hp), jnp.float32)
    for k in range(4):
        wih_p = wih_p.at[:in_dim, k * Hp:k * Hp + H].set(wih_t[:, k * H:(k + 1) * H])
        whh_p = whh_p.at[:H, k * Hp:k * Hp + H].set(whh_t[:, k * H:(k + 1) * H])
        b_p = b_p.at[:, k * Hp:k * Hp + H].set(b[:, k * H:(k + 1) * H])
    return wih_p.astype(w_dtype), whh_p.astype(w_dtype), b_p


def lstm_forward(x, lstm_params, lin_w_t, lin_b, num_layers, hidden_size,
                 output_size, matmul_dtype=jnp.bfloat16,
                 max_gate_scratch_bytes=4 << 20):
    """x: (B, T, input_size) batch-first, like the PyTorch module. Returns (B, T, out)."""
    B, T, input_size = x.shape
    Hp = _round_up(hidden_size, LANE)
    In_p = _round_up(input_size, LANE)
    Op = _round_up(output_size, LANE)

    BB = _choose_batch_block(B)
    Bp = _round_up(B, BB)
    nb = Bp // BB

    storage_dtype = matmul_dtype
    sbytes = jnp.dtype(storage_dtype).itemsize
    wbytes = jnp.dtype(matmul_dtype).itemsize

    # Gate-precompute chunk length (timesteps): bound the gates scratch.
    gate_row_bytes = BB * 4 * Hp * sbytes
    Tc = max(1, min(T, max_gate_scratch_bytes // gate_row_bytes))

    # time-major + zero-pad, then regroup as (nb, T*BB, In_p): each grid block
    # is a time-major slab so per-step row slices inside the kernel are
    # (8, 128)-aligned and the output store is lane-dense.
    x_tm = jnp.transpose(x, (1, 0, 2)).astype(jnp.float32)            # (T, B, in)
    x_p = jnp.zeros((T, Bp, In_p), jnp.float32).at[:, :B, :input_size].set(x_tm)
    x_blk = (x_p.reshape(T, nb, BB, In_p)
             .transpose(1, 0, 2, 3)
             .reshape(nb, T * BB, In_p))

    flat = [x_blk]
    for l in range(num_layers):
        in_dim = input_size if l == 0 else hidden_size
        in_p = In_p if l == 0 else Hp
        wih_t, whh_t, b = lstm_params[l]
        flat += list(_pad_lstm_layer(wih_t, whh_t, b, in_dim, in_p,
                                     hidden_size, Hp, matmul_dtype))
    lin_w_p = (jnp.zeros((Hp, Op), jnp.float32)
               .at[:hidden_size, :output_size].set(lin_w_t)
               .astype(matmul_dtype))
    lin_b_p = jnp.zeros((1, Op), jnp.float32).at[:, :output_size].set(lin_b)
    flat += [lin_w_p, lin_b_p]

    kernel = make_lstm_kernel(num_layers, T, Tc, BB, Hp, matmul_dtype)

    in_specs = [pl.BlockSpec((None, T * BB, In_p), lambda i: (i, 0, 0))]
    for l in range(num_layers):
        in_p = In_p if l == 0 else Hp
        in_specs += [
            pl.BlockSpec((in_p, 4 * Hp), lambda i: (0, 0)),
            pl.BlockSpec((Hp, 4 * Hp), lambda i: (0, 0)),
            pl.BlockSpec((1, 4 * Hp), lambda i: (0, 0)),
        ]
    in_specs += [pl.BlockSpec((Hp, Op), lambda i: (0, 0)),
                 pl.BlockSpec((1, Op), lambda i: (0, 0))]

    # Rough VMEM budget (double-buffered blocks + scratch); raise the scoped
    # limit explicitly when it exceeds the 16 MiB default (important on v5e).
    est = 2 * T * BB * In_p * 4 + 2 * T * BB * Op * 4
    for l in range(num_layers):
        in_p = In_p if l == 0 else Hp
        est += 2 * ((in_p + Hp) * 4 * Hp * wbytes + 4 * Hp * 4)
    est += 2 * (Hp * Op * wbytes + Op * 4)
    est += Tc * BB * 4 * Hp * sbytes + T * BB * Hp * sbytes
    vmem_limit = None
    if est > (16 << 20):
        vmem_limit = min(int(est * 1.25), 100 << 20)

    out_blk = pl.pallas_call(
        kernel,
        out_shape=jax.ShapeDtypeStruct((nb, T * BB, Op), jnp.float32),
        grid=(nb,),
        in_specs=in_specs,
        out_specs=pl.BlockSpec((None, T * BB, Op), lambda i: (i, 0, 0)),
        scratch_shapes=[
            pltpu.VMEM((Tc * BB, 4 * Hp), storage_dtype),   # chunked gates
            pltpu.VMEM((T * BB, Hp), storage_dtype),        # per-timestep outputs
        ],
        compiler_params=pltpu.CompilerParams(
            dimension_semantics=("parallel",),               # batch blocks across TCs
            vmem_limit_bytes=vmem_limit,
        ),
    )(*flat)

    # (nb, T*BB, Op) -> (Bp, T, Op) -> slice off padding -> (B, T, output_size)
    out = (out_blk.reshape(nb, T, BB, Op)
           .transpose(0, 2, 1, 3)
           .reshape(Bp, T, Op))
    return out[:B, :, :output_size]


# ----------------------------------------------------------------------------
# Deterministic parameter init (PyTorch-style uniform(-1/sqrt(H), 1/sqrt(H)))
# ----------------------------------------------------------------------------
def init_params(key, input_size, output_size, hidden_size, num_layers):
    k = 1.0 / np.sqrt(hidden_size)

    def uniform(key, shape):
        return jax.random.uniform(key, shape, jnp.float32, minval=-k, maxval=k)

    layers = []
    for l in range(num_layers):
        in_dim = input_size if l == 0 else hidden_size
        key, k1, k2, k3, k4 = jax.random.split(key, 5)
        wih_t = uniform(k1, (in_dim, 4 * hidden_size))            # W_ih^T
        whh_t = uniform(k2, (hidden_size, 4 * hidden_size))       # W_hh^T
        b = (uniform(k3, (4 * hidden_size,)) +
             uniform(k4, (4 * hidden_size,))).reshape(1, 4 * hidden_size)
        layers.append((wih_t, whh_t, b))
    key, k1, k2 = jax.random.split(key, 3)
    lin_w_t = uniform(k1, (hidden_size, output_size))             # Linear W^T
    lin_b = uniform(k2, (output_size,)).reshape(1, output_size)
    return layers, lin_w_t, lin_b


# ----------------------------------------------------------------------------
# Pure-JAX reference (matches the PyTorch module's forward, eval mode)
# ----------------------------------------------------------------------------
def lstm_reference(x, lstm_params, lin_w_t, lin_b, num_layers, H):
    B, T, _ = x.shape

    def cell(x_t, h, c, wih_t, whh_t, b):
        g = x_t @ wih_t + h @ whh_t + b
        i = jax.nn.sigmoid(g[:, :H])
        f = jax.nn.sigmoid(g[:, H:2 * H])
        gg = jnp.tanh(g[:, 2 * H:3 * H])
        o = jax.nn.sigmoid(g[:, 3 * H:])
        c2 = f * c + i * gg
        return o * jnp.tanh(c2), c2

    h = [jnp.zeros((B, H), jnp.float32) for _ in range(num_layers)]
    c = [jnp.zeros((B, H), jnp.float32) for _ in range(num_layers)]
    outs = []
    for t in range(T):
        inp = x[:, t, :]
        for l in range(num_layers):
            h[l], c[l] = cell(inp, h[l], c[l], *lstm_params[l])
            inp = h[l]                      # inter-layer dropout = identity (eval)
        outs.append(inp)
    lstm_out = jnp.stack(outs, axis=1)      # (B, T, H)
    return lstm_out @ lin_w_t + lin_b       # dropout = identity; Linear on all steps


# ----------------------------------------------------------------------------
if __name__ == "__main__":
    # Small deterministic config consistent with the module's forward.
    B, T = 2, 8
    input_size, output_size, hidden_size, num_layers = 4, 4, 32, 2
    dropout = 0.2                           # identity at inference (unused)

    key = jax.random.PRNGKey(0)
    key, kx, kp = jax.random.split(key, 3)
    x = jax.random.normal(kx, (B, T, input_size), jnp.float32)

    lstm_params, lin_w_t, lin_b = init_params(kp, input_size, output_size,
                                              hidden_size, num_layers)

    ref = jax.block_until_ready(
        lstm_reference(x, lstm_params, lin_w_t, lin_b, num_layers, hidden_size))

    # Exact-validation mode: f32 MXU operands / f32 scratch.
    out_f32 = jax.block_until_ready(
        lstm_forward(x, lstm_params, lin_w_t, lin_b, num_layers, hidden_size,
                     output_size, matmul_dtype=jnp.float32))
    assert out_f32.shape == (B, T, output_size)
    np.testing.assert_allclose(np.asarray(out_f32), np.asarray(ref),
                               atol=1e-4, rtol=1e-4)

    # Default fast path: bf16 MXU operands + bf16 scratch, f32 accumulation.
    out_bf16 = jax.block_until_ready(
        lstm_forward(x, lstm_params, lin_w_t, lin_b, num_layers, hidden_size,
                     output_size))
    assert out_bf16.shape == (B, T, output_size)
    np.testing.assert_allclose(np.asarray(out_bf16), np.asarray(ref),
                               atol=5e-2, rtol=5e-2)

    print("KERNEL_OK")
</pallas_src>

<mosaic_0001>
module attributes {stable_mosaic.version = 11 : i64} {
  func.func @kernel(%arg0: i32, %arg1: memref<1x64x128xf32, #tpu.memory_space<vmem>>, %arg2: memref<128x512xf32, #tpu.memory_space<vmem>>, %arg3: memref<128x512xf32, #tpu.memory_space<vmem>>, %arg4: memref<1x512xf32, #tpu.memory_space<vmem>>, %arg5: memref<128x512xf32, #tpu.memory_space<vmem>>, %arg6: memref<128x512xf32, #tpu.memory_space<vmem>>, %arg7: memref<1x512xf32, #tpu.memory_space<vmem>>, %arg8: memref<128x128xf32, #tpu.memory_space<vmem>>, %arg9: memref<1x128xf32, #tpu.memory_space<vmem>>, %arg10: memref<1x64x128xf32, #tpu.memory_space<vmem>>, %arg11: memref<64x512xf32, #tpu.memory_space<vmem>>, %arg12: memref<64x128xf32, #tpu.memory_space<vmem>>) attributes {dimension_semantics = [#tpu.dimension_semantics<parallel>], iteration_bounds = array<i64: 1>, scalar_prefetch = 0 : i64, scratch_operands = 2 : i64, tpu.core_type = #tpu.core_type<tc>, window_params = [{transform_indices = @transform_0, window_bounds = array<i64: 1, 64, 128>}, {pipeline_mode = #tpu.pipeline_mode<synchronous>, transform_indices = @transform_1, window_bounds = array<i64: 128, 512>}, {pipeline_mode = #tpu.pipeline_mode<synchronous>, transform_indices = @transform_2, window_bounds = array<i64: 128, 512>}, {pipeline_mode = #tpu.pipeline_mode<synchronous>, transform_indices = @transform_3, window_bounds = array<i64: 1, 512>}, {pipeline_mode = #tpu.pipeline_mode<synchronous>, transform_indices = @transform_4, window_bounds = array<i64: 128, 512>}, {pipeline_mode = #tpu.pipeline_mode<synchronous>, transform_indices = @transform_5, window_bounds = array<i64: 128, 512>}, {pipeline_mode = #tpu.pipeline_mode<synchronous>, transform_indices = @transform_6, window_bounds = array<i64: 1, 512>}, {pipeline_mode = #tpu.pipeline_mode<synchronous>, transform_indices = @transform_7, window_bounds = array<i64: 128, 128>}, {pipeline_mode = #tpu.pipeline_mode<synchronous>, transform_indices = @transform_8, window_bounds = array<i64: 1, 128>}, {transform_indices = @transform_9, window_bounds = array<i64: 1, 64, 128>}]} {
    %c0 = arith.constant 0 : index
    %c0_0 = arith.constant 0 : index
    %0 = vector.load %arg2[%c0, %c0_0] : memref<128x512xf32, #tpu.memory_space<vmem>>, vector<128x512xf32>
    %c0_1 = arith.constant 0 : index
    %c0_2 = arith.constant 0 : index
    %1 = vector.load %arg3[%c0_1, %c0_2] : memref<128x512xf32, #tpu.memory_space<vmem>>, vector<128x512xf32>
    %c0_3 = arith.constant 0 : index
    %c0_4 = arith.constant 0 : index
    %2 = vector.load %arg4[%c0_3, %c0_4] : memref<1x512xf32, #tpu.memory_space<vmem>>, vector<1x512xf32>
    %cst = arith.constant 0.000000e+00 : f32
    %3 = vector.broadcast %cst : f32 to vector<8x128xf32>
    %cst_5 = arith.constant 0.000000e+00 : f32
    %4 = vector.broadcast %cst_5 : f32 to vector<8x128xf32>
    %c0_6 = arith.constant 0 : index
    %c0_7 = arith.constant 0 : index
    %c0_8 = arith.constant 0 : index
    %5 = vector.load %arg1[%c0_6, %c0_7, %c0_8] : memref<1x64x128xf32, #tpu.memory_space<vmem>>, vector<1x64x128xf32>
    %6 = vector.shape_cast %5 : vector<1x64x128xf32> to vector<64x128xf32>
    %cst_9 = arith.constant dense<0.000000e+00> : vector<64x512xf32>
    %7 = tpu.matmul %6, %0, %cst_9 {dimension_numbers = #tpu.dot_dimension_numbers<[1], [0], [0], [1], [0, 0, 1, 1], [], []>} : vector<64x128xf32>, vector<128x512xf32>, vector<64x512xf32> -> vector<64x512xf32>
    %8 = vector.broadcast %2 : vector<1x512xf32> to vector<64x512xf32>
    %9 = arith.addf %7, %8 : vector<64x512xf32>
    %c0_10 = arith.constant 0 : index
    %c0_11 = arith.constant 0 : index
    %10 = vector.load %arg11[%c0_10, %c0_11] : memref<64x512xf32, #tpu.memory_space<vmem>>, vector<64x512xf32>
    tpu.vector_store %arg11[%c0_10, %c0_11], %9 {strides = array<i32>} : memref<64x512xf32, #tpu.memory_space<vmem>>, vector<64x512xf32>,
    %c0_12 = arith.constant 0 : index
    %c0_13 = arith.constant 0 : index
    %11 = vector.load %arg11[%c0_12, %c0_13] : memref<64x512xf32, #tpu.memory_space<vmem>>, vector<8x512xf32>
    %cst_14 = arith.constant dense<0.000000e+00> : vector<8x512xf32>
    %12 = tpu.matmul %3, %1, %cst_14 {dimension_numbers = #tpu.dot_dimension_numbers<[1], [0], [0], [1], [0, 0, 1, 1], [], []>} : vector<8x128xf32>, vector<128x512xf32>, vector<8x512xf32> -> vector<8x512xf32>
    %13 = arith.addf %11, %12 : vector<8x512xf32>
    %c8 = arith.constant 8 : index
    %c0_15 = arith.constant 0 : index
    %14 = vector.load %arg11[%c8, %c0_15] : memref<64x512xf32, #tpu.memory_space<vmem>>, vector<8x512xf32>
    %15 = vector.extract_strided_slice %13 {offsets = [0, 0], sizes = [8, 128], strides = [1, 1]} : vector<8x512xf32> to vector<8x128xf32>
    %16 = arith.negf %15 : vector<8x128xf32>
    %17 = math.exp %16 : vector<8x128xf32>
    %cst_16 = arith.constant 1.000000e+00 : f32
    %18 = vector.broadcast %cst_16 : f32 to vector<8x128xf32>
    %19 = arith.addf %18, %17 : vector<8x128xf32>
    %20 = arith.divf %18, %19 : vector<8x128xf32>
    %21 = vector.extract_strided_slice %13 {offsets = [0, 128], sizes = [8, 128], strides = [1, 1]} : vector<8x512xf32> to vector<8x128xf32>
    %22 = arith.negf %21 : vector<8x128xf32>
    %23 = math.exp %22 : vector<8x128xf32>
    %cst_17 = arith.constant 1.000000e+00 : f32
    %24 = vector.broadcast %cst_17 : f32 to vector<8x128xf32>
    %25 = arith.addf %24, %23 : vector<8x128xf32>
    %26 = arith.divf %24, %25 : vector<8x128xf32>
    %27 = vector.extract_strided_slice %13 {offsets = [0, 256], sizes = [8, 128], strides = [1, 1]} : vector<8x512xf32> to vector<8x128xf32>
    %28 = math.tanh %27 : vector<8x128xf32>
    %29 = vector.extract_strided_slice %13 {offsets = [0, 384], sizes = [8, 128], strides = [1, 1]} : vector<8x512xf32> to vector<8x128xf32>
    %30 = arith.negf %29 : vector<8x128xf32>
    %31 = math.exp %30 : vector<8x128xf32>
    %cst_18 = arith.constant 1.000000e+00 : f32
    %32 = vector.broadcast %cst_18 : f32 to vector<8x128xf32>
    %33 = arith.addf %32, %31 : vector<8x128xf32>
    %34 = arith.divf %32, %33 : vector<8x128xf32>
    %35 = arith.mulf %26, %4 : vector<8x128xf32>
    %36 = arith.mulf %20, %28 : vector<8x128xf32>
    %37 = arith.addf %35, %36 : vector<8x128xf32>
    %38 = math.tanh %37 : vector<8x128xf32>
    %39 = arith.mulf %34, %38 : vector<8x128xf32>
    %c0_19 = arith.constant 0 : index
    %c0_20 = arith.constant 0 : index
    %40 = vector.load %arg12[%c0_19, %c0_20] : memref<64x128xf32, #tpu.memory_space<vmem>>, vector<8x128xf32>
    tpu.vector_store %arg12[%c0_19, %c0_20], %39 {strides = array<i32>} : memref<64x128xf32, #tpu.memory_space<vmem>>, vector<8x128xf32>,
    %cst_21 = arith.constant dense<0.000000e+00> : vector<8x512xf32>
    %41 = tpu.matmul %39, %1, %cst_21 {dimension_numbers = #tpu.dot_dimension_numbers<[1], [0], [0], [1], [0, 0, 1, 1], [], []>} : vector<8x128xf32>, vector<128x512xf32>, vector<8x512xf32> -> vector<8x512xf32>
    %42 = arith.addf %14, %41 : vector<8x512xf32>
    %c16 = arith.constant 16 : index
    %c0_22 = arith.constant 0 : index
    %43 = vector.load %arg11[%c16, %c0_22] : memref<64x512xf32, #tpu.memory_space<vmem>>, vector<8x512xf32>
    %44 = vector.extract_strided_slice %42 {offsets = [0, 0], sizes = [8, 128], strides = [1, 1]} : vector<8x512xf32> to vector<8x128xf32>
    %45 = arith.negf %44 : vector<8x128xf32>
    %46 = math.exp %45 : vector<8x128xf32>
    %cst_23 = arith.constant 1.000000e+00 : f32
    %47 = vector.broadcast %cst_23 : f32 to vector<8x128xf32>
    %48 = arith.addf %47, %46 : vector<8x128xf32>
    %49 = arith.divf %47, %48 : vector<8x128xf32>
    %50 = vector.extract_strided_slice %42 {offsets = [0, 128], sizes = [8, 128], strides = [1, 1]} : vector<8x512xf32> to vector<8x128xf32>
    %51 = arith.negf %50 : vector<8x128xf32>
    %52 = math.exp %51 : vector<8x128xf32>
    %cst_24 = arith.constant 1.000000e+00 : f32
    %53 = vector.broadcast %cst_24 : f32 to vector<8x128xf32>
    %54 = arith.addf %53, %52 : vector<8x128xf32>
    %55 = arith.divf %53, %54 : vector<8x128xf32>
    %56 = vector.extract_strided_slice %42 {offsets = [0, 256], sizes = [8, 128], strides = [1, 1]} : vector<8x512xf32> to vector<8x128xf32>
    %57 = math.tanh %56 : vector<8x128xf32>
    %58 = vector.extract_strided_slice %42 {offsets = [0, 384], sizes = [8, 128], strides = [1, 1]} : vector<8x512xf32> to vector<8x128xf32>
    %59 = arith.negf %58 : vector<8x128xf32>
    %60 = math.exp %59 : vector<8x128xf32>
    %cst_25 = arith.constant 1.000000e+00 : f32
    %61 = vector.broadcast %cst_25 : f32 to vector<8x128xf32>
    %62 = arith.addf %61, %60 : vector<8x128xf32>
    %63 = arith.divf %61, %62 : vector<8x128xf32>
    %64 = arith.mulf %55, %37 : vector<8x128xf32>
    %65 = arith.mulf %49, %57 : vector<8x128xf32>
    %66 = arith.addf %64, %65 : vector<8x128xf32>
    %67 = math.tanh %66 : vector<8x128xf32>
    %68 = arith.mulf %63, %67 : vector<8x128xf32>
    %c8_26 = arith.constant 8 : index
    %c0_27 = arith.constant 0 : index
    %69 = vector.load %arg12[%c8_26, %c0_27] : memref<64x128xf32, #tpu.memory_space<vmem>>, vector<8x128xf32>
    tpu.vector_store %arg12[%c8_26, %c0_27], %68 {strides = array<i32>} : memref<64x128xf32, #tpu.memory_space<vmem>>, vector<8x128xf32>,
    %cst_28 = arith.constant dense<0.000000e+00> : vector<8x512xf32>
    %70 = tpu.matmul %68, %1, %cst_28 {dimension_numbers = #tpu.dot_dimension_numbers<[1], [0], [0], [1], [0, 0, 1, 1], [], []>} : vector<8x128xf32>, vector<128x512xf32>, vector<8x512xf32> -> vector<8x512xf32>
    %71 = arith.addf %43, %70 : vector<8x512xf32>
    %c24 = arith.constant 24 : index
    %c0_29 = arith.constant 0 : index
    %72 = vector.load %arg11[%c24, %c0_29] : memref<64x512xf32, #tpu.memory_space<vmem>>, vector<8x512xf32>
    %73 = vector.extract_strided_slice %71 {offsets = [0, 0], sizes = [8, 128], strides = [1, 1]} : vector<8x512xf32> to vector<8x128xf32>
    %74 = arith.negf %73 : vector<8x128xf32>
    %75 = math.exp %74 : vector<8x128xf32>
    %cst_30 = arith.constant 1.000000e+00 : f32
    %76 = vector.broadcast %cst_30 : f32 to vector<8x128xf32>
    %77 = arith.addf %76, %75 : vector<8x128xf32>
    %78 = arith.divf %76, %77 : vector<8x128xf32>
    %79 = vector.extract_strided_slice %71 {offsets = [0, 128], sizes = [8, 128], strides = [1, 1]} : vector<8x512xf32> to vector<8x128xf32>
    %80 = arith.negf %79 : vector<8x128xf32>
    %81 = math.exp %80 : vector<8x128xf32>
    %cst_31 = arith.constant 1.000000e+00 : f32
    %82 = vector.broadcast %cst_31 : f32 to vector<8x128xf32>
    %83 = arith.addf %82, %81 : vector<8x128xf32>
    %84 = arith.divf %82, %83 : vector<8x128xf32>
    %85 = vector.extract_strided_slice %71 {offsets = [0, 256], sizes = [8, 128], strides = [1, 1]} : vector<8x512xf32> to vector<8x128xf32>
    %86 = math.tanh %85 : vector<8x128xf32>
    %87 = vector.extract_strided_slice %71 {offsets = [0, 384], sizes = [8, 128], strides = [1, 1]} : vector<8x512xf32> to vector<8x128xf32>
    %88 = arith.negf %87 : vector<8x128xf32>
    %89 = math.exp %88 : vector<8x128xf32>
    %cst_32 = arith.constant 1.000000e+00 : f32
    %90 = vector.broadcast %cst_32 : f32 to vector<8x128xf32>
    %91 = arith.addf %90, %89 : vector<8x128xf32>
    %92 = arith.divf %90, %91 : vector<8x128xf32>
    %93 = arith.mulf %84, %66 : vector<8x128xf32>
    %94 = arith.mulf %78, %86 : vector<8x128xf32>
    %95 = arith.addf %93, %94 : vector<8x128xf32>
    %96 = math.tanh %95 : vector<8x128xf32>
    %97 = arith.mulf %92, %96 : vector<8x128xf32>
    %c16_33 = arith.constant 16 : index
    %c0_34 = arith.constant 0 : index
    %98 = vector.load %arg12[%c16_33, %c0_34] : memref<64x128xf32, #tpu.memory_space<vmem>>, vector<8x128xf32>
    tpu.vector_store %arg12[%c16_33, %c0_34], %97 {strides = array<i32>} : memref<64x128xf32, #tpu.memory_space<vmem>>, vector<8x128xf32>,
    %cst_35 = arith.constant dense<0.000000e+00> : vector<8x512xf32>
    %99 = tpu.matmul %97, %1, %cst_35 {dimension_numbers = #tpu.dot_dimension_numbers<[1], [0], [0], [1], [0, 0, 1, 1], [], []>} : vector<8x128xf32>, vector<128x512xf32>, vector<8x512xf32> -> vector<8x512xf32>
    %100 = arith.addf %72, %99 : vector<8x512xf32>
    %c32 = arith.constant 32 : index
    %c0_36 = arith.constant 0 : index
    %101 = vector.load %arg11[%c32, %c0_36] : memref<64x512xf32, #tpu.memory_space<vmem>>, vector<8x512xf32>
    %102 = vector.extract_strided_slice %100 {offsets = [0, 0], sizes = [8, 128], strides = [1, 1]} : vector<8x512xf32> to vector<8x128xf32>
    %103 = arith.negf %102 : vector<8x128xf32>
    %104 = math.exp %103 : vector<8x128xf32>
    %cst_37 = arith.constant 1.000000e+00 : f32
    %105 = vector.broadcast %cst_37 : f32 to vector<8x128xf32>
    %106 = arith.addf %105, %104 : vector<8x128xf32>
    %107 = arith.divf %105, %106 : vector<8x128xf32>
    %108 = vector.extract_strided_slice %100 {offsets = [0, 128], sizes = [8, 128], strides = [1, 1]} : vector<8x512xf32> to vector<8x128xf32>
    %109 = arith.negf %108 : vector<8x128xf32>
    %110 = math.exp %109 : vector<8x128xf32>
    %cst_38 = arith.constant 1.000000e+00 : f32
    %111 = vector.broadcast %cst_38 : f32 to vector<8x128xf32>
    %112 = arith.addf %111, %110 : vector<8x128xf32>
    %113 = arith.divf %111, %112 : vector<8x128xf32>
    %114 = vector.extract_strided_slice %100 {offsets = [0, 256], sizes = [8, 128], strides = [1, 1]} : vector<8x512xf32> to vector<8x128xf32>
    %115 = math.tanh %114 : vector<8x128xf32>
    %116 = vector.extract_strided_slice %100 {offsets = [0, 384], sizes = [8, 128], strides = [1, 1]} : vector<8x512xf32> to vector<8x128xf32>
    %117 = arith.negf %116 : vector<8x128xf32>
    %118 = math.exp %117 : vector<8x128xf32>
    %cst_39 = arith.constant 1.000000e+00 : f32
    %119 = vector.broadcast %cst_39 : f32 to vector<8x128xf32>
    %120 = arith.addf %119, %118 : vector<8x128xf32>
    %121 = arith.divf %119, %120 : vector<8x128xf32>
    %122 = arith.mulf %113, %95 : vector<8x128xf32>
    %123 = arith.mulf %107, %115 : vector<8x128xf32>
    %124 = arith.addf %122, %123 : vector<8x128xf32>
    %125 = math.tanh %124 : vector<8x128xf32>
    %126 = arith.mulf %121, %125 : vector<8x128xf32>
    %c24_40 = arith.constant 24 : index
    %c0_41 = arith.constant 0 : index
    %127 = vector.load %arg12[%c24_40, %c0_41] : memref<64x128xf32, #tpu.memory_space<vmem>>, vector<8x128xf32>
    tpu.vector_store %arg12[%c24_40, %c0_41], %126 {strides = array<i32>} : memref<64x128xf32, #tpu.memory_space<vmem>>, vector<8x128xf32>,
    %cst_42 = arith.constant dense<0.000000e+00> : vector<8x512xf32>
    %128 = tpu.matmul %126, %1, %cst_42 {dimension_numbers = #tpu.dot_dimension_numbers<[1], [0], [0], [1], [0, 0, 1, 1], [], []>} : vector<8x128xf32>, vector<128x512xf32>, vector<8x512xf32> -> vector<8x512xf32>
    %129 = arith.addf %101, %128 : vector<8x512xf32>
    %c40 = arith.constant 40 : index
    %c0_43 = arith.constant 0 : index
    %130 = vector.load %arg11[%c40, %c0_43] : memref<64x512xf32, #tpu.memory_space<vmem>>, vector<8x512xf32>
    %131 = vector.extract_strided_slice %129 {offsets = [0, 0], sizes = [8, 128], strides = [1, 1]} : vector<8x512xf32> to vector<8x128xf32>
    %132 = arith.negf %131 : vector<8x128xf32>
    %133 = math.exp %132 : vector<8x128xf32>
    %cst_44 = arith.constant 1.000000e+00 : f32
    %134 = vector.broadcast %cst_44 : f32 to vector<8x128xf32>
    %135 = arith.addf %134, %133 : vector<8x128xf32>
    %136 = arith.divf %134, %135 : vector<8x128xf32>
    %137 = vector.extract_strided_slice %129 {offsets = [0, 128], sizes = [8, 128], strides = [1, 1]} : vector<8x512xf32> to vector<8x128xf32>
    %138 = arith.negf %137 : vector<8x128xf32>
    %139 = math.exp %138 : vector<8x128xf32>
    %cst_45 = arith.constant 1.000000e+00 : f32
    %140 = vector.broadcast %cst_45 : f32 to vector<8x128xf32>
    %141 = arith.addf %140, %139 : vector<8x128xf32>
    %142 = arith.divf %140, %141 : vector<8x128xf32>
    %143 = vector.extract_strided_slice %129 {offsets = [0, 256], sizes = [8, 128], strides = [1, 1]} : vector<8x512xf32> to vector<8x128xf32>
    %144 = math.tanh %143 : vector<8x128xf32>
    %145 = vector.extract_strided_slice %129 {offsets = [0, 384], sizes = [8, 128], strides = [1, 1]} : vector<8x512xf32> to vector<8x128xf32>
    %146 = arith.negf %145 : vector<8x128xf32>
    %147 = math.exp %146 : vector<8x128xf32>
    %cst_46 = arith.constant 1.000000e+00 : f32
    %148 = vector.broadcast %cst_46 : f32 to vector<8x128xf32>
    %149 = arith.addf %148, %147 : vector<8x128xf32>
    %150 = arith.divf %148, %149 : vector<8x128xf32>
    %151 = arith.mulf %142, %124 : vector<8x128xf32>
    %152 = arith.mulf %136, %144 : vector<8x128xf32>
    %153 = arith.addf %151, %152 : vector<8x128xf32>
    %154 = math.tanh %153 : vector<8x128xf32>
    %155 = arith.mulf %150, %154 : vector<8x128xf32>
    %c32_47 = arith.constant 32 : index
    %c0_48 = arith.constant 0 : index
    %156 = vector.load %arg12[%c32_47, %c0_48] : memref<64x128xf32, #tpu.memory_space<vmem>>, vector<8x128xf32>
    tpu.vector_store %arg12[%c32_47, %c0_48], %155 {strides = array<i32>} : memref<64x128xf32, #tpu.memory_space<vmem>>, vector<8x128xf32>,
    %cst_49 = arith.constant dense<0.000000e+00> : vector<8x512xf32>
    %157 = tpu.matmul %155, %1, %cst_49 {dimension_numbers = #tpu.dot_dimension_numbers<[1], [0], [0], [1], [0, 0, 1, 1], [], []>} : vector<8x128xf32>, vector<128x512xf32>, vector<8x512xf32> -> vector<8x512xf32>
    %158 = arith.addf %130, %157 : vector<8x512xf32>
    %c48 = arith.constant 48 : index
    %c0_50 = arith.constant 0 : index
    %159 = vector.load %arg11[%c48, %c0_50] : memref<64x512xf32, #tpu.memory_space<vmem>>, vector<8x512xf32>
    %160 = vector.extract_strided_slice %158 {offsets = [0, 0], sizes = [8, 128], strides = [1, 1]} : vector<8x512xf32> to vector<8x128xf32>
    %161 = arith.negf %160 : vector<8x128xf32>
    %162 = math.exp %161 : vector<8x128xf32>
    %cst_51 = arith.constant 1.000000e+00 : f32
    %163 = vector.broadcast %cst_51 : f32 to vector<8x128xf32>
    %164 = arith.addf %163, %162 : vector<8x128xf32>
    %165 = arith.divf %163, %164 : vector<8x128xf32>
    %166 = vector.extract_strided_slice %158 {offsets = [0, 128], sizes = [8, 128], strides = [1, 1]} : vector<8x512xf32> to vector<8x128xf32>
    %167 = arith.negf %166 : vector<8x128xf32>
    %168 = math.exp %167 : vector<8x128xf32>
    %cst_52 = arith.constant 1.000000e+00 : f32
    %169 = vector.broadcast %cst_52 : f32 to vector<8x128xf32>
    %170 = arith.addf %169, %168 : vector<8x128xf32>
    %171 = arith.divf %169, %170 : vector<8x128xf32>
    %172 = vector.extract_strided_slice %158 {offsets = [0, 256], sizes = [8, 128], strides = [1, 1]} : vector<8x512xf32> to vector<8x128xf32>
    %173 = math.tanh %172 : vector<8x128xf32>
    %174 = vector.extract_strided_slice %158 {offsets = [0, 384], sizes = [8, 128], strides = [1, 1]} : vector<8x512xf32> to vector<8x128xf32>
    %175 = arith.negf %174 : vector<8x128xf32>
    %176 = math.exp %175 : vector<8x128xf32>
    %cst_53 = arith.constant 1.000000e+00 : f32
    %177 = vector.broadcast %cst_53 : f32 to vector<8x128xf32>
    %178 = arith.addf %177, %176 : vector<8x128xf32>
    %179 = arith.divf %177, %178 : vector<8x128xf32>
    %180 = arith.mulf %171, %153 : vector<8x128xf32>
    %181 = arith.mulf %165, %173 : vector<8x128xf32>
    %182 = arith.addf %180, %181 : vector<8x128xf32>
    %183 = math.tanh %182 : vector<8x128xf32>
    %184 = arith.mulf %179, %183 : vector<8x128xf32>
    %c40_54 = arith.constant 40 : index
    %c0_55 = arith.constant 0 : index
    %185 = vector.load %arg12[%c40_54, %c0_55] : memref<64x128xf32, #tpu.memory_space<vmem>>, vector<8x128xf32>
    tpu.vector_store %arg12[%c40_54, %c0_55], %184 {strides = array<i32>} : memref<64x128xf32, #tpu.memory_space<vmem>>, vector<8x128xf32>,
    %cst_56 = arith.constant dense<0.000000e+00> : vector<8x512xf32>
    %186 = tpu.matmul %184, %1, %cst_56 {dimension_numbers = #tpu.dot_dimension_numbers<[1], [0], [0], [1], [0, 0, 1, 1], [], []>} : vector<8x128xf32>, vector<128x512xf32>, vector<8x512xf32> -> vector<8x512xf32>
    %187 = arith.addf %159, %186 : vector<8x512xf32>
    %c56 = arith.constant 56 : index
    %c0_57 = arith.constant 0 : index
    %188 = vector.load %arg11[%c56, %c0_57] : memref<64x512xf32, #tpu.memory_space<vmem>>, vector<8x512xf32>
    %189 = vector.extract_strided_slice %187 {offsets = [0, 0], sizes = [8, 128], strides = [1, 1]} : vector<8x512xf32> to vector<8x128xf32>
    %190 = arith.negf %189 : vector<8x128xf32>
    %191 = math.exp %190 : vector<8x128xf32>
    %cst_58 = arith.constant 1.000000e+00 : f32
    %192 = vector.broadcast %cst_58 : f32 to vector<8x128xf32>
    %193 = arith.addf %192, %191 : vector<8x128xf32>
    %194 = arith.divf %192, %193 : vector<8x128xf32>
    %195 = vector.extract_strided_slice %187 {offsets = [0, 128], sizes = [8, 128], strides = [1, 1]} : vector<8x512xf32> to vector<8x128xf32>
    %196 = arith.negf %195 : vector<8x128xf32>
    %197 = math.exp %196 : vector<8x128xf32>
    %cst_59 = arith.constant 1.000000e+00 : f32
    %198 = vector.broadcast %cst_59 : f32 to vector<8x128xf32>
    %199 = arith.addf %198, %197 : vector<8x128xf32>
    %200 = arith.divf %198, %199 : vector<8x128xf32>
    %201 = vector.extract_strided_slice %187 {offsets = [0, 256], sizes = [8, 128], strides = [1, 1]} : vector<8x512xf32> to vector<8x128xf32>
    %202 = math.tanh %201 : vector<8x128xf32>
    %203 = vector.extract_strided_slice %187 {offsets = [0, 384], sizes = [8, 128], strides = [1, 1]} : vector<8x512xf32> to vector<8x128xf32>
    %204 = arith.negf %203 : vector<8x128xf32>
    %205 = math.exp %204 : vector<8x128xf32>
    %cst_60 = arith.constant 1.000000e+00 : f32
    %206 = vector.broadcast %cst_60 : f32 to vector<8x128xf32>
    %207 = arith.addf %206, %205 : vector<8x128xf32>
    %208 = arith.divf %206, %207 : vector<8x128xf32>
    %209 = arith.mulf %200, %182 : vector<8x128xf32>
    %210 = arith.mulf %194, %202 : vector<8x128xf32>
    %211 = arith.addf %209, %210 : vector<8x128xf32>
    %212 = math.tanh %211 : vector<8x128xf32>
    %213 = arith.mulf %208, %212 : vector<8x128xf32>
    %c48_61 = arith.constant 48 : index
    %c0_62 = arith.constant 0 : index
    %214 = vector.load %arg12[%c48_61, %c0_62] : memref<64x128xf32, #tpu.memory_space<vmem>>, vector<8x128xf32>
    tpu.vector_store %arg12[%c48_61, %c0_62], %213 {strides = array<i32>} : memref<64x128xf32, #tpu.memory_space<vmem>>, vector<8x128xf32>,
    %cst_63 = arith.constant dense<0.000000e+00> : vector<8x512xf32>
    %215 = tpu.matmul %213, %1, %cst_63 {dimension_numbers = #tpu.dot_dimension_numbers<[1], [0], [0], [1], [0, 0, 1, 1], [], []>} : vector<8x128xf32>, vector<128x512xf32>, vector<8x512xf32> -> vector<8x512xf32>
    %216 = arith.addf %188, %215 : vector<8x512xf32>
    %217 = vector.extract_strided_slice %216 {offsets = [0, 0], sizes = [8, 128], strides = [1, 1]} : vector<8x512xf32> to vector<8x128xf32>
    %218 = arith.negf %217 : vector<8x128xf32>
    %219 = math.exp %218 : vector<8x128xf32>
    %cst_64 = arith.constant 1.000000e+00 : f32
    %220 = vector.broadcast %cst_64 : f32 to vector<8x128xf32>
    %221 = arith.addf %220, %219 : vector<8x128xf32>
    %222 = arith.divf %220, %221 : vector<8x128xf32>
    %223 = vector.extract_strided_slice %216 {offsets = [0, 128], sizes = [8, 128], strides = [1, 1]} : vector<8x512xf32> to vector<8x128xf32>
    %224 = arith.negf %223 : vector<8x128xf32>
    %225 = math.exp %224 : vector<8x128xf32>
    %cst_65 = arith.constant 1.000000e+00 : f32
    %226 = vector.broadcast %cst_65 : f32 to vector<8x128xf32>
    %227 = arith.addf %226, %225 : vector<8x128xf32>
    %228 = arith.divf %226, %227 : vector<8x128xf32>
    %229 = vector.extract_strided_slice %216 {offsets = [0, 256], sizes = [8, 128], strides = [1, 1]} : vector<8x512xf32> to vector<8x128xf32>
    %230 = math.tanh %229 : vector<8x128xf32>
    %231 = vector.extract_strided_slice %216 {offsets = [0, 384], sizes = [8, 128], strides = [1, 1]} : vector<8x512xf32> to vector<8x128xf32>
    %232 = arith.negf %231 : vector<8x128xf32>
    %233 = math.exp %232 : vector<8x128xf32>
    %cst_66 = arith.constant 1.000000e+00 : f32
    %234 = vector.broadcast %cst_66 : f32 to vector<8x128xf32>
    %235 = arith.addf %234, %233 : vector<8x128xf32>
    %236 = arith.divf %234, %235 : vector<8x128xf32>
    %237 = arith.mulf %228, %211 : vector<8x128xf32>
    %238 = arith.mulf %222, %230 : vector<8x128xf32>
    %239 = arith.addf %237, %238 : vector<8x128xf32>
    %240 = math.tanh %239 : vector<8x128xf32>
    %241 = arith.mulf %236, %240 : vector<8x128xf32>
    %c56_67 = arith.constant 56 : index
    %c0_68 = arith.constant 0 : index
    %242 = vector.load %arg12[%c56_67, %c0_68] : memref<64x128xf32, #tpu.memory_space<vmem>>, vector<8x128xf32>
    tpu.vector_store %arg12[%c56_67, %c0_68], %241 {strides = array<i32>} : memref<64x128xf32, #tpu.memory_space<vmem>>, vector<8x128xf32>,
    %c0_69 = arith.constant 0 : index
    %c0_70 = arith.constant 0 : index
    %243 = vector.load %arg5[%c0_69, %c0_70] : memref<128x512xf32, #tpu.memory_space<vmem>>, vector<128x512xf32>
    %c0_71 = arith.constant 0 : index
    %c0_72 = arith.constant 0 : index
    %244 = vector.load %arg6[%c0_71, %c0_72] : memref<128x512xf32, #tpu.memory_space<vmem>>, vector<128x512xf32>
    %c0_73 = arith.constant 0 : index
    %c0_74 = arith.constant 0 : index
    %245 = vector.load %arg7[%c0_73, %c0_74] : memref<1x512xf32, #tpu.memory_space<vmem>>, vector<1x512xf32>
    %cst_75 = arith.constant 0.000000e+00 : f32
    %246 = vector.broadcast %cst_75 : f32 to vector<8x128xf32>
    %cst_76 = arith.constant 0.000000e+00 : f32
    %247 = vector.broadcast %cst_76 : f32 to vector<8x128xf32>
    %c0_77 = arith.constant 0 : index
    %c0_78 = arith.constant 0 : index
    %248 = vector.load %arg12[%c0_77, %c0_78] : memref<64x128xf32, #tpu.memory_space<vmem>>, vector<64x128xf32>
    %cst_79 = arith.constant dense<0.000000e+00> : vector<64x512xf32>
    %249 = tpu.matmul %248, %243, %cst_79 {dimension_numbers = #tpu.dot_dimension_numbers<[1], [0], [0], [1], [0, 0, 1, 1], [], []>} : vector<64x128xf32>, vector<128x512xf32>, vector<64x512xf32> -> vector<64x512xf32>
    %250 = vector.broadcast %245 : vector<1x512xf32> to vector<64x512xf32>
    %251 = arith.addf %249, %250 : vector<64x512xf32>
    %c0_80 = arith.constant 0 : index
    %c0_81 = arith.constant 0 : index
    %252 = vector.load %arg11[%c0_80, %c0_81] : memref<64x512xf32, #tpu.memory_space<vmem>>, vector<64x512xf32>
    tpu.vector_store %arg11[%c0_80, %c0_81], %251 {strides = array<i32>} : memref<64x512xf32, #tpu.memory_space<vmem>>, vector<64x512xf32>,
    %c0_82 = arith.constant 0 : index
    %c0_83 = arith.constant 0 : index
    %253 = vector.load %arg11[%c0_82, %c0_83] : memref<64x512xf32, #tpu.memory_space<vmem>>, vector<8x512xf32>
    %cst_84 = arith.constant dense<0.000000e+00> : vector<8x512xf32>
    %254 = tpu.matmul %246, %244, %cst_84 {dimension_numbers = #tpu.dot_dimension_numbers<[1], [0], [0], [1], [0, 0, 1, 1], [], []>} : vector<8x128xf32>, vector<128x512xf32>, vector<8x512xf32> -> vector<8x512xf32>
    %255 = arith.addf %253, %254 : vector<8x512xf32>
    %c8_85 = arith.constant 8 : index
    %c0_86 = arith.constant 0 : index
    %256 = vector.load %arg11[%c8_85, %c0_86] : memref<64x512xf32, #tpu.memory_space<vmem>>, vector<8x512xf32>
    %257 = vector.extract_strided_slice %255 {offsets = [0, 0], sizes = [8, 128], strides = [1, 1]} : vector<8x512xf32> to vector<8x128xf32>
    %258 = arith.negf %257 : vector<8x128xf32>
    %259 = math.exp %258 : vector<8x128xf32>
    %cst_87 = arith.constant 1.000000e+00 : f32
    %260 = vector.broadcast %cst_87 : f32 to vector<8x128xf32>
    %261 = arith.addf %260, %259 : vector<8x128xf32>
    %262 = arith.divf %260, %261 : vector<8x128xf32>
    %263 = vector.extract_strided_slice %255 {offsets = [0, 128], sizes = [8, 128], strides = [1, 1]} : vector<8x512xf32> to vector<8x128xf32>
    %264 = arith.negf %263 : vector<8x128xf32>
    %265 = math.exp %264 : vector<8x128xf32>
    %cst_88 = arith.constant 1.000000e+00 : f32
    %266 = vector.broadcast %cst_88 : f32 to vector<8x128xf32>
    %267 = arith.addf %266, %265 : vector<8x128xf32>
    %268 = arith.divf %266, %267 : vector<8x128xf32>
    %269 = vector.extract_strided_slice %255 {offsets = [0, 256], sizes = [8, 128], strides = [1, 1]} : vector<8x512xf32> to vector<8x128xf32>
    %270 = math.tanh %269 : vector<8x128xf32>
    %271 = vector.extract_strided_slice %255 {offsets = [0, 384], sizes = [8, 128], strides = [1, 1]} : vector<8x512xf32> to vector<8x128xf32>
    %272 = arith.negf %271 : vector<8x128xf32>
    %273 = math.exp %272 : vector<8x128xf32>
    %cst_89 = arith.constant 1.000000e+00 : f32
    %274 = vector.broadcast %cst_89 : f32 to vector<8x128xf32>
    %275 = arith.addf %274, %273 : vector<8x128xf32>
    %276 = arith.divf %274, %275 : vector<8x128xf32>
    %277 = arith.mulf %268, %247 : vector<8x128xf32>
    %278 = arith.mulf %262, %270 : vector<8x128xf32>
    %279 = arith.addf %277, %278 : vector<8x128xf32>
    %280 = math.tanh %279 : vector<8x128xf32>
    %281 = arith.mulf %276, %280 : vector<8x128xf32>
    %c0_90 = arith.constant 0 : index
    %c0_91 = arith.constant 0 : index
    %282 = vector.load %arg12[%c0_90, %c0_91] : memref<64x128xf32, #tpu.memory_space<vmem>>, vector<8x128xf32>
    tpu.vector_store %arg12[%c0_90, %c0_91], %281 {strides = array<i32>} : memref<64x128xf32, #tpu.memory_space<vmem>>, vector<8x128xf32>,
    %cst_92 = arith.constant dense<0.000000e+00> : vector<8x512xf32>
    %283 = tpu.matmul %281, %244, %cst_92 {dimension_numbers = #tpu.dot_dimension_numbers<[1], [0], [0], [1], [0, 0, 1, 1], [], []>} : vector<8x128xf32>, vector<128x512xf32>, vector<8x512xf32> -> vector<8x512xf32>
    %284 = arith.addf %256, %283 : vector<8x512xf32>
    %c16_93 = arith.constant 16 : index
    %c0_94 = arith.constant 0 : index
    %285 = vector.load %arg11[%c16_93, %c0_94] : memref<64x512xf32, #tpu.memory_space<vmem>>, vector<8x512xf32>
    %286 = vector.extract_strided_slice %284 {offsets = [0, 0], sizes = [8, 128], strides = [1, 1]} : vector<8x512xf32> to vector<8x128xf32>
    %287 = arith.negf %286 : vector<8x128xf32>
    %288 = math.exp %287 : vector<8x128xf32>
    %cst_95 = arith.constant 1.000000e+00 : f32
    %289 = vector.broadcast %cst_95 : f32 to vector<8x128xf32>
    %290 = arith.addf %289, %288 : vector<8x128xf32>
    %291 = arith.divf %289, %290 : vector<8x128xf32>
    %292 = vector.extract_strided_slice %284 {offsets = [0, 128], sizes = [8, 128], strides = [1, 1]} : vector<8x512xf32> to vector<8x128xf32>
    %293 = arith.negf %292 : vector<8x128xf32>
    %294 = math.exp %293 : vector<8x128xf32>
    %cst_96 = arith.constant 1.000000e+00 : f32
    %295 = vector.broadcast %cst_96 : f32 to vector<8x128xf32>
    %296 = arith.addf %295, %294 : vector<8x128xf32>
    %297 = arith.divf %295, %296 : vector<8x128xf32>
    %298 = vector.extract_strided_slice %284 {offsets = [0, 256], sizes = [8, 128], strides = [1, 1]} : vector<8x512xf32> to vector<8x128xf32>
    %299 = math.tanh %298 : vector<8x128xf32>
    %300 = vector.extract_strided_slice %284 {offsets = [0, 384], sizes = [8, 128], strides = [1, 1]} : vector<8x512xf32> to vector<8x128xf32>
    %301 = arith.negf %300 : vector<8x128xf32>
    %302 = math.exp %301 : vector<8x128xf32>
    %cst_97 = arith.constant 1.000000e+00 : f32
    %303 = vector.broadcast %cst_97 : f32 to vector<8x128xf32>
    %304 = arith.addf %303, %302 : vector<8x128xf32>
    %305 = arith.divf %303, %304 : vector<8x128xf32>
    %306 = arith.mulf %297, %279 : vector<8x128xf32>
    %307 = arith.mulf %291, %299 : vector<8x128xf32>
    %308 = arith.addf %306, %307 : vector<8x128xf32>
    %309 = math.tanh %308 : vector<8x128xf32>
    %310 = arith.mulf %305, %309 : vector<8x128xf32>
    %c8_98 = arith.constant 8 : index
    %c0_99 = arith.constant 0 : index
    %311 = vector.load %arg12[%c8_98, %c0_99] : memref<64x128xf32, #tpu.memory_space<vmem>>, vector<8x128xf32>
    tpu.vector_store %arg12[%c8_98, %c0_99], %310 {strides = array<i32>} : memref<64x128xf32, #tpu.memory_space<vmem>>, vector<8x128xf32>,
    %cst_100 = arith.constant dense<0.000000e+00> : vector<8x512xf32>
    %312 = tpu.matmul %310, %244, %cst_100 {dimension_numbers = #tpu.dot_dimension_numbers<[1], [0], [0], [1], [0, 0, 1, 1], [], []>} : vector<8x128xf32>, vector<128x512xf32>, vector<8x512xf32> -> vector<8x512xf32>
    %313 = arith.addf %285, %312 : vector<8x512xf32>
    %c24_101 = arith.constant 24 : index
    %c0_102 = arith.constant 0 : index
    %314 = vector.load %arg11[%c24_101, %c0_102] : memref<64x512xf32, #tpu.memory_space<vmem>>, vector<8x512xf32>
    %315 = vector.extract_strided_slice %313 {offsets = [0, 0], sizes = [8, 128], strides = [1, 1]} : vector<8x512xf32> to vector<8x128xf32>
    %316 = arith.negf %315 : vector<8x128xf32>
    %317 = math.exp %316 : vector<8x128xf32>
    %cst_103 = arith.constant 1.000000e+00 : f32
    %318 = vector.broadcast %cst_103 : f32 to vector<8x128xf32>
    %319 = arith.addf %318, %317 : vector<8x128xf32>
    %320 = arith.divf %318, %319 : vector<8x128xf32>
    %321 = vector.extract_strided_slice %313 {offsets = [0, 128], sizes = [8, 128], strides = [1, 1]} : vector<8x512xf32> to vector<8x128xf32>
    %322 = arith.negf %321 : vector<8x128xf32>
    %323 = math.exp %322 : vector<8x128xf32>
    %cst_104 = arith.constant 1.000000e+00 : f32
    %324 = vector.broadcast %cst_104 : f32 to vector<8x128xf32>
    %325 = arith.addf %324, %323 : vector<8x128xf32>
    %326 = arith.divf %324, %325 : vector<8x128xf32>
    %327 = vector.extract_strided_slice %313 {offsets = [0, 256], sizes = [8, 128], strides = [1, 1]} : vector<8x512xf32> to vector<8x128xf32>
    %328 = math.tanh %327 : vector<8x128xf32>
    %329 = vector.extract_strided_slice %313 {offsets = [0, 384], sizes = [8, 128], strides = [1, 1]} : vector<8x512xf32> to vector<8x128xf32>
    %330 = arith.negf %329 : vector<8x128xf32>
    %331 = math.exp %330 : vector<8x128xf32>
    %cst_105 = arith.constant 1.000000e+00 : f32
    %332 = vector.broadcast %cst_105 : f32 to vector<8x128xf32>
    %333 = arith.addf %332, %331 : vector<8x128xf32>
    %334 = arith.divf %332, %333 : vector<8x128xf32>
    %335 = arith.mulf %326, %308 : vector<8x128xf32>
    %336 = arith.mulf %320, %328 : vector<8x128xf32>
    %337 = arith.addf %335, %336 : vector<8x128xf32>
    %338 = math.tanh %337 : vector<8x128xf32>
    %339 = arith.mulf %334, %338 : vector<8x128xf32>
    %c16_106 = arith.constant 16 : index
    %c0_107 = arith.constant 0 : index
    %340 = vector.load %arg12[%c16_106, %c0_107] : memref<64x128xf32, #tpu.memory_space<vmem>>, vector<8x128xf32>
    tpu.vector_store %arg12[%c16_106, %c0_107], %339 {strides = array<i32>} : memref<64x128xf32, #tpu.memory_space<vmem>>, vector<8x128xf32>,
    %cst_108 = arith.constant dense<0.000000e+00> : vector<8x512xf32>
    %341 = tpu.matmul %339, %244, %cst_108 {dimension_numbers = #tpu.dot_dimension_numbers<[1], [0], [0], [1], [0, 0, 1, 1], [], []>} : vector<8x128xf32>, vector<128x512xf32>, vector<8x512xf32> -> vector<8x512xf32>
    %342 = arith.addf %314, %341 : vector<8x512xf32>
    %c32_109 = arith.constant 32 : index
    %c0_110 = arith.constant 0 : index
    %343 = vector.load %arg11[%c32_109, %c0_110] : memref<64x512xf32, #tpu.memory_space<vmem>>, vector<8x512xf32>
    %344 = vector.extract_strided_slice %342 {offsets = [0, 0], sizes = [8, 128], strides = [1, 1]} : vector<8x512xf32> to vector<8x128xf32>
    %345 = arith.negf %344 : vector<8x128xf32>
    %346 = math.exp %345 : vector<8x128xf32>
    %cst_111 = arith.constant 1.000000e+00 : f32
    %347 = vector.broadcast %cst_111 : f32 to vector<8x128xf32>
    %348 = arith.addf %347, %346 : vector<8x128xf32>
    %349 = arith.divf %347, %348 : vector<8x128xf32>
    %350 = vector.extract_strided_slice %342 {offsets = [0, 128], sizes = [8, 128], strides = [1, 1]} : vector<8x512xf32> to vector<8x128xf32>
    %351 = arith.negf %350 : vector<8x128xf32>
    %352 = math.exp %351 : vector<8x128xf32>
    %cst_112 = arith.constant 1.000000e+00 : f32
    %353 = vector.broadcast %cst_112 : f32 to vector<8x128xf32>
    %354 = arith.addf %353, %352 : vector<8x128xf32>
    %355 = arith.divf %353, %354 : vector<8x128xf32>
    %356 = vector.extract_strided_slice %342 {offsets = [0, 256], sizes = [8, 128], strides = [1, 1]} : vector<8x512xf32> to vector<8x128xf32>
    %357 = math.tanh %356 : vector<8x128xf32>
    %358 = vector.extract_strided_slice %342 {offsets = [0, 384], sizes = [8, 128], strides = [1, 1]} : vector<8x512xf32> to vector<8x128xf32>
    %359 = arith.negf %358 : vector<8x128xf32>
    %360 = math.exp %359 : vector<8x128xf32>
    %cst_113 = arith.constant 1.000000e+00 : f32
    %361 = vector.broadcast %cst_113 : f32 to vector<8x128xf32>
    %362 = arith.addf %361, %360 : vector<8x128xf32>
    %363 = arith.divf %361, %362 : vector<8x128xf32>
    %364 = arith.mulf %355, %337 : vector<8x128xf32>
    %365 = arith.mulf %349, %357 : vector<8x128xf32>
    %366 = arith.addf %364, %365 : vector<8x128xf32>
    %367 = math.tanh %366 : vector<8x128xf32>
    %368 = arith.mulf %363, %367 : vector<8x128xf32>
    %c24_114 = arith.constant 24 : index
    %c0_115 = arith.constant 0 : index
    %369 = vector.load %arg12[%c24_114, %c0_115] : memref<64x128xf32, #tpu.memory_space<vmem>>, vector<8x128xf32>
    tpu.vector_store %arg12[%c24_114, %c0_115], %368 {strides = array<i32>} : memref<64x128xf32, #tpu.memory_space<vmem>>, vector<8x128xf32>,
    %cst_116 = arith.constant dense<0.000000e+00> : vector<8x512xf32>
    %370 = tpu.matmul %368, %244, %cst_116 {dimension_numbers = #tpu.dot_dimension_numbers<[1], [0], [0], [1], [0, 0, 1, 1], [], []>} : vector<8x128xf32>, vector<128x512xf32>, vector<8x512xf32> -> vector<8x512xf32>
    %371 = arith.addf %343, %370 : vector<8x512xf32>
    %c40_117 = arith.constant 40 : index
    %c0_118 = arith.constant 0 : index
    %372 = vector.load %arg11[%c40_117, %c0_118] : memref<64x512xf32, #tpu.memory_space<vmem>>, vector<8x512xf32>
    %373 = vector.extract_strided_slice %371 {offsets = [0, 0], sizes = [8, 128], strides = [1, 1]} : vector<8x512xf32> to vector<8x128xf32>
    %374 = arith.negf %373 : vector<8x128xf32>
    %375 = math.exp %374 : vector<8x128xf32>
    %cst_119 = arith.constant 1.000000e+00 : f32
    %376 = vector.broadcast %cst_119 : f32 to vector<8x128xf32>
    %377 = arith.addf %376, %375 : vector<8x128xf32>
    %378 = arith.divf %376, %377 : vector<8x128xf32>
    %379 = vector.extract_strided_slice %371 {offsets = [0, 128], sizes = [8, 128], strides = [1, 1]} : vector<8x512xf32> to vector<8x128xf32>
    %380 = arith.negf %379 : vector<8x128xf32>
    %381 = math.exp %380 : vector<8x128xf32>
    %cst_120 = arith.constant 1.000000e+00 : f32
    %382 = vector.broadcast %cst_120 : f32 to vector<8x128xf32>
    %383 = arith.addf %382, %381 : vector<8x128xf32>
    %384 = arith.divf %382, %383 : vector<8x128xf32>
    %385 = vector.extract_strided_slice %371 {offsets = [0, 256], sizes = [8, 128], strides = [1, 1]} : vector<8x512xf32> to vector<8x128xf32>
    %386 = math.tanh %385 : vector<8x128xf32>
    %387 = vector.extract_strided_slice %371 {offsets = [0, 384], sizes = [8, 128], strides = [1, 1]} : vector<8x512xf32> to vector<8x128xf32>
    %388 = arith.negf %387 : vector<8x128xf32>
    %389 = math.exp %388 : vector<8x128xf32>
    %cst_121 = arith.constant 1.000000e+00 : f32
    %390 = vector.broadcast %cst_121 : f32 to vector<8x128xf32>
    %391 = arith.addf %390, %389 : vector<8x128xf32>
    %392 = arith.divf %390, %391 : vector<8x128xf32>
    %393 = arith.mulf %384, %366 : vector<8x128xf32>
    %394 = arith.mulf %378, %386 : vector<8x128xf32>
    %395 = arith.addf %393, %394 : vector<8x128xf32>
    %396 = math.tanh %395 : vector<8x128xf32>
    %397 = arith.mulf %392, %396 : vector<8x128xf32>
    %c32_122 = arith.constant 32 : index
    %c0_123 = arith.constant 0 : index
    %398 = vector.load %arg12[%c32_122, %c0_123] : memref<64x128xf32, #tpu.memory_space<vmem>>, vector<8x128xf32>
    tpu.vector_store %arg12[%c32_122, %c0_123], %397 {strides = array<i32>} : memref<64x128xf32, #tpu.memory_space<vmem>>, vector<8x128xf32>,
    %cst_124 = arith.constant dense<0.000000e+00> : vector<8x512xf32>
    %399 = tpu.matmul %397, %244, %cst_124 {dimension_numbers = #tpu.dot_dimension_numbers<[1], [0], [0], [1], [0, 0, 1, 1], [], []>} : vector<8x128xf32>, vector<128x512xf32>, vector<8x512xf32> -> vector<8x512xf32>
    %400 = arith.addf %372, %399 : vector<8x512xf32>
    %c48_125 = arith.constant 48 : index
    %c0_126 = arith.constant 0 : index
    %401 = vector.load %arg11[%c48_125, %c0_126] : memref<64x512xf32, #tpu.memory_space<vmem>>, vector<8x512xf32>
    %402 = vector.extract_strided_slice %400 {offsets = [0, 0], sizes = [8, 128], strides = [1, 1]} : vector<8x512xf32> to vector<8x128xf32>
    %403 = arith.negf %402 : vector<8x128xf32>
    %404 = math.exp %403 : vector<8x128xf32>
    %cst_127 = arith.constant 1.000000e+00 : f32
    %405 = vector.broadcast %cst_127 : f32 to vector<8x128xf32>
    %406 = arith.addf %405, %404 : vector<8x128xf32>
    %407 = arith.divf %405, %406 : vector<8x128xf32>
    %408 = vector.extract_strided_slice %400 {offsets = [0, 128], sizes = [8, 128], strides = [1, 1]} : vector<8x512xf32> to vector<8x128xf32>
    %409 = arith.negf %408 : vector<8x128xf32>
    %410 = math.exp %409 : vector<8x128xf32>
    %cst_128 = arith.constant 1.000000e+00 : f32
    %411 = vector.broadcast %cst_128 : f32 to vector<8x128xf32>
    %412 = arith.addf %411, %410 : vector<8x128xf32>
    %413 = arith.divf %411, %412 : vector<8x128xf32>
    %414 = vector.extract_strided_slice %400 {offsets = [0, 256], sizes = [8, 128], strides = [1, 1]} : vector<8x512xf32> to vector<8x128xf32>
    %415 = math.tanh %414 : vector<8x128xf32>
    %416 = vector.extract_strided_slice %400 {offsets = [0, 384], sizes = [8, 128], strides = [1, 1]} : vector<8x512xf32> to vector<8x128xf32>
    %417 = arith.negf %416 : vector<8x128xf32>
    %418 = math.exp %417 : vector<8x128xf32>
    %cst_129 = arith.constant 1.000000e+00 : f32
    %419 = vector.broadcast %cst_129 : f32 to vector<8x128xf32>
    %420 = arith.addf %419, %418 : vector<8x128xf32>
    %421 = arith.divf %419, %420 : vector<8x128xf32>
    %422 = arith.mulf %413, %395 : vector<8x128xf32>
    %423 = arith.mulf %407, %415 : vector<8x128xf32>
    %424 = arith.addf %422, %423 : vector<8x128xf32>
    %425 = math.tanh %424 : vector<8x128xf32>
    %426 = arith.mulf %421, %425 : vector<8x128xf32>
    %c40_130 = arith.constant 40 : index
    %c0_131 = arith.constant 0 : index
    %427 = vector.load %arg12[%c40_130, %c0_131] : memref<64x128xf32, #tpu.memory_space<vmem>>, vector<8x128xf32>
    tpu.vector_store %arg12[%c40_130, %c0_131], %426 {strides = array<i32>} : memref<64x128xf32, #tpu.memory_space<vmem>>, vector<8x128xf32>,
    %cst_132 = arith.constant dense<0.000000e+00> : vector<8x512xf32>
    %428 = tpu.matmul %426, %244, %cst_132 {dimension_numbers = #tpu.dot_dimension_numbers<[1], [0], [0], [1], [0, 0, 1, 1], [], []>} : vector<8x128xf32>, vector<128x512xf32>, vector<8x512xf32> -> vector<8x512xf32>
    %429 = arith.addf %401, %428 : vector<8x512xf32>
    %c56_133 = arith.constant 56 : index
    %c0_134 = arith.constant 0 : index
    %430 = vector.load %arg11[%c56_133, %c0_134] : memref<64x512xf32, #tpu.memory_space<vmem>>, vector<8x512xf32>
    %431 = vector.extract_strided_slice %429 {offsets = [0, 0], sizes = [8, 128], strides = [1, 1]} : vector<8x512xf32> to vector<8x128xf32>
    %432 = arith.negf %431 : vector<8x128xf32>
    %433 = math.exp %432 : vector<8x128xf32>
    %cst_135 = arith.constant 1.000000e+00 : f32
    %434 = vector.broadcast %cst_135 : f32 to vector<8x128xf32>
    %435 = arith.addf %434, %433 : vector<8x128xf32>
    %436 = arith.divf %434, %435 : vector<8x128xf32>
    %437 = vector.extract_strided_slice %429 {offsets = [0, 128], sizes = [8, 128], strides = [1, 1]} : vector<8x512xf32> to vector<8x128xf32>
    %438 = arith.negf %437 : vector<8x128xf32>
    %439 = math.exp %438 : vector<8x128xf32>
    %cst_136 = arith.constant 1.000000e+00 : f32
    %440 = vector.broadcast %cst_136 : f32 to vector<8x128xf32>
    %441 = arith.addf %440, %439 : vector<8x128xf32>
    %442 = arith.divf %440, %441 : vector<8x128xf32>
    %443 = vector.extract_strided_slice %429 {offsets = [0, 256], sizes = [8, 128], strides = [1, 1]} : vector<8x512xf32> to vector<8x128xf32>
    %444 = math.tanh %443 : vector<8x128xf32>
    %445 = vector.extract_strided_slice %429 {offsets = [0, 384], sizes = [8, 128], strides = [1, 1]} : vector<8x512xf32> to vector<8x128xf32>
    %446 = arith.negf %445 : vector<8x128xf32>
    %447 = math.exp %446 : vector<8x128xf32>
    %cst_137 = arith.constant 1.000000e+00 : f32
    %448 = vector.broadcast %cst_137 : f32 to vector<8x128xf32>
    %449 = arith.addf %448, %447 : vector<8x128xf32>
    %450 = arith.divf %448, %449 : vector<8x128xf32>
    %451 = arith.mulf %442, %424 : vector<8x128xf32>
    %452 = arith.mulf %436, %444 : vector<8x128xf32>
    %453 = arith.addf %451, %452 : vector<8x128xf32>
    %454 = math.tanh %453 : vector<8x128xf32>
    %455 = arith.mulf %450, %454 : vector<8x128xf32>
    %c48_138 = arith.constant 48 : index
    %c0_139 = arith.constant 0 : index
    %456 = vector.load %arg12[%c48_138, %c0_139] : memref<64x128xf32, #tpu.memory_space<vmem>>, vector<8x128xf32>
    tpu.vector_store %arg12[%c48_138, %c0_139], %455 {strides = array<i32>} : memref<64x128xf32, #tpu.memory_space<vmem>>, vector<8x128xf32>,
    %cst_140 = arith.constant dense<0.000000e+00> : vector<8x512xf32>
    %457 = tpu.matmul %455, %244, %cst_140 {dimension_numbers = #tpu.dot_dimension_numbers<[1], [0], [0], [1], [0, 0, 1, 1], [], []>} : vector<8x128xf32>, vector<128x512xf32>, vector<8x512xf32> -> vector<8x512xf32>
    %458 = arith.addf %430, %457 : vector<8x512xf32>
    %459 = vector.extract_strided_slice %458 {offsets = [0, 0], sizes = [8, 128], strides = [1, 1]} : vector<8x512xf32> to vector<8x128xf32>
    %460 = arith.negf %459 : vector<8x128xf32>
    %461 = math.exp %460 : vector<8x128xf32>
    %cst_141 = arith.constant 1.000000e+00 : f32
    %462 = vector.broadcast %cst_141 : f32 to vector<8x128xf32>
    %463 = arith.addf %462, %461 : vector<8x128xf32>
    %464 = arith.divf %462, %463 : vector<8x128xf32>
    %465 = vector.extract_strided_slice %458 {offsets = [0, 128], sizes = [8, 128], strides = [1, 1]} : vector<8x512xf32> to vector<8x128xf32>
    %466 = arith.negf %465 : vector<8x128xf32>
    %467 = math.exp %466 : vector<8x128xf32>
    %cst_142 = arith.constant 1.000000e+00 : f32
    %468 = vector.broadcast %cst_142 : f32 to vector<8x128xf32>
    %469 = arith.addf %468, %467 : vector<8x128xf32>
    %470 = arith.divf %468, %469 : vector<8x128xf32>
    %471 = vector.extract_strided_slice %458 {offsets = [0, 256], sizes = [8, 128], strides = [1, 1]} : vector<8x512xf32> to vector<8x128xf32>
    %472 = math.tanh %471 : vector<8x128xf32>
    %473 = vector.extract_strided_slice %458 {offsets = [0, 384], sizes = [8, 128], strides = [1, 1]} : vector<8x512xf32> to vector<8x128xf32>
    %474 = arith.negf %473 : vector<8x128xf32>
    %475 = math.exp %474 : vector<8x128xf32>
    %cst_143 = arith.constant 1.000000e+00 : f32
    %476 = vector.broadcast %cst_143 : f32 to vector<8x128xf32>
    %477 = arith.addf %476, %475 : vector<8x128xf32>
    %478 = arith.divf %476, %477 : vector<8x128xf32>
    %479 = arith.mulf %470, %453 : vector<8x128xf32>
    %480 = arith.mulf %464, %472 : vector<8x128xf32>
    %481 = arith.addf %479, %480 : vector<8x128xf32>
    %482 = math.tanh %481 : vector<8x128xf32>
    %483 = arith.mulf %478, %482 : vector<8x128xf32>
    %c56_144 = arith.constant 56 : index
    %c0_145 = arith.constant 0 : index
    %484 = vector.load %arg12[%c56_144, %c0_145] : memref<64x128xf32, #tpu.memory_space<vmem>>, vector<8x128xf32>
    tpu.vector_store %arg12[%c56_144, %c0_145], %483 {strides = array<i32>} : memref<64x128xf32, #tpu.memory_space<vmem>>, vector<8x128xf32>,
    %c0_146 = arith.constant 0 : index
    %c0_147 = arith.constant 0 : index
    %485 = vector.load %arg12[%c0_146, %c0_147] : memref<64x128xf32, #tpu.memory_space<vmem>>, vector<64x128xf32>
    %c0_148 = arith.constant 0 : index
    %c0_149 = arith.constant 0 : index
    %486 = vector.load %arg8[%c0_148, %c0_149] : memref<128x128xf32, #tpu.memory_space<vmem>>, vector<128x128xf32>
    %cst_150 = arith.constant dense<0.000000e+00> : vector<64x128xf32>
    %487 = tpu.matmul %485, %486, %cst_150 {dimension_numbers = #tpu.dot_dimension_numbers<[1], [0], [0], [1], [0, 0, 1, 1], [], []>} : vector<64x128xf32>, vector<128x128xf32>, vector<64x128xf32> -> vector<64x128xf32>
    %c0_151 = arith.constant 0 : index
    %c0_152 = arith.constant 0 : index
    %488 = vector.load %arg9[%c0_151, %c0_152] : memref<1x128xf32, #tpu.memory_space<vmem>>, vector<1x128xf32>
    %489 = vector.broadcast %488 : vector<1x128xf32> to vector<64x128xf32>
    %490 = arith.addf %487, %489 : vector<64x128xf32>
    %c0_153 = arith.constant 0 : index
    %c0_154 = arith.constant 0 : index
    %c0_155 = arith.constant 0 : index
    %491 = vector.load %arg10[%c0_153, %c0_154, %c0_155] : memref<1x64x128xf32, #tpu.memory_space<vmem>>, vector<1x64x128xf32>
    %492 = vector.shape_cast %491 : vector<1x64x128xf32> to vector<64x128xf32>
    %493 = vector.shape_cast %490 : vector<64x128xf32> to vector<1x64x128xf32>
    tpu.vector_store %arg10[%c0_153, %c0_154, %c0_155], %493 {strides = array<i32>} : memref<1x64x128xf32, #tpu.memory_space<vmem>>, vector<1x64x128xf32>,
    return
  }
  func.func @transform_0(%arg0: i32) -> (i32, i32, i32) {
    %c0_i32 = arith.constant 0 : i32
    %c0_i32_0 = arith.constant 0 : i32
    %c0_i32_1 = arith.constant 0 : i32
    return %arg0, %c0_i32, %c0_i32_0 : i32, i32, i32
  }
  func.func @transform_1(%arg0: i32) -> (i32, i32) {
    %c0_i32 = arith.constant 0 : i32
    %c0_i32_0 = arith.constant 0 : i32
    %c0_i32_1 = arith.constant 0 : i32
    return %c0_i32, %c0_i32_0 : i32, i32
  }
  func.func @transform_2(%arg0: i32) -> (i32, i32) {
    %c0_i32 = arith.constant 0 : i32
    %c0_i32_0 = arith.constant 0 : i32
    %c0_i32_1 = arith.constant 0 : i32
    return %c0_i32, %c0_i32_0 : i32, i32
  }
  func.func @transform_3(%arg0: i32) -> (i32, i32) {
    %c0_i32 = arith.constant 0 : i32
    %c0_i32_0 = arith.constant 0 : i32
    %c0_i32_1 = arith.constant 0 : i32
    return %c0_i32, %c0_i32_0 : i32, i32
  }
  func.func @transform_4(%arg0: i32) -> (i32, i32) {
    %c0_i32 = arith.constant 0 : i32
    %c0_i32_0 = arith.constant 0 : i32
    %c0_i32_1 = arith.constant 0 : i32
    return %c0_i32, %c0_i32_0 : i32, i32
  }
  func.func @transform_5(%arg0: i32) -> (i32, i32) {
    %c0_i32 = arith.constant 0 : i32
    %c0_i32_0 = arith.constant 0 : i32
    %c0_i32_1 = arith.constant 0 : i32
    return %c0_i32, %c0_i32_0 : i32, i32
  }
  func.func @transform_6(%arg0: i32) -> (i32, i32) {
    %c0_i32 = arith.constant 0 : i32
    %c0_i32_0 = arith.constant 0 : i32
    %c0_i32_1 = arith.constant 0 : i32
    return %c0_i32, %c0_i32_0 : i32, i32
  }
  func.func @transform_7(%arg0: i32) -> (i32, i32) {
    %c0_i32 = arith.constant 0 : i32
    %c0_i32_0 = arith.constant 0 : i32
    %c0_i32_1 = arith.constant 0 : i32
    return %c0_i32, %c0_i32_0 : i32, i32
  }
  func.func @transform_8(%arg0: i32) -> (i32, i32) {
    %c0_i32 = arith.constant 0 : i32
    %c0_i32_0 = arith.constant 0 : i32
    %c0_i32_1 = arith.constant 0 : i32
    return %c0_i32, %c0_i32_0 : i32, i32
  }
  func.func @transform_9(%arg0: i32) -> (i32, i32, i32) {
    %c0_i32 = arith.constant 0 : i32
    %c0_i32_0 = arith.constant 0 : i32
    %c0_i32_1 = arith.constant 0 : i32
    return %arg0, %c0_i32, %c0_i32_0 : i32, i32, i32
  }
}

</mosaic_0001>

<bundles_post_ra>
// kernel: tpu_custom_call.1
= control target key start
LH: loop header
LB: loop body
LE: loop exit
PB: predicated region body
PF: predicated region fallthrough
CT: control target
= control target key end

     0   :  { %14 = vsyncpa [#allocation5], 0  ;;  %s6185_s0 = inlined_call_operand.hbm [shape: f32[1,64,128], index: 0, kind: input, shape index: {}]   ;;  %s6186_s1 = inlined_call_operand.hbm [shape: f32[128,512], index: 1, kind: input, shape index: {}]   ;;  %s6187_s2 = inlined_call_operand.hbm [shape: f32[128,512], index: 2, kind: input, shape index: {}]   ;;  %s6188_s3 = inlined_call_operand.hbm [shape: f32[1,512], index: 3, kind: input, shape index: {}]   ;;  %s6189_s4 = inlined_call_operand.hbm [shape: f32[128,512], index: 4, kind: input, shape index: {}]   ;;  %s6190_s5 = inlined_call_operand.hbm [shape: f32[128,512], index: 5, kind: input, shape index: {}]   ;;  %s6191_s6 = inlined_call_operand.vmem [shape: f32[1,512], index: 6, kind: input, shape index: {}]   ;;  %s6192_s7 = inlined_call_operand.hbm [shape: f32[128,128], index: 7, kind: input, shape index: {}]   ;;  %s6193_s8 = inlined_call_operand.vmem [shape: f32[1,128], index: 8, kind: input, shape index: {}]   ;;  %s6194_s9 = inlined_call_operand.hbm [shape: f32[1,64,128], index: 9, kind: output, shape index: {}]  }
   0x1   :  { %15 = vsyncpa [#allocation8], 0 }
   0x2   :  { %16 = vsyncpa [#allocation11], 0 }
   0x3   :  { %17 = vsyncpa [#allocation14], 0  ;;  %s36_s11 = sshll.u32 %s6186_s1, 4  ;;  %s37_s11 = int_to_ptr.hbm [resolvable:$true] %s36_s11 }
   0x4   :  { %18 = vsyncpa [#allocation6], 0  ;;  %s4034_s12 = smov [#allocation7]   ;;  %s63_s16 = sshll.u32 %s6188_s3, 4  ;;  %s64_s16 = int_to_ptr.hbm [resolvable:$true] %s63_s16 }
   0x5   :  { %s38_s13 = sshll.u32 %s4034_s12, 4  ;;  %s4035_s17 = smov 512   ;;  %s39_s13 = int_to_ptr.vmem [resolvable:$true] %s38_s13 }
   0x6   :  { %s4036_s18 = smov 32   ;;  %s4037_s19 = smov [#allocation10]  }
   0x7   :  { %44 = dma.hbm_to_vmem [thread:$0]  %s37_s11, 8192, %s39_s13, [#allocation8], %s4035_s17, %s4035_s17, %s4036_s18  }
   0x8   :  { %s65_s20 = sshll.u32 %s4037_s19, 4  ;;  %s86_s22 = sshll.u32 %s6190_s5, 4  ;;  %s66_s20 = int_to_ptr.vmem [resolvable:$true] %s65_s20  ;;  %s87_s22 = int_to_ptr.hbm [resolvable:$true] %s86_s22 }
   0x9   :  { %68 = dma.hbm_to_vmem [thread:$0]  %s64_s16, 64, %s66_s20, [#allocation11]  }
   0xa   :  { %s23_s3 = sshll.u32 %s6185_s0, 4  ;;  %s4038_s25 = smov [#allocation13]   ;;  %s24_s3 = int_to_ptr.hbm [resolvable:$true] %s23_s3 }
   0xb   :  { %s88_s26 = sshll.u32 %s4038_s25, 4  ;;  %s4039_s27 = smov [#allocation4]   ;;  %s89_s26 = int_to_ptr.vmem [resolvable:$true] %s88_s26 }
   0xc   :  { %94 = dma.hbm_to_vmem [thread:$0]  %s87_s22, 8192, %s89_s26, [#allocation14], %s4035_s17, %s4035_s17, %s4036_s18  }
   0xd   :  { %s25_s28 = sshll.u32 %s4039_s27, 4  ;;  %s4040_s29 = smov 128   ;;  %s26_s28 = int_to_ptr.vmem [resolvable:$true] %s25_s28 }
   0xe   :  { %s4041_s5 = smov 8   ;;  %s49_s0 = sshll.u32 %s6187_s2, 4  ;;  %s50_s0 = int_to_ptr.hbm [resolvable:$true] %s49_s0 }
   0xf   :  { %31 = dma.hbm_to_vmem [thread:$0]  %s24_s3, 1024, %s26_s28, [#allocation5], %s4040_s29, %s4040_s29, %s4041_s5  }
  0x10   :  { %s4042_s11 = smov [#allocation9]   ;;  %s73_s15 = sshll.u32 %s6189_s4, 4  ;;  %s74_s15 = int_to_ptr.hbm [resolvable:$true] %s73_s15 }
  0x11   :  { %s51_s12 = sshll.u32 %s4042_s11, 4  ;;  %s4043_s16 = smov [#allocation12]   ;;  %s52_s12 = int_to_ptr.vmem [resolvable:$true] %s51_s12 }
  0x12   :  { %57 = dma.hbm_to_vmem [thread:$0]  %s50_s0, 8192, %s52_s12, [#allocation8], %s4035_s17, %s4035_s17, %s4036_s18  }
  0x13   :  { %s75_s19 = sshll.u32 %s4043_s16, 4  ;;  %s101_s1 = sshll.u32 %s6192_s7, 4  ;;  %s76_s19 = int_to_ptr.vmem [resolvable:$true] %s75_s19  ;;  %s102_s1 = int_to_ptr.hbm [resolvable:$true] %s101_s1 }
  0x14   :  { %81 = dma.hbm_to_vmem [thread:$0]  %s74_s15, 8192, %s76_s19, [#allocation11], %s4035_s17, %s4035_s17, %s4036_s18  }
  0x15   :  { %s4044_s2 = smov [#allocation15]  }
  0x16   :  { %s103_s22 = sshll.u32 %s4044_s2, 4  ;;  %s104_s22 = int_to_ptr.vmem [resolvable:$true] %s103_s22 }
  0x17   :  { %109 = dma.hbm_to_vmem [thread:$0]  %s102_s1, 2048, %s104_s22, [#allocation14], %s4040_s29, %s4040_s29, %s4041_s5  }
  0x18   :  { %4024 = dma.done.wait [#allocation5], 1024  }
  0x19   :  { %4025 = vsyncadd [#allocation5], 4294966272 }
  0x1a   :  { %4026 = dma.done.wait [#allocation8], 16384  }
  0x1b   :  { %4027 = vsyncadd [#allocation8], 4294950912 }
  0x1c   :  { %4028 = dma.done.wait [#allocation11], 8256  }
  0x1d   :  { %4029 = vsyncadd [#allocation11], 4294959040 }
  0x1e   :  { %4030 = dma.done.wait [#allocation14], 10240  }
  0x1f   :  { %4031 = vsyncadd [#allocation14], 4294957056  ;;  %v200_v0 = vld [vmem:[#allocation7 + $0x1e0] sm:$0xff]  ;;  %v203_v1 = vld [vmem:[#allocation7 + $0x1f8] sm:$0xff]  ;;  %v6195_v57 = vmov 0.0   ;;  %s3339_s3 = sshll.u32 %s6194_s9, 4  ;;  %s3340_s3 = int_to_ptr.hbm [resolvable:$true] %s3339_s3 }
  0x20   :  { %v196_v2 = vld [vmem:[#allocation7 + $0x1c0] sm:$0xff]  ;;  %286 = vmatpush.msra.mxu1 %v200_v0  ;;  %3403 = vmatpush.msra.mxu2 %v200_v0  ;;  %v199_v3 = vld [vmem:[#allocation7 + $0x1d8] sm:$0xff]  ;;  %v201_v49 = vld [vmem:[#allocation7 + $0x1e8] sm:$0xff] }
  0x21   :  { %v4136_v4 = vld [vmem:[#allocation9 + $0x1e0] sm:$0xff]  ;;  %409 = vmatpush.msra.mxu3 %v203_v1  ;;  %v195_v7 = vld [vmem:[#allocation7 + $0x1b8] sm:$0xff]  ;;  %v202_v50 = vld [vmem:[#allocation7 + $0x1f0] sm:$0xff] }
  0x22   :  { %486 = vmatpush.msra.mxu0 %v4136_v4  ;;  %v192_v5 = vld [vmem:[#allocation7 + $0x1a0] sm:$0xff]  ;;  %287 = vmatpush.msra.mxu1 %v196_v2  ;;  %v191_v10 = vld [vmem:[#allocation7 + $0x198] sm:$0xff]  ;;  %v197_v52 = vld [vmem:[#allocation7 + $0x1c8] sm:$0xff] }
  0x23   :  { %v4139_v6 = vld [vmem:[#allocation9 + $0x1c0] sm:$0xff]  ;;  %3404 = vmatpush.msra.mxu2 %v196_v2  ;;  %410 = vmatpush.msra.mxu3 %v199_v3  ;;  %v187_v13 = vld [vmem:[#allocation7 + $0x178] sm:$0xff]  ;;  %v198_v53 = vld [vmem:[#allocation7 + $0x1d0] sm:$0xff] }
  0x24   :  { %v4141_v8 = vld [vmem:[#allocation9 + $0x1a0] sm:$0xff]  ;;  %487 = vmatpush.msra.mxu0 %v4139_v6  ;;  %288 = vmatpush.msra.mxu1 %v192_v5  ;;  %v183_v16 = vld [vmem:[#allocation7 + $0x158] sm:$0xff]  ;;  %v193_v54 = vld [vmem:[#allocation7 + $0x1a8] sm:$0xff] }
  0x25   :  { %v188_v9 = vld [vmem:[#allocation7 + $0x180] sm:$0xff]  ;;  %3405 = vmatpush.msra.mxu2 %v192_v5  ;;  %411 = vmatpush.msra.mxu3 %v195_v7  ;;  %v179_v19 = vld [vmem:[#allocation7 + $0x138] sm:$0xff]  ;;  %v194_v56 = vld [vmem:[#allocation7 + $0x1b0] sm:$0xff] }
  0x26   :  { %v4144_v11 = vld [vmem:[#allocation9 + $0x180] sm:$0xff]  ;;  %488 = vmatpush.msra.mxu0 %v4141_v8  ;;  %289 = vmatpush.msra.mxu1 %v188_v9  ;;  %v175_v22 = vld [vmem:[#allocation7 + $0x118] sm:$0xff]  ;;  %v189_v58 = vld [vmem:[#allocation7 + $0x188] sm:$0xff] }
  0x27   :  { %v184_v12 = vld [vmem:[#allocation7 + $0x160] sm:$0xff]  ;;  %3406 = vmatpush.msra.mxu2 %v188_v9  ;;  %412 = vmatpush.msra.mxu3 %v191_v10  ;;  %v171_v25 = vld [vmem:[#allocation7 + $0xf8] sm:$0xff]  ;;  %v190_v60 = vld [vmem:[#allocation7 + $0x190] sm:$0xff] }
  0x28   :  { %v4147_v14 = vld [vmem:[#allocation9 + $0x160] sm:$0xff]  ;;  %489 = vmatpush.msra.mxu0 %v4144_v11  ;;  %290 = vmatpush.msra.mxu1 %v184_v12  ;;  %v167_v28 = vld [vmem:[#allocation7 + $0xd8] sm:$0xff]  ;;  %v4196_v61 = vld [vmem:[#allocation4 + $0x8] sm:$0xff] }
  0x29   :  { %v180_v15 = vld [vmem:[#allocation7 + $0x140] sm:$0xff]  ;;  %3407 = vmatpush.msra.mxu2 %v184_v12  ;;  %413 = vmatpush.msra.mxu3 %v187_v13  ;;  %v163_v31 = vld [vmem:[#allocation7 + $0xb8] sm:$0xff]  ;;  %v4199_v62 = vld [vmem:[#allocation4 + $0x28] sm:$0xff] }
  0x2a   :  { %v4150_v17 = vld [vmem:[#allocation9 + $0x140] sm:$0xff]  ;;  %490 = vmatpush.msra.mxu0 %v4147_v14  ;;  %291 = vmatpush.msra.mxu1 %v180_v15  ;;  %v159_v34 = vld [vmem:[#allocation7 + $0x98] sm:$0xff]  ;;  %v185_v63 = vld [vmem:[#allocation7 + $0x168] sm:$0xff] }
  0x2b   :  { %v176_v18 = vld [vmem:[#allocation7 + $0x120] sm:$0xff]  ;;  %3408 = vmatpush.msra.mxu2 %v180_v15  ;;  %414 = vmatpush.msra.mxu3 %v183_v16  ;;  %v155_v37 = vld [vmem:[#allocation7 + $0x78] sm:$0xff]  ;;  %v186_v0 = vld [vmem:[#allocation7 + $0x170] sm:$0xff] }
  0x2c   :  { %v4153_v20 = vld [vmem:[#allocation9 + $0x120] sm:$0xff]  ;;  %491 = vmatpush.msra.mxu0 %v4150_v17  ;;  %292 = vmatpush.msra.mxu1 %v176_v18  ;;  %v151_v40 = vld [vmem:[#allocation7 + $0x58] sm:$0xff]  ;;  %v181_v1 = vld [vmem:[#allocation7 + $0x148] sm:$0xff] }
  0x2d   :  { %v172_v21 = vld [vmem:[#allocation7 + $0x100] sm:$0xff]  ;;  %3409 = vmatpush.msra.mxu2 %v176_v18  ;;  %415 = vmatpush.msra.mxu3 %v179_v19  ;;  %v147_v43 = vld [vmem:[#allocation7 + $0x38] sm:$0xff]  ;;  %v182_v3 = vld [vmem:[#allocation7 + $0x150] sm:$0xff] }
  0x2e   :  { %v4156_v23 = vld [vmem:[#allocation9 + $0x100] sm:$0xff]  ;;  %492 = vmatpush.msra.mxu0 %v4153_v20  ;;  %293 = vmatpush.msra.mxu1 %v172_v21  ;;  %v143_v46 = vld [vmem:[#allocation7 + $0x18] sm:$0xff]  ;;  %v177_v5 = vld [vmem:[#allocation7 + $0x128] sm:$0xff] }
  0x2f   :  { %v168_v24 = vld [vmem:[#allocation7 + $0xe0] sm:$0xff]  ;;  %3410 = vmatpush.msra.mxu2 %v172_v21  ;;  %416 = vmatpush.msra.mxu3 %v175_v22  ;;  %v4190_v55 = vld [vmem:[#allocation9 + $0x1f8] sm:$0xff]  ;;  %v178_v9 = vld [vmem:[#allocation7 + $0x130] sm:$0xff] }
  0x30   :  { %v4159_v26 = vld [vmem:[#allocation9 + $0xe0] sm:$0xff]  ;;  %493 = vmatpush.msra.mxu0 %v4156_v23  ;;  %294 = vmatpush.msra.mxu1 %v168_v24  ;;  %v4194_v59 = vld [vmem:[#allocation9 + $0x1d8] sm:$0xff]  ;;  %v173_v10 = vld [vmem:[#allocation7 + $0x108] sm:$0xff] }
  0x31   :  { %v164_v27 = vld [vmem:[#allocation7 + $0xc0] sm:$0xff]  ;;  %3411 = vmatpush.msra.mxu2 %v168_v24  ;;  %417 = vmatpush.msra.mxu3 %v171_v25  ;;  %v4204_v2 = vld [vmem:[#allocation9 + $0x1b8] sm:$0xff]  ;;  %v174_v13 = vld [vmem:[#allocation7 + $0x110] sm:$0xff] }
  0x32   :  { %v4162_v29 = vld [vmem:[#allocation9 + $0xc0] sm:$0xff]  ;;  %494 = vmatpush.msra.mxu0 %v4159_v26  ;;  %295 = vmatpush.msra.mxu1 %v164_v27  ;;  %v4208_v7 = vld [vmem:[#allocation9 + $0x198] sm:$0xff]  ;;  %v4214_v15 = vld [vmem:[#allocation4 + $0x10] sm:$0xff] }
  0x33   :  { %6429 = vst [vmem:[#allocation22_spill] sm:$0xff] %v4162_v29  ;;  %v160_v30 = vld [vmem:[#allocation7 + $0xa0] sm:$0xff]  ;;  %3412 = vmatpush.msra.mxu2 %v164_v27  ;;  %418 = vmatpush.msra.mxu3 %v167_v28  ;;  %v4211_v12 = vld [vmem:[#allocation9 + $0x178] sm:$0xff]  ;;  %v4217_v16 = vld [vmem:[#allocation4 + $0x30] sm:$0xff] }
  0x34   :  { %v4165_v32 = vld [vmem:[#allocation9 + $0xa0] sm:$0xff]  ;;  %495 = vmatpush.msra.mxu0 %v4162_v29  ;;  %296 = vmatpush.msra.mxu1 %v160_v30  ;;  %v169_v18 = vld [vmem:[#allocation7 + $0xe8] sm:$0xff]  ;;  %v170_v19 = vld [vmem:[#allocation7 + $0xf0] sm:$0xff] }
  0x35   :  { %6430 = vst [vmem:[#allocation23_spill] sm:$0xff] %v4165_v32  ;;  %v156_v33 = vld [vmem:[#allocation7 + $0x80] sm:$0xff]  ;;  %3413 = vmatpush.msra.mxu2 %v160_v30  ;;  %419 = vmatpush.msra.mxu3 %v163_v31  ;;  %v165_v21 = vld [vmem:[#allocation7 + $0xc8] sm:$0xff]  ;;  %v4222_v22 = vld [vmem:[#allocation9 + $0x158] sm:$0xff] }
  0x36   :  { %v4168_v35 = vld [vmem:[#allocation9 + $0x80] sm:$0xff]  ;;  %496 = vmatpush.msra.mxu0 %v4165_v32  ;;  %297 = vmatpush.msra.mxu1 %v156_v33  ;;  %v166_v24 = vld [vmem:[#allocation7 + $0xd0] sm:$0xff]  ;;  %v161_v25 = vld [vmem:[#allocation7 + $0xa8] sm:$0xff] }
  0x37   :  { %6431 = vst [vmem:[#allocation24_spill] sm:$0xff] %v4168_v35  ;;  %v152_v36 = vld [vmem:[#allocation7 + $0x60] sm:$0xff]  ;;  %3414 = vmatpush.msra.mxu2 %v156_v33  ;;  %420 = vmatpush.msra.mxu3 %v159_v34  ;;  %v4226_v27 = vld [vmem:[#allocation9 + $0x138] sm:$0xff]  ;;  %v162_v28 = vld [vmem:[#allocation7 + $0xb0] sm:$0xff] }
  0x38   :  { %v4171_v38 = vld [vmem:[#allocation9 + $0x60] sm:$0xff]  ;;  %497 = vmatpush.msra.mxu0 %v4168_v35  ;;  %298 = vmatpush.msra.mxu1 %v152_v36  ;;  %v157_v30 = vld [vmem:[#allocation7 + $0x88] sm:$0xff]  ;;  %v4229_v31 = vld [vmem:[#allocation9 + $0x118] sm:$0xff] }
  0x39   :  { %6432 = vst [vmem:[#allocation25_spill] sm:$0xff] %v4171_v38  ;;  %v148_v39 = vld [vmem:[#allocation7 + $0x40] sm:$0xff]  ;;  %3415 = vmatpush.msra.mxu2 %v152_v36  ;;  %421 = vmatpush.msra.mxu3 %v155_v37  ;;  %v158_v33 = vld [vmem:[#allocation7 + $0x90] sm:$0xff]  ;;  %v4232_v34 = vld [vmem:[#allocation4 + $0x18] sm:$0xff] }
  0x3a   :  { %v4174_v41 = vld [vmem:[#allocation9 + $0x40] sm:$0xff]  ;;  %498 = vmatpush.msra.mxu0 %v4171_v38  ;;  %299 = vmatpush.msra.mxu1 %v148_v39  ;;  %v4235_v36 = vld [vmem:[#allocation4 + $0x38] sm:$0xff]  ;;  %v153_v37 = vld [vmem:[#allocation7 + $0x68] sm:$0xff] }
  0x3b   :  { %6433 = vst [vmem:[#allocation26_spill] sm:$0xff] %v4174_v41  ;;  %v144_v42 = vld [vmem:[#allocation7 + $0x20] sm:$0xff]  ;;  %3416 = vmatpush.msra.mxu2 %v148_v39  ;;  %422 = vmatpush.msra.mxu3 %v151_v40  ;;  %v154_v39 = vld [vmem:[#allocation7 + $0x70] sm:$0xff]  ;;  %v149_v40 = vld [vmem:[#allocation7 + $0x48] sm:$0xff] }
  0x3c   :  { %v4177_v44 = vld [vmem:[#allocation9 + $0x20] sm:$0xff]  ;;  %499 = vmatpush.msra.mxu0 %v4174_v41  ;;  %300 = vmatpush.msra.mxu1 %v144_v42 }
  0x3d   :  { %v140_v45 = vld [vmem:[#allocation7] sm:$0xff]  ;;  %3417 = vmatpush.msra.mxu2 %v144_v42  ;;  %423 = vmatpush.msra.mxu3 %v147_v43  ;;  %v4240_v42 = vld [vmem:[#allocation9 + $0xf8] sm:$0xff]  ;;  %v150_v43 = vld [vmem:[#allocation7 + $0x50] sm:$0xff] }
  0x3e   :  { %v4180_v47 = vld [vmem:[#allocation4] sm:$0xff]  ;;  %500 = vmatpush.msra.mxu0 %v4177_v44  ;;  %301 = vmatpush.msra.mxu1 %v140_v45 }
  0x3f   :  { %v4183_v48 = vld [vmem:[#allocation4 + $0x20] sm:$0xff]  ;;  %3418 = vmatpush.msra.mxu2 %v140_v45  ;;  %424 = vmatpush.msra.mxu3 %v143_v46  ;;  %v145_v45 = vld [vmem:[#allocation7 + $0x28] sm:$0xff]  ;;  %v4244_v46 = vld [vmem:[#allocation9 + $0xd8] sm:$0xff] }
  0x40   :  { %302 = vmatmul.f32.vlgmr.msra.gmra.mxu1 %v4180_v47  ;;  %v4186_v51 = vld [vmem:[#allocation9] sm:$0xff]  ;;  %314 = vmatmul.f32.vlgmr.msra.gmra.mxu2 %v4183_v48 }
  0x41   :  { %6434 = vst [vmem:[#allocation27_spill] sm:$0xff] %v4186_v51  ;;  %327 = vmatpush.msrb.mxu1 %v201_v49  ;;  %425 = vmatmul.f32.vlgmr.msra.gmra.mxu3 %v4180_v47  ;;  %v146_v49 = vld [vmem:[#allocation7 + $0x30] sm:$0xff] }
  0x42   :  { %368 = vmatpush.msrb.mxu2 %v202_v50  ;;  %501 = vmatpush.msra.mxu0 %v4186_v51  ;;  %v141_v50 = vld [vmem:[#allocation7 + $0x8] sm:$0xff] }
  0x43   :  { %328 = vmatpush.msrb.mxu1 %v197_v52  ;;  %502 = vmatmul.f32.vlgmr.msra.gmra.mxu0 %v6195_v57  ;;  %v4247_v52 = vld [vmem:[#allocation9 + $0xb8] sm:$0xff]  ;;  %v4366_v57 = vld [vmem:[#allocation9 + $0x70] sm:$0xff] }
  0x44   :  { %369 = vmatpush.msrb.mxu2 %v198_v53  ;;  %546 = vmatpush.msrb.mxu3 %v4190_v55  ;;  %v142_v53 = vld [vmem:[#allocation7 + $0x10] sm:$0xff]  ;;  %6440 = vst [vmem:[#allocation33_spill] sm:$0xff] %v4366_v57 }
  0x45   :  { %329 = vmatpush.msrb.mxu1 %v193_v54  ;;  %638 = vmatpush.msrb.mxu0 %v4136_v4  ;;  %v4251_v54 = vld [vmem:[#allocation9 + $0x1e8] sm:$0xff] }
  0x46   :  { %370 = vmatpush.msrb.mxu2 %v194_v56  ;;  %547 = vmatpush.msrb.mxu3 %v4194_v59  ;;  %v4254_v56 = vld [vmem:[#allocation9 + $0x1f0] sm:$0xff] }
  0x47   :  { %330 = vmatpush.msrb.mxu1 %v189_v58  ;;  %639 = vmatpush.msrb.mxu0 %v4139_v6  ;;  %v4258_v58 = vld [vmem:[#allocation9 + $0x1c8] sm:$0xff] }
  0x48   :  { %371 = vmatpush.msrb.mxu2 %v190_v60  ;;  %305 = vmatmul.f32.gmra.mxu1 %v4196_v61  ;;  %v4260_v60 = vld [vmem:[#allocation9 + $0x98] sm:$0xff] }
  0x49   :  { %317 = vmatmul.f32.gmra.mxu2 %v4199_v62  ;;  %331 = vmatpush.msrb.mxu1 %v185_v63  ;;  %v4264_v63 = vld [vmem:[#allocation9 + $0x1d0] sm:$0xff] }
  0x4a   :  { %428 = vmatmul.f32.gmra.mxu3 %v4196_v61  ;;  %372 = vmatpush.msrb.mxu2 %v186_v0  ;;  %v4267_v0 = vld [vmem:[#allocation9 + $0x1a8] sm:$0xff] }
  0x4b   :  { %332 = vmatpush.msrb.mxu1 %v181_v1  ;;  %548 = vmatpush.msrb.mxu3 %v4204_v2  ;;  %v4270_v1 = vld [vmem:[#allocation9 + $0x78] sm:$0xff] }
  0x4c   :  { %373 = vmatpush.msrb.mxu2 %v182_v3  ;;  %640 = vmatpush.msrb.mxu0 %v4141_v8  ;;  %6435 = vst [vmem:[#allocation28_spill] sm:$0xff] %v4270_v1  ;;  %v4273_v3 = vld [vmem:[#allocation9 + $0x1b0] sm:$0xff] }
  0x4d   :  { %333 = vmatpush.msrb.mxu1 %v177_v5  ;;  %549 = vmatpush.msrb.mxu3 %v4208_v7  ;;  %v4276_v5 = vld [vmem:[#allocation9 + $0x188] sm:$0xff] }
  0x4e   :  { %374 = vmatpush.msrb.mxu2 %v178_v9  ;;  %641 = vmatpush.msrb.mxu0 %v4144_v11  ;;  %v4284_v9 = vld [vmem:[#allocation9 + $0x190] sm:$0xff] }
  0x4f   :  { %334 = vmatpush.msrb.mxu1 %v173_v10  ;;  %550 = vmatpush.msrb.mxu3 %v4211_v12  ;;  %v4286_v10 = vld [vmem:[#allocation9 + $0x168] sm:$0xff] }
  0x50   :  { %375 = vmatpush.msrb.mxu2 %v174_v13  ;;  %308 = vmatmul.f32.gmra.mxu1 %v4214_v15  ;;  %v4292_v13 = vld [vmem:[#allocation9 + $0x170] sm:$0xff] }
  0x51   :  { %320 = vmatmul.f32.gmra.mxu2 %v4217_v16  ;;  %335 = vmatpush.msrb.mxu1 %v169_v18  ;;  %v4295_v18 = vld [vmem:[#allocation9 + $0x148] sm:$0xff] }
  0x52   :  { %431 = vmatmul.f32.gmra.mxu3 %v4214_v15  ;;  %376 = vmatpush.msrb.mxu2 %v170_v19  ;;  %v4298_v19 = vld [vmem:[#allocation9 + $0x38] sm:$0xff] }
  0x53   :  { %336 = vmatpush.msrb.mxu1 %v165_v21  ;;  %551 = vmatpush.msrb.mxu3 %v4222_v22  ;;  %6437 = vst [vmem:[#allocation30_spill] sm:$0xff] %v4298_v19  ;;  %v4302_v21 = vld [vmem:[#allocation9 + $0x150] sm:$0xff] }
  0x54   :  { %377 = vmatpush.msrb.mxu2 %v166_v24  ;;  %642 = vmatpush.msrb.mxu0 %v4147_v14  ;;  %v4305_v24 = vld [vmem:[#allocation9 + $0x128] sm:$0xff] }
  0x55   :  { %337 = vmatpush.msrb.mxu1 %v161_v25  ;;  %552 = vmatpush.msrb.mxu3 %v4226_v27  ;;  %v4308_v25 = vld [vmem:[#allocation9 + $0x18] sm:$0xff] }
  0x56   :  { %378 = vmatpush.msrb.mxu2 %v162_v28  ;;  %643 = vmatpush.msrb.mxu0 %v4150_v17  ;;  %6438 = vst [vmem:[#allocation31_spill] sm:$0xff] %v4308_v25  ;;  %v4312_v28 = vld [vmem:[#allocation9 + $0x130] sm:$0xff] }
  0x57   :  { %338 = vmatpush.msrb.mxu1 %v157_v30  ;;  %553 = vmatpush.msrb.mxu3 %v4229_v31  ;;  %v4314_v30 = vld [vmem:[#allocation9 + $0x108] sm:$0xff] }
  0x58   :  { %379 = vmatpush.msrb.mxu2 %v158_v33  ;;  %311 = vmatmul.f32.gmra.mxu1 %v4232_v34  ;;  %v4322_v33 = vld [vmem:[#allocation9 + $0xe8] sm:$0xff] }
  0x59   :  { %323 = vmatmul.f32.gmra.mxu2 %v4235_v36  ;;  %339 = vmatpush.msrb.mxu1 %v153_v37  ;;  %v4327_v37 = vld [vmem:[#allocation9 + $0xf0] sm:$0xff] }
  0x5a   :  { %434 = vmatmul.f32.gmra.mxu3 %v4232_v34  ;;  %380 = vmatpush.msrb.mxu2 %v154_v39  ;;  %v4331_v39 = vld [vmem:[#allocation9 + $0xc8] sm:$0xff] }
  0x5b   :  { %340 = vmatpush.msrb.mxu1 %v149_v40  ;;  %554 = vmatpush.msrb.mxu3 %v4240_v42  ;;  %v4336_v40 = vld [vmem:[#allocation9 + $0xd0] sm:$0xff] }
  0x5c   :  { %381 = vmatpush.msrb.mxu2 %v150_v43  ;;  %644 = vmatpush.msrb.mxu0 %v4153_v20  ;;  %v4339_v43 = vld [vmem:[#allocation9 + $0xa8] sm:$0xff] }
  0x5d   :  { %341 = vmatpush.msrb.mxu1 %v145_v45  ;;  %555 = vmatpush.msrb.mxu3 %v4244_v46  ;;  %v4343_v45 = vld [vmem:[#allocation9 + $0xb0] sm:$0xff] }
  0x5e   :  { %382 = vmatpush.msrb.mxu2 %v146_v49  ;;  %645 = vmatpush.msrb.mxu0 %v4156_v23  ;;  %v4346_v49 = vld [vmem:[#allocation9 + $0x88] sm:$0xff] }
  0x5f   :  { %342 = vmatpush.msrb.mxu1 %v141_v50  ;;  %556 = vmatpush.msrb.mxu3 %v4247_v52  ;;  %v4354_v50 = vld [vmem:[#allocation9 + $0x68] sm:$0xff] }
  0x60   :  { %383 = vmatpush.msrb.mxu2 %v142_v53  ;;  %343 = vmatmul.f32.vlgmr.msrb.gmra.mxu1 %v4180_v47  ;;  %v4361_v53 = vld [vmem:[#allocation9 + $0x48] sm:$0xff] }
  0x61   :  { %384 = vmatmul.f32.vlgmr.msrb.gmra.mxu2 %v4180_v47  ;;  %506 = vmatpush.msra.mxu1 %v4251_v54  ;;  %v4279_v47 = vld [vmem:[#allocation9 + $0x58] sm:$0xff]  ;;  %6439 = vst [vmem:[#allocation32_spill] sm:$0xff] %v4361_v53 }
  0x62   :  { %437 = vmatmul.f32.gmra.mxu3 %v4183_v48  ;;  %526 = vmatpush.msra.mxu2 %v4254_v56  ;;  %6436 = vst [vmem:[#allocation29_spill] sm:$0xff] %v4279_v47 }
  0x63   :  { %507 = vmatpush.msra.mxu1 %v4258_v58  ;;  %557 = vmatpush.msrb.mxu3 %v4260_v60 }
  0x64   :  { %527 = vmatpush.msra.mxu2 %v4264_v63  ;;  %646 = vmatpush.msrb.mxu0 %v4159_v26 }
  0x65   :  { %508 = vmatpush.msra.mxu1 %v4267_v0  ;;  %558 = vmatpush.msrb.mxu3 %v4270_v1 }
  0x66   :  { %528 = vmatpush.msra.mxu2 %v4273_v3  ;;  %647 = vmatpush.msrb.mxu0 %v4162_v29  ;;  %v4383_v29 = vld [vmem:[#allocation9 + $0x10] sm:$0xff] }
  0x67   :  { %509 = vmatpush.msra.mxu1 %v4276_v5  ;;  %559 = vmatpush.msrb.mxu3 %v4279_v47  ;;  %6445 = vst [vmem:[#allocation38_spill] sm:$0xff] %v4383_v29 }
  0x68   :  { %346 = vmatmul.f32.gmra.mxu1 %v4196_v61  ;;  %529 = vmatpush.msra.mxu2 %v4284_v9 }
  0x69   :  { %387 = vmatmul.f32.gmra.mxu2 %v4196_v61  ;;  %510 = vmatpush.msra.mxu1 %v4286_v10  ;;  %v4320_v61 = vld [vmem:[#allocation9 + $0x110] sm:$0xff] }
  0x6a   :  { %440 = vmatmul.f32.gmra.mxu3 %v4199_v62  ;;  %530 = vmatpush.msra.mxu2 %v4292_v13 }
  0x6b   :  { %511 = vmatpush.msra.mxu1 %v4295_v18  ;;  %560 = vmatpush.msrb.mxu3 %v4298_v19 }
  0x6c   :  { %531 = vmatpush.msra.mxu2 %v4302_v21  ;;  %648 = vmatpush.msrb.mxu0 %v4165_v32  ;;  %v4375_v32 = vld [vmem:[#allocation9 + $0x30] sm:$0xff] }
  0x6d   :  { %512 = vmatpush.msra.mxu1 %v4305_v24  ;;  %561 = vmatpush.msrb.mxu3 %v4308_v25  ;;  %6443 = vst [vmem:[#allocation36_spill] sm:$0xff] %v4375_v32 }
  0x6e   :  { %532 = vmatpush.msra.mxu2 %v4312_v28  ;;  %649 = vmatpush.msrb.mxu0 %v4168_v35  ;;  %v4368_v35 = vld [vmem:[#allocation9 + $0x50] sm:$0xff] }
  0x6f   :  { %698 = vmatpush.msra.mxu3 %v4190_v55  ;;  %513 = vmatpush.msra.mxu1 %v4314_v30  ;;  %6441 = vst [vmem:[#allocation34_spill] sm:$0xff] %v4368_v35 }
  0x70   :  { %349 = vmatmul.f32.gmra.mxu1 %v4214_v15  ;;  %533 = vmatpush.msra.mxu2 %v4320_v61 }
  0x71   :  { %390 = vmatmul.f32.gmra.mxu2 %v4214_v15  ;;  %514 = vmatpush.msra.mxu1 %v4322_v33  ;;  %v4351_v15 = vld [vmem:[#allocation9 + $0x90] sm:$0xff] }
  0x72   :  { %443 = vmatmul.f32.gmra.mxu3 %v4217_v16  ;;  %534 = vmatpush.msra.mxu2 %v4327_v37 }
  0x73   :  { %515 = vmatpush.msra.mxu1 %v4331_v39  ;;  %699 = vmatpush.msra.mxu3 %v4194_v59 }
  0x74   :  { %535 = vmatpush.msra.mxu2 %v4336_v40  ;;  %650 = vmatpush.msrb.mxu0 %v4171_v38  ;;  %v4371_v38 = vld [vmem:[#allocation9 + $0x28] sm:$0xff] }
  0x75   :  { %516 = vmatpush.msra.mxu1 %v4339_v43  ;;  %700 = vmatpush.msra.mxu3 %v4204_v2  ;;  %6442 = vst [vmem:[#allocation35_spill] sm:$0xff] %v4371_v38 }
  0x76   :  { %536 = vmatpush.msra.mxu2 %v4343_v45  ;;  %651 = vmatpush.msrb.mxu0 %v4174_v41  ;;  %v6446_v41 = vmov 0.0  }
  0x77   :  { %517 = vmatpush.msra.mxu1 %v4346_v49  ;;  %701 = vmatpush.msra.mxu3 %v4208_v7 }
  0x78   :  { %352 = vmatmul.f32.gmra.mxu1 %v4232_v34  ;;  %537 = vmatpush.msra.mxu2 %v4351_v15 }
  0x79   :  { %393 = vmatmul.f32.gmra.mxu2 %v4232_v34  ;;  %518 = vmatpush.msra.mxu1 %v4354_v50  ;;  %v4379_v34 = vld [vmem:[#allocation9 + $0x8] sm:$0xff] }
  0x7a   :  { %446 = vmatmul.f32.gmra.mxu3 %v4235_v36  ;;  %538 = vmatpush.msra.mxu2 %v4366_v57  ;;  %6444 = vst [vmem:[#allocation37_spill] sm:$0xff] %v4379_v34 }
  0x7b   :  { %519 = vmatpush.msra.mxu1 %v4361_v53  ;;  %702 = vmatpush.msra.mxu3 %v4211_v12 }
  0x7c   :  { %539 = vmatpush.msra.mxu2 %v4368_v35  ;;  %652 = vmatpush.msrb.mxu0 %v4177_v44 }
  0x7d   :  { %520 = vmatpush.msra.mxu1 %v4371_v38  ;;  %703 = vmatpush.msra.mxu3 %v4222_v22 }
  0x7e   :  { %540 = vmatpush.msra.mxu2 %v4375_v32  ;;  %653 = vmatpush.msrb.mxu0 %v4186_v51 }
  0x7f   :  { %521 = vmatpush.msra.mxu1 %v4379_v34  ;;  %704 = vmatpush.msra.mxu3 %v4226_v27 }
  0x80   :  { %355 = vmatmul.f32.gmra.mxu1 %v4183_v48  ;;  %541 = vmatpush.msra.mxu2 %v4383_v29 }
  0x81   :  { %396 = vmatmul.f32.gmra.mxu2 %v4183_v48  ;;  %658 = vmatpush.msrb.mxu1 %v4251_v54 }
  0x82   :  { %562 = vmatmul.f32.vlgmr.msrb.gmra.mxu3 %v6446_v41  ;;  %678 = vmatpush.msrb.mxu2 %v4254_v56 }
  0x83   :  { %659 = vmatpush.msrb.mxu1 %v4258_v58  ;;  %705 = vmatpush.msra.mxu3 %v4229_v31 }
  0x84   :  { %679 = vmatpush.msrb.mxu2 %v4264_v63  ;;  %790 = vmatpush.msra.mxu0 %v4136_v4  ;;  %v6447_v4 = vld [vmem:[#allocation22_spill] sm:$0xff] }
  0x85   :  { %660 = vmatpush.msrb.mxu1 %v4267_v0  ;;  %706 = vmatpush.msra.mxu3 %v4240_v42 }
  0x86   :  { %680 = vmatpush.msrb.mxu2 %v4273_v3  ;;  %791 = vmatpush.msra.mxu0 %v4139_v6  ;;  %v6448_v6 = vld [vmem:[#allocation23_spill] sm:$0xff] }
  0x87   :  { %661 = vmatpush.msrb.mxu1 %v4276_v5  ;;  %707 = vmatpush.msra.mxu3 %v4244_v46 }
  0x88   :  { %358 = vmatmul.f32.gmra.mxu1 %v4199_v62  ;;  %681 = vmatpush.msrb.mxu2 %v4284_v9 }
  0x89   :  { %399 = vmatmul.f32.gmra.mxu2 %v4199_v62  ;;  %662 = vmatpush.msrb.mxu1 %v4286_v10 }
  0x8a   :  { %682 = vmatpush.msrb.mxu2 %v4292_v13  ;;  %708 = vmatpush.msra.mxu3 %v4247_v52 }
  0x8b   :  { %663 = vmatpush.msrb.mxu1 %v4295_v18  ;;  %792 = vmatpush.msra.mxu0 %v4141_v8  ;;  %v6449_v8 = vld [vmem:[#allocation24_spill] sm:$0xff] }
  0x8c   :  { %683 = vmatpush.msrb.mxu2 %v4302_v21  ;;  %709 = vmatpush.msra.mxu3 %v4260_v60 }
  0x8d   :  { %664 = vmatpush.msrb.mxu1 %v4305_v24  ;;  %793 = vmatpush.msra.mxu0 %v4144_v11  ;;  %v6450_v11 = vld [vmem:[#allocation25_spill] sm:$0xff] }
  0x8e   :  { %684 = vmatpush.msrb.mxu2 %v4312_v28  ;;  %710 = vmatpush.msra.mxu3 %v4270_v1 }
  0x8f   :  { %665 = vmatpush.msrb.mxu1 %v4314_v30  ;;  %794 = vmatpush.msra.mxu0 %v4147_v14  ;;  %v6451_v14 = vld [vmem:[#allocation26_spill] sm:$0xff] }
  0x90   :  { %361 = vmatmul.f32.gmra.mxu1 %v4217_v16  ;;  %685 = vmatpush.msrb.mxu2 %v4320_v61 }
  0x91   :  { %402 = vmatmul.f32.gmra.mxu2 %v4217_v16  ;;  %666 = vmatpush.msrb.mxu1 %v4322_v33 }
  0x92   :  { %686 = vmatpush.msrb.mxu2 %v4327_v37  ;;  %711 = vmatpush.msra.mxu3 %v4279_v47 }
  0x93   :  { %667 = vmatpush.msrb.mxu1 %v4331_v39  ;;  %795 = vmatpush.msra.mxu0 %v4150_v17 }
  0x94   :  { %687 = vmatpush.msrb.mxu2 %v4336_v40  ;;  %712 = vmatpush.msra.mxu3 %v4298_v19 }
  0x95   :  { %668 = vmatpush.msrb.mxu1 %v4339_v43  ;;  %796 = vmatpush.msra.mxu0 %v4153_v20 }
  0x96   :  { %688 = vmatpush.msrb.mxu2 %v4343_v45  ;;  %713 = vmatpush.msra.mxu3 %v4308_v25 }
  0x97   :  { %669 = vmatpush.msrb.mxu1 %v4346_v49  ;;  %797 = vmatpush.msra.mxu0 %v4156_v23 }
  0x98   :  { %850 = vmatpush.msrb.mxu3 %v4190_v55  ;;  %364 = vmatmul.f32.gmra.mxu1 %v4235_v36 }
  0x99   :  { %689 = vmatpush.msrb.mxu2 %v4351_v15  ;;  %670 = vmatpush.msrb.mxu1 %v4354_v50 }
  0x9a   :  { %405 = vmatmul.f32.gmra.mxu2 %v4235_v36  ;;  %851 = vmatpush.msrb.mxu3 %v4194_v59 }
  0x9b   :  { %690 = vmatpush.msrb.mxu2 %v4366_v57  ;;  %671 = vmatpush.msrb.mxu1 %v4361_v53 }
  0x9c   :  { %852 = vmatpush.msrb.mxu3 %v4204_v2  ;;  %798 = vmatpush.msra.mxu0 %v4159_v26 }
  0x9d   :  { %691 = vmatpush.msrb.mxu2 %v4368_v35  ;;  %672 = vmatpush.msrb.mxu1 %v4371_v38 }
  0x9e   :  { %853 = vmatpush.msrb.mxu3 %v4208_v7  ;;  %799 = vmatpush.msra.mxu0 %v6447_v4 }
  0x9f   :  { %692 = vmatpush.msrb.mxu2 %v4375_v32  ;;  %673 = vmatpush.msrb.mxu1 %v4379_v34 }
  0xa0   :  { %522 = vmatmul.f32.vlgmr.msra.gmra.mxu1 %v6446_v41  ;;  %854 = vmatpush.msrb.mxu3 %v4211_v12 }
  0xa1   :  { %693 = vmatpush.msrb.mxu2 %v4383_v29  ;;  %810 = vmatpush.msra.mxu1 %v4251_v54 }
  0xa2   :  { %542 = vmatmul.f32.vlgmr.msra.gmra.mxu2 %v6446_v41  ;;  %855 = vmatpush.msrb.mxu3 %v4222_v22 }
  0xa3   :  { %830 = vmatpush.msra.mxu2 %v4254_v56  ;;  %811 = vmatpush.msra.mxu1 %v4258_v58 }
  0xa4   :  { %800 = vmatpush.msra.mxu0 %v6448_v6  ;;  %856 = vmatpush.msrb.mxu3 %v4226_v27 }
  0xa5   :  { %831 = vmatpush.msra.mxu2 %v4264_v63  ;;  %812 = vmatpush.msra.mxu1 %v4267_v0 }
  0xa6   :  { %801 = vmatpush.msra.mxu0 %v6449_v8  ;;  %857 = vmatpush.msrb.mxu3 %v4229_v31 }
  0xa7   :  { %832 = vmatpush.msra.mxu2 %v4273_v3  ;;  %813 = vmatpush.msra.mxu1 %v4276_v5 }
  0xa8   :  { %802 = vmatpush.msra.mxu0 %v6450_v11  ;;  %858 = vmatpush.msrb.mxu3 %v4240_v42 }
  0xa9   :  { %833 = vmatpush.msra.mxu2 %v4284_v9  ;;  %814 = vmatpush.msra.mxu1 %v4286_v10 }
  0xaa   :  { %803 = vmatpush.msra.mxu0 %v6451_v14  ;;  %859 = vmatpush.msrb.mxu3 %v4244_v46 }
  0xab   :  { %834 = vmatpush.msra.mxu2 %v4292_v13  ;;  %815 = vmatpush.msra.mxu1 %v4295_v18 }
  0xac   :  { %804 = vmatpush.msra.mxu0 %v4177_v44  ;;  %860 = vmatpush.msrb.mxu3 %v4247_v52 }
  0xad   :  { %835 = vmatpush.msra.mxu2 %v4302_v21  ;;  %816 = vmatpush.msra.mxu1 %v4305_v24 }
  0xae   :  { %805 = vmatpush.msra.mxu0 %v4186_v51  ;;  %861 = vmatpush.msrb.mxu3 %v4260_v60 }
  0xaf   :  { %836 = vmatpush.msra.mxu2 %v4312_v28  ;;  %817 = vmatpush.msra.mxu1 %v4314_v30 }
  0xb0   :  { %862 = vmatpush.msrb.mxu3 %v4270_v1 }
  0xb1   :  { %837 = vmatpush.msra.mxu2 %v4320_v61  ;;  %818 = vmatpush.msra.mxu1 %v4322_v33 }
  0xb2   :  { %863 = vmatpush.msrb.mxu3 %v4279_v47 }
  0xb3   :  { %838 = vmatpush.msra.mxu2 %v4327_v37  ;;  %819 = vmatpush.msra.mxu1 %v4331_v39 }
  0xb4   :  { %864 = vmatpush.msrb.mxu3 %v4298_v19 }
  0xb5   :  { %839 = vmatpush.msra.mxu2 %v4336_v40  ;;  %820 = vmatpush.msra.mxu1 %v4339_v43 }
  0xb6   :  { %865 = vmatpush.msrb.mxu3 %v4308_v25 }
  0xb7   :  { %840 = vmatpush.msra.mxu2 %v4343_v45  ;;  %821 = vmatpush.msra.mxu1 %v4346_v49 }
  0xb9   :  { %841 = vmatpush.msra.mxu2 %v4351_v15  ;;  %822 = vmatpush.msra.mxu1 %v4354_v50 }
  0xbb   :  { %842 = vmatpush.msra.mxu2 %v4366_v57  ;;  %823 = vmatpush.msra.mxu1 %v4361_v53 }
  0xbd   :  { %843 = vmatpush.msra.mxu2 %v4368_v35  ;;  %v303_v17 = vpop.f32.mrf.mxu1  ;;  %824 = vmatpush.msra.mxu1 %v4371_v38 }
  0xbf   :  { %844 = vmatpush.msra.mxu2 %v4375_v32  ;;  %825 = vmatpush.msra.mxu1 %v4379_v34 }
  0xc1   :  { %845 = vmatpush.msra.mxu2 %v4383_v29 }
  0xc3   :  { %v4508_v20 = vpop.f32.mrf.mxu2 }
  0xc4   :  { %6452 = vst [vmem:[#allocation22_spill] sm:$0xff] %v4508_v20  ;;  %v426_v23 = vpop.f32.mrf.mxu3 }
  0xc5   :  { %v4510_v26 = vpop.f32.mrf.mxu1 }
  0xc6   :  { %6453 = vst [vmem:[#allocation23_spill] sm:$0xff] %v4510_v26  ;;  %v268_v26 = vld [vmem:[#allocation10] sm:$0xf] }
  0xc7   :  { %v4573_v19 = vperm.slane %v268_v26, 2 }
  0xc9   :  { %6483 = vst [vmem:[#allocation65_spill] sm:$0xff] %v4573_v19 }
  0xcc   :  { %v4512_v44 = vpop.f32.mrf.mxu2 }
  0xcd   :  { %6454 = vst [vmem:[#allocation24_spill] sm:$0xff] %v4512_v44  ;;  %v4514_v48 = vpop.f32.mrf.mxu3  ;;  %v4516_v62 = vpop.f32.mrf.mxu1 }
  0xce   :  { %6455 = vst [vmem:[#allocation25_spill] sm:$0xff] %v4514_v48 }
  0xcf   :  { %6456 = vst [vmem:[#allocation26_spill] sm:$0xff] %v4516_v62 }
  0xd4   :  { %v4518_v16 = vpop.f32.mrf.mxu2 }
  0xd5   :  { %6457 = vst [vmem:[#allocation39_spill] sm:$0xff] %v4518_v16  ;;  %v4520_v36 = vpop.f32.mrf.mxu1  ;;  %v4522_v4 = vpop.f32.mrf.mxu3 }
  0xd6   :  { %6458 = vst [vmem:[#allocation40_spill] sm:$0xff] %v4520_v36 }
  0xd7   :  { %6459 = vst [vmem:[#allocation41_spill] sm:$0xff] %v4522_v4 }
  0xdc   :  { %v4524_v6 = vpop.f32.mrf.mxu2 }
  0xdd   :  { %6460 = vst [vmem:[#allocation42_spill] sm:$0xff] %v4524_v6  ;;  %v344_v8 = vpop.f32.mrf.mxu1  ;;  %v4526_v11 = vpop.f32.mrf.mxu3 }
  0xde   :  { %6461 = vst [vmem:[#allocation43_spill] sm:$0xff] %v4526_v11 }
  0xe4   :  { %v385_v14 = vpop.f32.mrf.mxu2 }
  0xe5   :  { %v4528_v41 = vpop.f32.mrf.mxu1  ;;  %v4530_v20 = vpop.f32.mrf.mxu3 }
  0xe6   :  { %6462 = vst [vmem:[#allocation44_spill] sm:$0xff] %v4528_v41  ;;  %v4548_v41 = vperm.slane %v268_v26, 0 }
  0xe7   :  { %6463 = vst [vmem:[#allocation45_spill] sm:$0xff] %v4530_v20 }
  0xe8   :  { %6472 = vst [vmem:[#allocation54_spill] sm:$0xff] %v4548_v41 }
  0xec   :  { %v4532_v44 = vpop.f32.mrf.mxu2 }
  0xed   :  { %6464 = vst [vmem:[#allocation46_spill] sm:$0xff] %v4532_v44  ;;  %v4534_v48 = vpop.f32.mrf.mxu1  ;;  %v4536_v62 = vpop.f32.mrf.mxu3 }
  0xee   :  { %6465 = vst [vmem:[#allocation47_spill] sm:$0xff] %v4534_v48  ;;  %v304_v48 = vadd.f32 %v303_v17, %v4548_v41  ;;  %v4566_v17 = vperm.slane %v268_v26, 1 }
  0xef   :  { %6466 = vst [vmem:[#allocation48_spill] sm:$0xff] %v4536_v62  ;;  %v503_v62 = vpop.f32.mrf.mxu0 }
  0xf0   :  { %6480 = vst [vmem:[#allocation62_spill] sm:$0xff] %v4566_v17 }
  0xf4   :  { %v4538_v16 = vpop.f32.mrf.mxu2 }
  0xf5   :  { %6467 = vst [vmem:[#allocation49_spill] sm:$0xff] %v4538_v16  ;;  %v4540_v36 = vpop.f32.mrf.mxu1  ;;  %v4546_v11 = vpop.f32.mrf.mxu3  ;;  %v566_v16 = vadd.f32 %v503_v62, %v304_v48 }
  0xf6   :  { %6468 = vst [vmem:[#allocation50_spill] sm:$0xff] %v4540_v36 }
  0xf7   :  { %6471 = vst [vmem:[#allocation53_spill] sm:$0xff] %v4546_v11 }
  0xfc   :  { %v4542_v4 = vpop.f32.mrf.mxu2 }
  0xfd   :  { %6469 = vst [vmem:[#allocation51_spill] sm:$0xff] %v4542_v4  ;;  %v4544_v6 = vpop.f32.mrf.mxu1  ;;  %v4555_v25 = vpop.f32.mrf.mxu3  ;;  %v3355_v4 = vmul.f32 -1.442695, %v566_v16  ;;  %v345_v16 = vadd.f32 %v344_v8, %v4566_v17  ;;  %v386_v8 = vadd.f32 %v385_v14, %v4573_v19 }
  0xfe   :  { %6470 = vst [vmem:[#allocation52_spill] sm:$0xff] %v4544_v6  ;;  %v4561_v6 = vperm.slane %v268_v26, 3 }
  0xff   :  { %6475 = vst [vmem:[#allocation57_spill] sm:$0xff] %v4555_v25  ;;  %3433 = vpow2.f32 %v3355_v4 }
 0x100   :  { %6478 = vst [vmem:[#allocation60_spill] sm:$0xff] %v4561_v6  ;;  %v427_v34 = vadd.f32 %v426_v23, %v4561_v6 }
 0x104   :  { %v4550_v20 = vpop.f32.mrf.mxu2 }
 0x105   :  { %6473 = vst [vmem:[#allocation55_spill] sm:$0xff] %v4550_v20  ;;  %v4552_v44 = vpop.f32.mrf.mxu1  ;;  %v563_v11 = vpop.f32.mrf.mxu3 }
 0x106   :  { %6474 = vst [vmem:[#allocation56_spill] sm:$0xff] %v4552_v44  ;;  %v569_v20 = vadd.f32 %v563_v11, %v427_v34  ;;  %v3434_v44 = vpop.eup %3433 }
 0x107   :  { %v577_v62 = vadd.f32 1.0, %v3434_v44 }
 0x108   :  { %v3357_v48 = vmul.f32 -1.442695, %v569_v20 }
 0x109   :  { %vm583_vm1 = vweird.f32 %v577_v62  ;;  %v589_v26 = vand.u32 2147483648, %v577_v62  ;;  %v587_v38 = vand.u32 2147483647, %v577_v62 }
 0x10a   :  { %3435 = vpow2.f32 %v3357_v48 }
 0x10b   :  { %3437 = vrcp.f32 %v577_v62  ;;  %v590_v19 = vor.u32 1.1754944e-38, %v589_v26  ;;  %vm588_vm6 = vcmp.eq.f32.partialorder %v587_v38, 8.507059e+37  ;;  %v6494_v26 = vld [vmem:[#allocation35_spill] sm:$0xff] }
 0x10c   :  { %v4559_v29 = vpop.f32.mrf.mxu2 }
 0x10d   :  { %v4557_v36 = vpop.f32.mrf.mxu1  ;;  %6477 = vst [vmem:[#allocation59_spill] sm:$0xff] %v4559_v29 }
 0x10e   :  { %6476 = vst [vmem:[#allocation58_spill] sm:$0xff] %v4557_v36 }
 0x110   :  { %v3436_v34 = vpop.eup %3435 }
 0x111   :  { %v3438_v23 = vpop.eup %3437  ;;  %v616_v11 = vadd.f32 1.0, %v3436_v34 }
 0x112   :  { %v579_v6 = vmul.f32 %v3438_v23, %v577_v62  ;;  %vm584_vm0 = vweird.f32 %v3438_v23 }
 0x113   :  { %vm585_vm3 = vmor %vm583_vm1, %vm584_vm0  ;;  %vm622_vm9 = vweird.f32 %v616_v11 }
 0x114   :  { %v4568_v41 = vpop.f32.mrf.mxu2  ;;  %v580_v20 = vsub.f32 1.0, %v579_v6 }
 0x115   :  { %v4564_v51 = vpop.f32.mrf.mxu1  ;;  %6481 = vst [vmem:[#allocation63_spill] sm:$0xff] %v4568_v41 }
 0x116   :  { %6479 = vst [vmem:[#allocation61_spill] sm:$0xff] %v4564_v51 }
 0x11d   :  { %v523_v25 = vpop.f32.mrf.mxu1  ;;  %v4571_v29 = vpop.f32.mrf.mxu2 }
 0x11e   :  { %v567_v36 = vadd.f32 %v523_v25, %v345_v16  ;;  %6482 = vst [vmem:[#allocation64_spill] sm:$0xff] %v4571_v29 }
 0x120   :  { %v3356_v4 = vmul.f32 -1.442695, %v567_v36  ;;  %v581_v36 = vmul.f32 %v3438_v23, %v580_v20 }
 0x122   :  { %3439 = vpow2.f32 %v3356_v4  ;;  %v582_v34 = vadd.f32 %v3438_v23, %v581_v36 }
 0x123   :  { %3441 = vrcp.f32 %v616_v11 }
 0x124   :  { %v586_v14 = vsel %vm585_vm3, %v3438_v23, %v582_v34  ;;  %v6492_v34 = vld [vmem:[#allocation29_spill] sm:$0xff] }
 0x125   :  { %v543_v44 = vpop.f32.mrf.mxu2  ;;  %v591_v36 = vsel %vm588_vm6, %v590_v19, %v586_v14  ;;  %v4597_v19 = vld [vmem:[#allocation9 + $0x1a0] sm:$0xff]  ;;  %v6497_v14 = vld [vmem:[#allocation27_spill] sm:$0xff] }
 0x126   :  { %v568_v25 = vadd.f32 %v543_v44, %v386_v8 }
 0x128   :  { %v3440_v51 = vpop.eup %3439 }
 0x129   :  { %v596_v41 = vadd.f32 1.0, %v3440_v51  ;;  %v3442_v48 = vpop.eup %3441 }
 0x12a   :  { %v618_v4 = vmul.f32 %v3442_v48, %v616_v11  ;;  %vm623_vm8 = vweird.f32 %v3442_v48 }
 0x12b   :  { %3443 = vrcp.f32 %v596_v41  ;;  %v608_v32 = vand.u32 2147483648, %v596_v41  ;;  %v606_v6 = vand.u32 2147483647, %v596_v41  ;;  %vm602_vm4 = vweird.f32 %v596_v41  ;;  %vm624_vm10 = vmor %vm622_vm9, %vm623_vm8 }
 0x12c   :  { %3445 = vtanh.f32 %v568_v25  ;;  %v619_v47 = vsub.f32 1.0, %v618_v4  ;;  %v628_v4 = vand.u32 2147483648, %v616_v11 }
 0x12d   :  { %v609_v8 = vor.u32 1.1754944e-38, %v608_v32  ;;  %vm607_vm7 = vcmp.eq.f32.partialorder %v606_v6, 8.507059e+37  ;;  %v6496_v6 = vld [vmem:[#allocation30_spill] sm:$0xff] }
 0x12e   :  { %v620_v25 = vmul.f32 %v3442_v48, %v619_v47  ;;  %v629_v23 = vor.u32 1.1754944e-38, %v628_v4  ;;  %v6504_v4 = vld [vmem:[#allocation44_spill] sm:$0xff] }
 0x130   :  { %v621_v1 = vadd.f32 %v3442_v48, %v620_v25  ;;  %v6502_v25 = vld [vmem:[#allocation23_spill] sm:$0xff] }
 0x131   :  { %v3444_v16 = vpop.eup %3443 }
 0x132   :  { %v598_v29 = vmul.f32 %v3444_v16, %v596_v41  ;;  %vm603_vm2 = vweird.f32 %v3444_v16  ;;  %v3446_v20 = vpop.eup %3445  ;;  %v626_v41 = vand.u32 2147483647, %v616_v11  ;;  %v625_v32 = vsel %vm624_vm10, %v3442_v48, %v621_v1  ;;  %v4591_v1 = vld [vmem:[#allocation9 + $0x1c0] sm:$0xff]  ;;  %v6490_v11 = vld [vmem:[#allocation32_spill] sm:$0xff] }
 0x133   :  { %vm604_vm5 = vmor %vm602_vm4, %vm603_vm2  ;;  %v6491_v48 = vld [vmem:[#allocation34_spill] sm:$0xff] }
 0x134   :  { %v599_v17 = vsub.f32 1.0, %v598_v29  ;;  %vm627_vm11 = vcmp.eq.f32.partialorder %v626_v41, 8.507059e+37 }
 0x136   :  { %v600_v51 = vmul.f32 %v3444_v16, %v599_v17  ;;  %v633_v17 = vmul.f32 %v3446_v20, %v591_v36  ;;  %v6499_v20 = vld [vmem:[#allocation38_spill] sm:$0xff] }
 0x138   :  { %v601_v44 = vadd.f32 %v3444_v16, %v600_v51  ;;  %v6495_v51 = vld [vmem:[#allocation36_spill] sm:$0xff] }
 0x13a   :  { %v605_v29 = vsel %vm604_vm5, %v3444_v16, %v601_v44  ;;  %v630_v16 = vsel %vm627_vm11, %v629_v23, %v625_v32  ;;  %v6498_v44 = vld [vmem:[#allocation37_spill] sm:$0xff] }
 0x13b   :  { %v610_v35 = vsel %vm607_vm7, %v609_v8, %v605_v29  ;;  %v6500_v8 = vld [vmem:[#allocation31_spill] sm:$0xff]  ;;  %v6501_v29 = vld [vmem:[#allocation54_spill] sm:$0xff] }
 0x13c   :  { %v632_v53 = vmul.f32 0.0, %v610_v35  ;;  %v4585_v35 = vld [vmem:[#allocation9 + $0x1e0] sm:$0xff]  ;;  %v307_v36 = vadd.f32 %v6502_v25, %v6501_v29 }
 0x13e   :  { %v4576_v62 = vadd.f32 %v633_v17, %v632_v53  ;;  %v6488_v53 = vld [vmem:[#allocation28_spill] sm:$0xff]  ;;  %v6503_v17 = vld [vmem:[#allocation62_spill] sm:$0xff] }
 0x13f   :  { %v348_v41 = vadd.f32 %v6504_v4, %v6503_v17 }
 0x140   :  { %3447 = vtanh.f32 %v4576_v62 }
 0x146   :  { %v3448_v38 = vpop.eup %3447 }
 0x147   :  { %v4579_v47 = vmul.f32 %v3448_v38, %v630_v16 }
 0x149   :  { %6484 = vst [vmem:[#allocation66_spill] sm:$0xff] %v4579_v47  ;;  %654 = vmatmul.f32.vlgmr.msrb.gmra.mxu0 %v4579_v47  ;;  %674 = vmatmul.f32.vlgmr.msrb.gmra.mxu1 %v4579_v47 }
 0x14a   :  { %694 = vmatmul.f32.vlgmr.msrb.gmra.mxu2 %v4579_v47  ;;  %714 = vmatmul.f32.vlgmr.msra.gmra.mxu3 %v4579_v47  ;;  %v6506_v47 = vld [vmem:[#allocation25_spill] sm:$0xff] }
 0x14b   :  { %942 = vmatpush.msrb.mxu0 %v4585_v35  ;;  %962 = vmatpush.msrb.mxu1 %v4251_v54 }
 0x14c   :  { %982 = vmatpush.msrb.mxu2 %v4254_v56  ;;  %1002 = vmatpush.msra.mxu3 %v4190_v55  ;;  %v4603_v55 = vld [vmem:[#allocation9 + $0x180] sm:$0xff] }
 0x14d   :  { %943 = vmatpush.msrb.mxu0 %v4591_v1  ;;  %963 = vmatpush.msrb.mxu1 %v4258_v58 }
 0x14e   :  { %983 = vmatpush.msrb.mxu2 %v4264_v63  ;;  %1003 = vmatpush.msra.mxu3 %v4194_v59  ;;  %v4609_v59 = vld [vmem:[#allocation9 + $0x160] sm:$0xff] }
 0x14f   :  { %944 = vmatpush.msrb.mxu0 %v4597_v19  ;;  %964 = vmatpush.msrb.mxu1 %v4267_v0 }
 0x150   :  { %984 = vmatpush.msrb.mxu2 %v4273_v3  ;;  %1004 = vmatpush.msra.mxu3 %v4204_v2  ;;  %v4615_v2 = vld [vmem:[#allocation9 + $0x140] sm:$0xff] }
 0x151   :  { %945 = vmatpush.msrb.mxu0 %v4603_v55  ;;  %965 = vmatpush.msrb.mxu1 %v4276_v5 }
 0x152   :  { %985 = vmatpush.msrb.mxu2 %v4284_v9  ;;  %1005 = vmatpush.msra.mxu3 %v4208_v7  ;;  %v4621_v7 = vld [vmem:[#allocation9 + $0x120] sm:$0xff] }
 0x153   :  { %946 = vmatpush.msrb.mxu0 %v4609_v59  ;;  %966 = vmatpush.msrb.mxu1 %v4286_v10 }
 0x154   :  { %986 = vmatpush.msrb.mxu2 %v4292_v13  ;;  %1006 = vmatpush.msra.mxu3 %v4211_v12  ;;  %v4627_v12 = vld [vmem:[#allocation9 + $0x100] sm:$0xff] }
 0x155   :  { %947 = vmatpush.msrb.mxu0 %v4615_v2  ;;  %967 = vmatpush.msrb.mxu1 %v4295_v18 }
 0x156   :  { %987 = vmatpush.msrb.mxu2 %v4302_v21  ;;  %1007 = vmatpush.msra.mxu3 %v4222_v22  ;;  %v4633_v22 = vld [vmem:[#allocation9 + $0xe0] sm:$0xff] }
 0x157   :  { %948 = vmatpush.msrb.mxu0 %v4621_v7  ;;  %968 = vmatpush.msrb.mxu1 %v4305_v24 }
 0x158   :  { %988 = vmatpush.msrb.mxu2 %v4312_v28  ;;  %1008 = vmatpush.msra.mxu3 %v4226_v27  ;;  %v4639_v27 = vld [vmem:[#allocation9 + $0xc0] sm:$0xff] }
 0x159   :  { %949 = vmatpush.msrb.mxu0 %v4627_v12  ;;  %969 = vmatpush.msrb.mxu1 %v4314_v30 }
 0x15a   :  { %989 = vmatpush.msrb.mxu2 %v4320_v61  ;;  %1009 = vmatpush.msra.mxu3 %v4229_v31  ;;  %v4645_v31 = vld [vmem:[#allocation9 + $0xa0] sm:$0xff] }
 0x15b   :  { %950 = vmatpush.msrb.mxu0 %v4633_v22  ;;  %970 = vmatpush.msrb.mxu1 %v4322_v33  ;;  %6485 = vst [vmem:[#allocation67_spill] sm:$0xff] %v4645_v31 }
 0x15c   :  { %990 = vmatpush.msrb.mxu2 %v4327_v37  ;;  %1010 = vmatpush.msra.mxu3 %v4240_v42  ;;  %v4651_v42 = vld [vmem:[#allocation9 + $0x80] sm:$0xff] }
 0x15d   :  { %951 = vmatpush.msrb.mxu0 %v4639_v27  ;;  %971 = vmatpush.msrb.mxu1 %v4331_v39  ;;  %6486 = vst [vmem:[#allocation68_spill] sm:$0xff] %v4651_v42 }
 0x15e   :  { %991 = vmatpush.msrb.mxu2 %v4336_v40  ;;  %1011 = vmatpush.msra.mxu3 %v4244_v46  ;;  %v4657_v46 = vld [vmem:[#allocation9 + $0x60] sm:$0xff] }
 0x15f   :  { %952 = vmatpush.msrb.mxu0 %v4645_v31  ;;  %972 = vmatpush.msrb.mxu1 %v4339_v43  ;;  %6487 = vst [vmem:[#allocation69_spill] sm:$0xff] %v4657_v46 }
 0x160   :  { %992 = vmatpush.msrb.mxu2 %v4343_v45  ;;  %1012 = vmatpush.msra.mxu3 %v4247_v52  ;;  %v4663_v52 = vld [vmem:[#allocation9 + $0x40] sm:$0xff] }
 0x161   :  { %953 = vmatpush.msrb.mxu0 %v4651_v42  ;;  %973 = vmatpush.msrb.mxu1 %v4346_v49  ;;  %6489 = vst [vmem:[#allocation28_spill] sm:$0xff] %v4663_v52 }
 0x162   :  { %993 = vmatpush.msrb.mxu2 %v4351_v15  ;;  %1013 = vmatpush.msra.mxu3 %v4260_v60  ;;  %v4669_v60 = vld [vmem:[#allocation9 + $0x20] sm:$0xff] }
 0x163   :  { %954 = vmatpush.msrb.mxu0 %v4657_v46  ;;  %974 = vmatpush.msrb.mxu1 %v4354_v50  ;;  %6493 = vst [vmem:[#allocation29_spill] sm:$0xff] %v4669_v60 }
 0x164   :  { %994 = vmatpush.msrb.mxu2 %v4366_v57  ;;  %1014 = vmatpush.msra.mxu3 %v6488_v53 }
 0x165   :  { %955 = vmatpush.msrb.mxu0 %v4663_v52  ;;  %975 = vmatpush.msrb.mxu1 %v6490_v11 }
 0x166   :  { %995 = vmatpush.msrb.mxu2 %v6491_v48  ;;  %1015 = vmatpush.msra.mxu3 %v6492_v34 }
 0x167   :  { %956 = vmatpush.msrb.mxu0 %v4669_v60  ;;  %976 = vmatpush.msrb.mxu1 %v6494_v26 }
 0x168   :  { %996 = vmatpush.msrb.mxu2 %v6495_v51  ;;  %1016 = vmatpush.msra.mxu3 %v6496_v6 }
 0x169   :  { %957 = vmatpush.msrb.mxu0 %v6497_v14  ;;  %977 = vmatpush.msrb.mxu1 %v6498_v44  ;;  %v6505_v14 = vld [vmem:[#allocation60_spill] sm:$0xff] }
 0x16a   :  { %997 = vmatpush.msrb.mxu2 %v6499_v20  ;;  %1017 = vmatpush.msra.mxu3 %v6500_v8  ;;  %v430_v44 = vadd.f32 %v6506_v47, %v6505_v14 }
 0x1c6   :  { %v655_v32 = vpop.f32.mrf.mxu0  ;;  %v675_v23 = vpop.f32.mrf.mxu1 }
 0x1c7   :  { %v718_v38 = vadd.f32 %v655_v32, %v307_v36  ;;  %v719_v16 = vadd.f32 %v675_v23, %v348_v41  ;;  %v6507_v41 = vld [vmem:[#allocation65_spill] sm:$0xff]  ;;  %v6508_v32 = vld [vmem:[#allocation46_spill] sm:$0xff] }
 0x1c8   :  { %v389_v23 = vadd.f32 %v6508_v32, %v6507_v41 }
 0x1c9   :  { %v3358_v53 = vmul.f32 -1.442695, %v718_v38  ;;  %v3359_v34 = vmul.f32 -1.442695, %v719_v16 }
 0x1cb   :  { %3449 = vpow2.f32 %v3358_v53 }
 0x1cc   :  { %3451 = vpow2.f32 %v3359_v34 }
 0x1cd   :  { %v715_v20 = vpop.f32.mrf.mxu3  ;;  %v695_v4 = vpop.f32.mrf.mxu2 }
 0x1ce   :  { %v721_v6 = vadd.f32 %v715_v20, %v430_v44  ;;  %v720_v53 = vadd.f32 %v695_v4, %v389_v23 }
 0x1d0   :  { %v3360_v8 = vmul.f32 -1.442695, %v721_v6 }
 0x1d1   :  { %v3450_v51 = vpop.eup %3449 }
 0x1d2   :  { %v3452_v26 = vpop.eup %3451  ;;  %v729_v25 = vadd.f32 1.0, %v3450_v51  ;;  %3453 = vpow2.f32 %v3360_v8 }
 0x1d3   :  { %v748_v29 = vadd.f32 1.0, %v3452_v26 }
 0x1d4   :  { %3455 = vrcp.f32 %v729_v25  ;;  %v741_v14 = vand.u32 2147483648, %v729_v25  ;;  %v739_v8 = vand.u32 2147483647, %v729_v25  ;;  %vm735_vm14 = vweird.f32 %v729_v25 }
 0x1d5   :  { %3457 = vrcp.f32 %v748_v29  ;;  %v760_v51 = vand.u32 2147483648, %v748_v29  ;;  %v758_v60 = vand.u32 2147483647, %v748_v29  ;;  %vm754_vm15 = vweird.f32 %v748_v29 }
 0x1d6   :  { %v742_v4 = vor.u32 1.1754944e-38, %v741_v14  ;;  %vm740_vm2 = vcmp.eq.f32.partialorder %v739_v8, 8.507059e+37 }
 0x1d7   :  { %vm759_vm3 = vcmp.eq.f32.partialorder %v758_v60, 8.507059e+37 }
 0x1d8   :  { %v3454_v36 = vpop.eup %3453 }
 0x1d9   :  { %v768_v38 = vadd.f32 1.0, %v3454_v36 }
 0x1da   :  { %v3456_v16 = vpop.eup %3455 }
 0x1db   :  { %v3458_v47 = vpop.eup %3457  ;;  %v731_v34 = vmul.f32 %v3456_v16, %v729_v25  ;;  %3459 = vrcp.f32 %v768_v38  ;;  %vm736_vm12 = vweird.f32 %v3456_v16  ;;  %vm774_vm5 = vweird.f32 %v768_v38 }
 0x1dc   :  { %v750_v44 = vmul.f32 %v3458_v47, %v748_v29  ;;  %3461 = vtanh.f32 %v720_v53  ;;  %vm755_vm13 = vweird.f32 %v3458_v47  ;;  %vm737_vm0 = vmor %vm735_vm14, %vm736_vm12  ;;  %v778_v14 = vand.u32 2147483647, %v768_v38 }
 0x1dd   :  { %v732_v6 = vsub.f32 1.0, %v731_v34  ;;  %vm756_vm1 = vmor %vm754_vm15, %vm755_vm13  ;;  %v761_v34 = vor.u32 1.1754944e-38, %v760_v51 }
 0x1de   :  { %v751_v20 = vsub.f32 1.0, %v750_v44  ;;  %vm779_vm7 = vcmp.eq.f32.partialorder %v778_v14, 8.507059e+37 }
 0x1df   :  { %v733_v26 = vmul.f32 %v3456_v16, %v732_v6 }
 0x1e0   :  { %v752_v17 = vmul.f32 %v3458_v47, %v751_v20 }
 0x1e1   :  { %v3460_v48 = vpop.eup %3459  ;;  %v734_v32 = vadd.f32 %v3456_v16, %v733_v26 }
 0x1e2   :  { %v753_v36 = vadd.f32 %v3458_v47, %v752_v17  ;;  %v770_v23 = vmul.f32 %v3460_v48, %v768_v38  ;;  %v3462_v53 = vpop.eup %3461  ;;  %vm775_vm4 = vweird.f32 %v3460_v48  ;;  %v780_v17 = vand.u32 2147483648, %v768_v38 }
 0x1e3   :  { %v738_v44 = vsel %vm737_vm0, %v3456_v16, %v734_v32  ;;  %vm776_vm6 = vmor %vm774_vm5, %vm775_vm4 }
 0x1e4   :  { %v743_v41 = vsel %vm740_vm2, %v742_v4, %v738_v44  ;;  %v757_v6 = vsel %vm756_vm1, %v3458_v47, %v753_v36  ;;  %v771_v11 = vsub.f32 1.0, %v770_v23  ;;  %v781_v51 = vor.u32 1.1754944e-38, %v780_v17 }
 0x1e5   :  { %v762_v20 = vsel %vm759_vm3, %v761_v34, %v757_v6  ;;  %v785_v52 = vmul.f32 %v3462_v53, %v743_v41  ;;  %v6530_v41 = vld [vmem:[#allocation47_spill] sm:$0xff]  ;;  %v6531_v53 = vld [vmem:[#allocation60_spill] sm:$0xff]  ;;  %v6532_v6 = vld [vmem:[#allocation41_spill] sm:$0xff] }
 0x1e6   :  { %v784_v57 = vmul.f32 %v762_v20, %v4576_v62  ;;  %v772_v26 = vmul.f32 %v3460_v48, %v771_v11  ;;  %v4706_v62 = vld [vmem:[#allocation9 + $0x1d8] sm:$0xff]  ;;  %v433_v20 = vadd.f32 %v6532_v6, %v6531_v53 }
 0x1e8   :  { %v4688_v25 = vadd.f32 %v785_v52, %v784_v57  ;;  %v773_v29 = vadd.f32 %v3460_v48, %v772_v26  ;;  %v4700_v57 = vld [vmem:[#allocation9 + $0x1f8] sm:$0xff]  ;;  %v6528_v52 = vld [vmem:[#allocation26_spill] sm:$0xff] }
 0x1ea   :  { %3463 = vtanh.f32 %v4688_v25  ;;  %v777_v16 = vsel %vm776_vm6, %v3460_v48, %v773_v29  ;;  %v6529_v48 = vld [vmem:[#allocation62_spill] sm:$0xff] }
 0x1eb   :  { %v782_v47 = vsel %vm779_vm7, %v781_v51, %v777_v16  ;;  %v351_v38 = vadd.f32 %v6530_v41, %v6529_v48 }
 0x1f0   :  { %v3464_v60 = vpop.eup %3463 }
 0x1f1   :  { %v4691_v8 = vmul.f32 %v3464_v60, %v782_v47 }
 0x1f3   :  { %6509 = vst [vmem:[#allocation27_spill] sm:$0xff] %v4691_v8  ;;  %806 = vmatmul.f32.vlgmr.msra.gmra.mxu0 %v4691_v8  ;;  %826 = vmatmul.f32.vlgmr.msra.gmra.mxu1 %v4691_v8 }
 0x1f4   :  { %846 = vmatmul.f32.vlgmr.msra.gmra.mxu2 %v4691_v8  ;;  %866 = vmatmul.f32.vlgmr.msrb.gmra.mxu3 %v4691_v8  ;;  %v4922_v8 = vld [vmem:[#allocation9 + $0x28] sm:$0xff] }
 0x1f5   :  { %1094 = vmatpush.msra.mxu0 %v4585_v35  ;;  %1114 = vmatpush.msra.mxu1 %v4251_v54  ;;  %v4712_v54 = vld [vmem:[#allocation9 + $0x1b8] sm:$0xff] }
 0x1f6   :  { %1134 = vmatpush.msra.mxu2 %v4254_v56  ;;  %1154 = vmatpush.msrb.mxu3 %v4700_v57  ;;  %v4718_v56 = vld [vmem:[#allocation9 + $0x198] sm:$0xff] }
 0x1f7   :  { %1095 = vmatpush.msra.mxu0 %v4591_v1  ;;  %1115 = vmatpush.msra.mxu1 %v4258_v58  ;;  %v4724_v58 = vld [vmem:[#allocation9 + $0x178] sm:$0xff] }
 0x1f8   :  { %1135 = vmatpush.msra.mxu2 %v4264_v63  ;;  %1155 = vmatpush.msrb.mxu3 %v4706_v62  ;;  %v4730_v63 = vld [vmem:[#allocation9 + $0x158] sm:$0xff] }
 0x1f9   :  { %1096 = vmatpush.msra.mxu0 %v4597_v19  ;;  %1116 = vmatpush.msra.mxu1 %v4267_v0  ;;  %v4736_v0 = vld [vmem:[#allocation9 + $0x138] sm:$0xff] }
 0x1fa   :  { %1136 = vmatpush.msra.mxu2 %v4273_v3  ;;  %1156 = vmatpush.msrb.mxu3 %v4712_v54  ;;  %v4742_v3 = vld [vmem:[#allocation9 + $0x118] sm:$0xff] }
 0x1fb   :  { %1097 = vmatpush.msra.mxu0 %v4603_v55  ;;  %1117 = vmatpush.msra.mxu1 %v4276_v5  ;;  %v4748_v5 = vld [vmem:[#allocation9 + $0xf8] sm:$0xff] }
 0x1fc   :  { %1137 = vmatpush.msra.mxu2 %v4284_v9  ;;  %1157 = vmatpush.msrb.mxu3 %v4718_v56  ;;  %v4754_v9 = vld [vmem:[#allocation9 + $0xd8] sm:$0xff] }
 0x1fd   :  { %1098 = vmatpush.msra.mxu0 %v4609_v59  ;;  %1118 = vmatpush.msra.mxu1 %v4286_v10  ;;  %6510 = vst [vmem:[#allocation23_spill] sm:$0xff] %v4754_v9  ;;  %v4760_v10 = vld [vmem:[#allocation9 + $0xb8] sm:$0xff] }
 0x1fe   :  { %1138 = vmatpush.msra.mxu2 %v4292_v13  ;;  %1158 = vmatpush.msrb.mxu3 %v4724_v58  ;;  %6511 = vst [vmem:[#allocation44_spill] sm:$0xff] %v4760_v10  ;;  %v4766_v13 = vld [vmem:[#allocation9 + $0x98] sm:$0xff] }
 0x1ff   :  { %1099 = vmatpush.msra.mxu0 %v4615_v2  ;;  %1119 = vmatpush.msra.mxu1 %v4295_v18  ;;  %6512 = vst [vmem:[#allocation25_spill] sm:$0xff] %v4766_v13  ;;  %v6513_v18 = vld [vmem:[#allocation33_spill] sm:$0xff] }
 0x200   :  { %1139 = vmatpush.msra.mxu2 %v4302_v21  ;;  %1159 = vmatpush.msrb.mxu3 %v4730_v63  ;;  %v4772_v21 = vld [vmem:[#allocation9 + $0x78] sm:$0xff] }
 0x201   :  { %1100 = vmatpush.msra.mxu0 %v4621_v7  ;;  %1120 = vmatpush.msra.mxu1 %v4305_v24  ;;  %6514 = vst [vmem:[#allocation46_spill] sm:$0xff] %v4772_v21  ;;  %v6515_v24 = vld [vmem:[#allocation28_spill] sm:$0xff] }
 0x202   :  { %1140 = vmatpush.msra.mxu2 %v4312_v28  ;;  %1160 = vmatpush.msrb.mxu3 %v4736_v0  ;;  %v6516_v28 = vld [vmem:[#allocation32_spill] sm:$0xff] }
 0x203   :  { %1101 = vmatpush.msra.mxu0 %v4627_v12  ;;  %1121 = vmatpush.msra.mxu1 %v4314_v30  ;;  %v6517_v30 = vld [vmem:[#allocation34_spill] sm:$0xff] }
 0x204   :  { %1141 = vmatpush.msra.mxu2 %v4320_v61  ;;  %1161 = vmatpush.msrb.mxu3 %v4742_v3  ;;  %v4778_v61 = vld [vmem:[#allocation9 + $0x58] sm:$0xff] }
 0x205   :  { %1102 = vmatpush.msra.mxu0 %v4633_v22  ;;  %1122 = vmatpush.msra.mxu1 %v4322_v33  ;;  %6518 = vst [vmem:[#allocation33_spill] sm:$0xff] %v4778_v61  ;;  %v6519_v33 = vld [vmem:[#allocation29_spill] sm:$0xff] }
 0x206   :  { %1142 = vmatpush.msra.mxu2 %v4327_v37  ;;  %1162 = vmatpush.msrb.mxu3 %v4748_v5  ;;  %v6520_v37 = vld [vmem:[#allocation35_spill] sm:$0xff] }
 0x207   :  { %1103 = vmatpush.msra.mxu0 %v4639_v27  ;;  %1123 = vmatpush.msra.mxu1 %v4331_v39  ;;  %v6521_v39 = vld [vmem:[#allocation36_spill] sm:$0xff] }
 0x208   :  { %1143 = vmatpush.msra.mxu2 %v4336_v40  ;;  %1163 = vmatpush.msrb.mxu3 %v4754_v9  ;;  %v6522_v40 = vld [vmem:[#allocation30_spill] sm:$0xff] }
 0x209   :  { %1104 = vmatpush.msra.mxu0 %v4645_v31  ;;  %1124 = vmatpush.msra.mxu1 %v4339_v43  ;;  %v4785_v43 = vld [vmem:[#allocation9] sm:$0xff] }
 0x20a   :  { %1144 = vmatpush.msra.mxu2 %v4343_v45  ;;  %1164 = vmatpush.msrb.mxu3 %v4760_v10  ;;  %6523 = vst [vmem:[#allocation32_spill] sm:$0xff] %v4785_v43  ;;  %v6524_v45 = vld [vmem:[#allocation37_spill] sm:$0xff] }
 0x20b   :  { %1105 = vmatpush.msra.mxu0 %v4651_v42  ;;  %1125 = vmatpush.msra.mxu1 %v4346_v49  ;;  %v6525_v49 = vld [vmem:[#allocation38_spill] sm:$0xff] }
 0x20c   :  { %1145 = vmatpush.msra.mxu2 %v4351_v15  ;;  %1165 = vmatpush.msrb.mxu3 %v4766_v13  ;;  %v6526_v15 = vld [vmem:[#allocation31_spill] sm:$0xff] }
 0x20d   :  { %1106 = vmatpush.msra.mxu0 %v4657_v46  ;;  %1126 = vmatpush.msra.mxu1 %v4354_v50  ;;  %v6527_v50 = vld [vmem:[#allocation54_spill] sm:$0xff] }
 0x20e   :  { %1146 = vmatpush.msra.mxu2 %v6513_v18  ;;  %1166 = vmatpush.msrb.mxu3 %v4772_v21  ;;  %v310_v11 = vadd.f32 %v6528_v52, %v6527_v50 }
 0x20f   :  { %1107 = vmatpush.msra.mxu0 %v6515_v24  ;;  %1127 = vmatpush.msra.mxu1 %v6516_v28  ;;  %v6533_v28 = vld [vmem:[#allocation65_spill] sm:$0xff] }
 0x210   :  { %1147 = vmatpush.msra.mxu2 %v6517_v30  ;;  %1167 = vmatpush.msrb.mxu3 %v4778_v61  ;;  %v6534_v30 = vld [vmem:[#allocation49_spill] sm:$0xff] }
 0x211   :  { %1108 = vmatpush.msra.mxu0 %v6519_v33  ;;  %1128 = vmatpush.msra.mxu1 %v6520_v37  ;;  %v392_v37 = vadd.f32 %v6534_v30, %v6533_v28  ;;  %6545 = vst [vmem:[#allocation49_spill] sm:$0xff] %v4922_v8 }
 0x212   :  { %1148 = vmatpush.msra.mxu2 %v6521_v39  ;;  %1168 = vmatpush.msrb.mxu3 %v6522_v40 }
 0x213   :  { %1109 = vmatpush.msra.mxu0 %v4785_v43  ;;  %1129 = vmatpush.msra.mxu1 %v6524_v45 }
 0x214   :  { %1149 = vmatpush.msra.mxu2 %v6525_v49  ;;  %1169 = vmatpush.msrb.mxu3 %v6526_v15 }
 0x270   :  { %v807_v32 = vpop.f32.mrf.mxu0  ;;  %v827_v4 = vpop.f32.mrf.mxu1 }
 0x271   :  { %v870_v36 = vadd.f32 %v807_v32, %v310_v11  ;;  %v871_v23 = vadd.f32 %v827_v4, %v351_v38 }
 0x273   :  { %v3361_v34 = vmul.f32 -1.442695, %v870_v36  ;;  %v3362_v44 = vmul.f32 -1.442695, %v871_v23 }
 0x275   :  { %3465 = vpow2.f32 %v3361_v34 }
 0x276   :  { %3467 = vpow2.f32 %v3362_v44 }
 0x277   :  { %v867_v26 = vpop.f32.mrf.mxu3  ;;  %v847_v47 = vpop.f32.mrf.mxu2 }
 0x278   :  { %v873_v29 = vadd.f32 %v867_v26, %v433_v20  ;;  %v872_v45 = vadd.f32 %v847_v47, %v392_v37 }
 0x27a   :  { %v3363_v17 = vmul.f32 -1.442695, %v873_v29 }
 0x27b   :  { %v3466_v14 = vpop.eup %3465 }
 0x27c   :  { %v3468_v16 = vpop.eup %3467  ;;  %v881_v51 = vadd.f32 1.0, %v3466_v14  ;;  %3469 = vpow2.f32 %v3363_v17 }
 0x27d   :  { %v900_v60 = vadd.f32 1.0, %v3468_v16 }
 0x27e   :  { %3471 = vrcp.f32 %v881_v51  ;;  %v893_v38 = vand.u32 2147483648, %v881_v51  ;;  %v891_v36 = vand.u32 2147483647, %v881_v51  ;;  %vm887_vm10 = vweird.f32 %v881_v51 }
 0x27f   :  { %3473 = vrcp.f32 %v900_v60  ;;  %v912_v32 = vand.u32 2147483648, %v900_v60  ;;  %v910_v34 = vand.u32 2147483647, %v900_v60  ;;  %vm906_vm11 = vweird.f32 %v900_v60 }
 0x280   :  { %v894_v20 = vor.u32 1.1754944e-38, %v893_v38  ;;  %vm892_vm14 = vcmp.eq.f32.partialorder %v891_v36, 8.507059e+37  ;;  %v4818_v36 = vld [vmem:[#allocation9 + $0x1c8] sm:$0xff] }
 0x281   :  { %v913_v17 = vor.u32 1.1754944e-38, %v912_v32  ;;  %vm911_vm15 = vcmp.eq.f32.partialorder %v910_v34, 8.507059e+37  ;;  %v4826_v34 = vld [vmem:[#allocation9 + $0x1a8] sm:$0xff] }
 0x282   :  { %v3470_v18 = vpop.eup %3469 }
 0x283   :  { %v920_v39 = vadd.f32 1.0, %v3470_v18 }
 0x284   :  { %v3472_v40 = vpop.eup %3471 }
 0x285   :  { %v3474_v49 = vpop.eup %3473  ;;  %v883_v15 = vmul.f32 %v3472_v40, %v881_v51  ;;  %3475 = vrcp.f32 %v920_v39  ;;  %vm888_vm8 = vweird.f32 %v3472_v40  ;;  %vm926_vm1 = vweird.f32 %v920_v39 }
 0x286   :  { %v902_v52 = vmul.f32 %v3474_v49, %v900_v60  ;;  %3477 = vtanh.f32 %v872_v45  ;;  %vm907_vm9 = vweird.f32 %v3474_v49  ;;  %vm889_vm12 = vmor %vm887_vm10, %vm888_vm8 }
 0x287   :  { %v884_v11 = vsub.f32 1.0, %v883_v15  ;;  %vm908_vm13 = vmor %vm906_vm11, %vm907_vm9 }
 0x288   :  { %v903_v41 = vsub.f32 1.0, %v902_v52 }
 0x289   :  { %v885_v4 = vmul.f32 %v3472_v40, %v884_v11  ;;  %v932_v11 = vand.u32 2147483648, %v920_v39 }
 0x28a   :  { %v904_v23 = vmul.f32 %v3474_v49, %v903_v41 }
 0x28b   :  { %v3476_v44 = vpop.eup %3475  ;;  %v886_v6 = vadd.f32 %v3472_v40, %v885_v4  ;;  %v933_v38 = vor.u32 1.1754944e-38, %v932_v11  ;;  %v4893_v11 = vld [vmem:[#allocation9 + $0xb0] sm:$0xff] }
 0x28c   :  { %v905_v26 = vadd.f32 %v3474_v49, %v904_v23  ;;  %v922_v29 = vmul.f32 %v3476_v44, %v920_v39  ;;  %v3478_v16 = vpop.eup %3477  ;;  %vm927_vm0 = vweird.f32 %v3476_v44  ;;  %v4821_v23 = vld [vmem:[#allocation9 + $0x1d0] sm:$0xff]  ;;  %6538 = vst [vmem:[#allocation30_spill] sm:$0xff] %v4893_v11 }
 0x28d   :  { %v890_v14 = vsel %vm889_vm12, %v3472_v40, %v886_v6  ;;  %v930_v40 = vand.u32 2147483647, %v920_v39  ;;  %vm928_vm2 = vmor %vm926_vm1, %vm927_vm0  ;;  %v4813_v39 = vld [vmem:[#allocation9 + $0x1f0] sm:$0xff]  ;;  %v4834_v6 = vld [vmem:[#allocation9 + $0x188] sm:$0xff] }
 0x28e   :  { %v895_v47 = vsel %vm892_vm14, %v894_v20, %v890_v14  ;;  %v909_v18 = vsel %vm908_vm13, %v3474_v49, %v905_v26  ;;  %v923_v30 = vsub.f32 1.0, %v922_v29  ;;  %v4837_v20 = vld [vmem:[#allocation9 + $0x190] sm:$0xff]  ;;  %v4842_v26 = vld [vmem:[#allocation9 + $0x168] sm:$0xff] }
 0x28f   :  { %v914_v37 = vsel %vm911_vm15, %v913_v17, %v909_v18  ;;  %v937_v45 = vmul.f32 %v3478_v16, %v895_v47  ;;  %vm931_vm3 = vcmp.eq.f32.partialorder %v930_v40, 8.507059e+37  ;;  %v4845_v29 = vld [vmem:[#allocation9 + $0x170] sm:$0xff]  ;;  %v4850_v17 = vld [vmem:[#allocation9 + $0x148] sm:$0xff] }
 0x290   :  { %v936_v15 = vmul.f32 %v914_v37, %v4688_v25  ;;  %v924_v52 = vmul.f32 %v3476_v44, %v923_v30  ;;  %v4810_v25 = vld [vmem:[#allocation9 + $0x1e8] sm:$0xff]  ;;  %v4853_v14 = vld [vmem:[#allocation9 + $0x150] sm:$0xff] }
 0x291   :  { %v4858_v16 = vld [vmem:[#allocation9 + $0x128] sm:$0xff]  ;;  %v4861_v47 = vld [vmem:[#allocation9 + $0x130] sm:$0xff] }
 0x292   :  { %v4800_v51 = vadd.f32 %v937_v45, %v936_v15  ;;  %v925_v60 = vadd.f32 %v3476_v44, %v924_v52  ;;  %v4866_v18 = vld [vmem:[#allocation9 + $0x108] sm:$0xff]  ;;  %v4869_v30 = vld [vmem:[#allocation9 + $0x110] sm:$0xff] }
 0x293   :  { %v4874_v37 = vld [vmem:[#allocation9 + $0xe8] sm:$0xff]  ;;  %v4877_v45 = vld [vmem:[#allocation9 + $0xf0] sm:$0xff] }
 0x294   :  { %3479 = vtanh.f32 %v4800_v51  ;;  %v929_v41 = vsel %vm928_vm2, %v3476_v44, %v925_v60  ;;  %v4829_v44 = vld [vmem:[#allocation9 + $0x1b0] sm:$0xff]  ;;  %v4882_v15 = vld [vmem:[#allocation9 + $0xc8] sm:$0xff] }
 0x295   :  { %v934_v32 = vsel %vm931_vm3, %v933_v38, %v929_v41  ;;  %v4885_v52 = vld [vmem:[#allocation9 + $0xd0] sm:$0xff]  ;;  %v4890_v60 = vld [vmem:[#allocation9 + $0xa8] sm:$0xff] }
 0x296   :  { %6536 = vst [vmem:[#allocation35_spill] sm:$0xff] %v4885_v52  ;;  %v4898_v40 = vld [vmem:[#allocation9 + $0x88] sm:$0xff]  ;;  %v4901_v41 = vld [vmem:[#allocation9 + $0x90] sm:$0xff] }
 0x297   :  { %6537 = vst [vmem:[#allocation36_spill] sm:$0xff] %v4890_v60  ;;  %v4906_v38 = vld [vmem:[#allocation9 + $0x68] sm:$0xff] }
 0x298   :  { %6539 = vst [vmem:[#allocation37_spill] sm:$0xff] %v4898_v40 }
 0x299   :  { %6540 = vst [vmem:[#allocation38_spill] sm:$0xff] %v4901_v41 }
 0x29a   :  { %v3480_v49 = vpop.eup %3479  ;;  %6541 = vst [vmem:[#allocation31_spill] sm:$0xff] %v4906_v38 }
 0x29b   :  { %v4803_v4 = vmul.f32 %v3480_v49, %v934_v32  ;;  %v4909_v49 = vld [vmem:[#allocation9 + $0x70] sm:$0xff]  ;;  %v4914_v32 = vld [vmem:[#allocation9 + $0x48] sm:$0xff] }
 0x29c   :  { %6542 = vst [vmem:[#allocation26_spill] sm:$0xff] %v4909_v49 }
 0x29d   :  { %6535 = vst [vmem:[#allocation34_spill] sm:$0xff] %v4803_v4  ;;  %958 = vmatmul.f32.vlgmr.msrb.gmra.mxu0 %v4803_v4  ;;  %978 = vmatmul.f32.vlgmr.msrb.gmra.mxu1 %v4803_v4 }
 0x29e   :  { %998 = vmatmul.f32.vlgmr.msrb.gmra.mxu2 %v4803_v4  ;;  %1018 = vmatmul.f32.vlgmr.msra.gmra.mxu3 %v4803_v4  ;;  %6543 = vst [vmem:[#allocation47_spill] sm:$0xff] %v4914_v32  ;;  %v4917_v4 = vld [vmem:[#allocation9 + $0x50] sm:$0xff] }
 0x29f   :  { %1246 = vmatpush.msrb.mxu0 %v4585_v35  ;;  %1266 = vmatpush.msrb.mxu1 %v4810_v25  ;;  %6544 = vst [vmem:[#allocation41_spill] sm:$0xff] %v4917_v4 }
 0x2a0   :  { %1286 = vmatpush.msrb.mxu2 %v4813_v39  ;;  %1306 = vmatpush.msra.mxu3 %v4700_v57 }
 0x2a1   :  { %1247 = vmatpush.msrb.mxu0 %v4591_v1  ;;  %1267 = vmatpush.msrb.mxu1 %v4818_v36 }
 0x2a2   :  { %1287 = vmatpush.msrb.mxu2 %v4821_v23  ;;  %1307 = vmatpush.msra.mxu3 %v4706_v62 }
 0x2a3   :  { %1248 = vmatpush.msrb.mxu0 %v4597_v19  ;;  %1268 = vmatpush.msrb.mxu1 %v4826_v34 }
 0x2a4   :  { %1288 = vmatpush.msrb.mxu2 %v4829_v44  ;;  %1308 = vmatpush.msra.mxu3 %v4712_v54 }
 0x2a5   :  { %1249 = vmatpush.msrb.mxu0 %v4603_v55  ;;  %1269 = vmatpush.msrb.mxu1 %v4834_v6 }
 0x2a6   :  { %1289 = vmatpush.msrb.mxu2 %v4837_v20  ;;  %1309 = vmatpush.msra.mxu3 %v4718_v56 }
 0x2a7   :  { %1250 = vmatpush.msrb.mxu0 %v4609_v59  ;;  %1270 = vmatpush.msrb.mxu1 %v4842_v26 }
 0x2a8   :  { %1290 = vmatpush.msrb.mxu2 %v4845_v29  ;;  %1310 = vmatpush.msra.mxu3 %v4724_v58 }
 0x2a9   :  { %1251 = vmatpush.msrb.mxu0 %v4615_v2  ;;  %1271 = vmatpush.msrb.mxu1 %v4850_v17 }
 0x2aa   :  { %1291 = vmatpush.msrb.mxu2 %v4853_v14  ;;  %1311 = vmatpush.msra.mxu3 %v4730_v63 }
 0x2ab   :  { %1252 = vmatpush.msrb.mxu0 %v4621_v7  ;;  %1272 = vmatpush.msrb.mxu1 %v4858_v16 }
 0x2ac   :  { %1292 = vmatpush.msrb.mxu2 %v4861_v47  ;;  %1312 = vmatpush.msra.mxu3 %v4736_v0 }
 0x2ad   :  { %1253 = vmatpush.msrb.mxu0 %v4627_v12  ;;  %1273 = vmatpush.msrb.mxu1 %v4866_v18 }
 0x2ae   :  { %1293 = vmatpush.msrb.mxu2 %v4869_v30  ;;  %1313 = vmatpush.msra.mxu3 %v4742_v3 }
 0x2af   :  { %1254 = vmatpush.msrb.mxu0 %v4633_v22  ;;  %1274 = vmatpush.msrb.mxu1 %v4874_v37 }
 0x2b0   :  { %1294 = vmatpush.msrb.mxu2 %v4877_v45  ;;  %1314 = vmatpush.msra.mxu3 %v4748_v5 }
 0x2b1   :  { %1255 = vmatpush.msrb.mxu0 %v4639_v27  ;;  %1275 = vmatpush.msrb.mxu1 %v4882_v15 }
 0x2b2   :  { %1295 = vmatpush.msrb.mxu2 %v4885_v52  ;;  %1315 = vmatpush.msra.mxu3 %v4754_v9 }
 0x2b3   :  { %1256 = vmatpush.msrb.mxu0 %v4645_v31  ;;  %1276 = vmatpush.msrb.mxu1 %v4890_v60 }
 0x2b4   :  { %1296 = vmatpush.msrb.mxu2 %v4893_v11  ;;  %1316 = vmatpush.msra.mxu3 %v4760_v10 }
 0x2b5   :  { %1257 = vmatpush.msrb.mxu0 %v4651_v42  ;;  %1277 = vmatpush.msrb.mxu1 %v4898_v40 }
 0x2b6   :  { %1297 = vmatpush.msrb.mxu2 %v4901_v41  ;;  %1317 = vmatpush.msra.mxu3 %v4766_v13  ;;  %v6553_v41 = vld [vmem:[#allocation43_spill] sm:$0xff] }
 0x2b7   :  { %1258 = vmatpush.msrb.mxu0 %v4657_v46  ;;  %1278 = vmatpush.msrb.mxu1 %v4906_v38 }
 0x2b8   :  { %1298 = vmatpush.msrb.mxu2 %v4909_v49  ;;  %1318 = vmatpush.msra.mxu3 %v4772_v21  ;;  %v4925_v49 = vld [vmem:[#allocation9 + $0x30] sm:$0xff] }
 0x2b9   :  { %1259 = vmatpush.msrb.mxu0 %v6515_v24  ;;  %1279 = vmatpush.msrb.mxu1 %v4914_v32  ;;  %6546 = vst [vmem:[#allocation70_spill] sm:$0xff] %v4925_v49  ;;  %v4928_v24 = vld [vmem:[#allocation9 + $0x38] sm:$0xff]  ;;  %v4932_v32 = vld [vmem:[#allocation9 + $0x8] sm:$0xff] }
 0x2ba   :  { %1299 = vmatpush.msrb.mxu2 %v4917_v4  ;;  %1319 = vmatpush.msra.mxu3 %v4778_v61  ;;  %6547 = vst [vmem:[#allocation71_spill] sm:$0xff] %v4928_v24  ;;  %v4935_v61 = vld [vmem:[#allocation9 + $0x10] sm:$0xff]  ;;  %v6552_v4 = vld [vmem:[#allocation50_spill] sm:$0xff] }
 0x2bb   :  { %1260 = vmatpush.msrb.mxu0 %v6519_v33  ;;  %1280 = vmatpush.msrb.mxu1 %v4922_v8  ;;  %6548 = vst [vmem:[#allocation72_spill] sm:$0xff] %v4932_v32  ;;  %v4938_v33 = vld [vmem:[#allocation9 + $0x18] sm:$0xff] }
 0x2bc   :  { %1300 = vmatpush.msrb.mxu2 %v4925_v49  ;;  %1320 = vmatpush.msra.mxu3 %v4928_v24  ;;  %6549 = vst [vmem:[#allocation73_spill] sm:$0xff] %v4935_v61  ;;  %v6551_v49 = vld [vmem:[#allocation40_spill] sm:$0xff]  ;;  %v354_v24 = vadd.f32 %v6552_v4, %v6529_v48 }
 0x2bd   :  { %1261 = vmatpush.msrb.mxu0 %v4785_v43  ;;  %1281 = vmatpush.msrb.mxu1 %v4932_v32  ;;  %6550 = vst [vmem:[#allocation74_spill] sm:$0xff] %v4938_v33  ;;  %v313_v8 = vadd.f32 %v6551_v49, %v6527_v50 }
 0x2be   :  { %1301 = vmatpush.msrb.mxu2 %v4935_v61  ;;  %1321 = vmatpush.msra.mxu3 %v4938_v33  ;;  %v436_v61 = vadd.f32 %v6553_v41, %v6531_v53 }
 0x31a   :  { %v959_v21 = vpop.f32.mrf.mxu0  ;;  %v979_v43 = vpop.f32.mrf.mxu1 }
 0x31b   :  { %v1022_v38 = vadd.f32 %v959_v21, %v313_v8  ;;  %v1023_v46 = vadd.f32 %v979_v43, %v354_v24  ;;  %v6554_v21 = vld [vmem:[#allocation51_spill] sm:$0xff] }
 0x31d   :  { %v3364_v13 = vmul.f32 -1.442695, %v1022_v38  ;;  %v3365_v32 = vmul.f32 -1.442695, %v1023_v46  ;;  %v395_v46 = vadd.f32 %v6554_v21, %v6533_v28 }
 0x31f   :  { %3481 = vpow2.f32 %v3364_v13 }
 0x320   :  { %3483 = vpow2.f32 %v3365_v32 }
 0x321   :  { %v1019_v40 = vpop.f32.mrf.mxu3  ;;  %v999_v4 = vpop.f32.mrf.mxu2 }
 0x322   :  { %v1025_v42 = vadd.f32 %v1019_v40, %v436_v61  ;;  %v1024_v43 = vadd.f32 %v999_v4, %v395_v46 }
 0x324   :  { %v3366_v33 = vmul.f32 -1.442695, %v1025_v42 }
 0x325   :  { %v3482_v10 = vpop.eup %3481 }
 0x326   :  { %v3484_v11 = vpop.eup %3483  ;;  %v1033_v49 = vadd.f32 1.0, %v3482_v10  ;;  %3485 = vpow2.f32 %v3366_v33 }
 0x327   :  { %v1052_v50 = vadd.f32 1.0, %v3484_v11 }
 0x328   :  { %3487 = vrcp.f32 %v1033_v49  ;;  %v1045_v32 = vand.u32 2147483648, %v1033_v49  ;;  %v1043_v11 = vand.u32 2147483647, %v1033_v49  ;;  %vm1039_vm6 = vweird.f32 %v1033_v49 }
 0x329   :  { %3489 = vrcp.f32 %v1052_v50  ;;  %v1064_v10 = vand.u32 2147483648, %v1052_v50  ;;  %v1062_v48 = vand.u32 2147483647, %v1052_v50  ;;  %vm1058_vm7 = vweird.f32 %v1052_v50 }
 0x32a   :  { %v1046_v4 = vor.u32 1.1754944e-38, %v1045_v32  ;;  %vm1044_vm10 = vcmp.eq.f32.partialorder %v1043_v11, 8.507059e+37 }
 0x32b   :  { %vm1063_vm11 = vcmp.eq.f32.partialorder %v1062_v48, 8.507059e+37 }
 0x32c   :  { %v3486_v8 = vpop.eup %3485 }
 0x32d   :  { %v1072_v13 = vadd.f32 1.0, %v3486_v8 }
 0x32e   :  { %v3488_v24 = vpop.eup %3487 }
 0x32f   :  { %v3490_v41 = vpop.eup %3489  ;;  %v1035_v38 = vmul.f32 %v3488_v24, %v1033_v49  ;;  %3491 = vrcp.f32 %v1072_v13  ;;  %vm1040_vm4 = vweird.f32 %v3488_v24  ;;  %vm1078_vm13 = vweird.f32 %v1072_v13 }
 0x330   :  { %v1054_v61 = vmul.f32 %v3490_v41, %v1052_v50  ;;  %3493 = vtanh.f32 %v1024_v43  ;;  %vm1059_vm5 = vweird.f32 %v3490_v41  ;;  %vm1041_vm8 = vmor %vm1039_vm6, %vm1040_vm4 }
 0x331   :  { %v1036_v42 = vsub.f32 1.0, %v1035_v38  ;;  %vm1060_vm9 = vmor %vm1058_vm7, %vm1059_vm5  ;;  %v1065_v38 = vor.u32 1.1754944e-38, %v1064_v10 }
 0x332   :  { %v1055_v40 = vsub.f32 1.0, %v1054_v61 }
 0x333   :  { %v1037_v33 = vmul.f32 %v3488_v24, %v1036_v42 }
 0x334   :  { %v1056_v53 = vmul.f32 %v3490_v41, %v1055_v40 }
 0x335   :  { %v3492_v60 = vpop.eup %3491  ;;  %v1038_v21 = vadd.f32 %v3488_v24, %v1037_v33 }
 0x336   :  { %v1057_v8 = vadd.f32 %v3490_v41, %v1056_v53  ;;  %v1074_v46 = vmul.f32 %v3492_v60, %v1072_v13  ;;  %v3494_v43 = vpop.eup %3493  ;;  %vm1079_vm12 = vweird.f32 %v3492_v60  ;;  %v1084_v53 = vand.u32 2147483648, %v1072_v13 }
 0x337   :  { %v1042_v61 = vsel %vm1041_vm8, %v3488_v24, %v1038_v21  ;;  %v1082_v24 = vand.u32 2147483647, %v1072_v13  ;;  %vm1080_vm14 = vmor %vm1078_vm13, %vm1079_vm12  ;;  %v6572_v13 = vld [vmem:[#allocation41_spill] sm:$0xff] }
 0x338   :  { %v1047_v28 = vsel %vm1044_vm10, %v1046_v4, %v1042_v61  ;;  %v1061_v42 = vsel %vm1060_vm9, %v3490_v41, %v1057_v8  ;;  %v1075_v31 = vsub.f32 1.0, %v1074_v46  ;;  %v1085_v10 = vor.u32 1.1754944e-38, %v1084_v53  ;;  %v6573_v21 = vld [vmem:[#allocation33_spill] sm:$0xff]  ;;  %v6576_v46 = vld [vmem:[#allocation70_spill] sm:$0xff]  ;;  %v6578_v61 = vld [vmem:[#allocation32_spill] sm:$0xff] }
 0x339   :  { %v1066_v40 = vsel %vm1063_vm11, %v1065_v38, %v1061_v42  ;;  %v1089_v9 = vmul.f32 %v3494_v43, %v1047_v28  ;;  %vm1083_vm15 = vcmp.eq.f32.partialorder %v1082_v24, 8.507059e+37  ;;  %v6568_v28 = vld [vmem:[#allocation26_spill] sm:$0xff]  ;;  %v6574_v4 = vld [vmem:[#allocation29_spill] sm:$0xff]  ;;  %v6577_v38 = vld [vmem:[#allocation71_spill] sm:$0xff] }
 0x33a   :  { %v1088_v52 = vmul.f32 %v1066_v40, %v4800_v51  ;;  %v1076_v33 = vmul.f32 %v3492_v60, %v1075_v31  ;;  %v6566_v31 = vld [vmem:[#allocation69_spill] sm:$0xff]  ;;  %v6569_v51 = vld [vmem:[#allocation46_spill] sm:$0xff]  ;;  %v6579_v43 = vld [vmem:[#allocation72_spill] sm:$0xff] }
 0x33b   :  { %v6575_v8 = vld [vmem:[#allocation49_spill] sm:$0xff]  ;;  %v6581_v40 = vld [vmem:[#allocation74_spill] sm:$0xff] }
 0x33c   :  { %v4950_v49 = vadd.f32 %v1089_v9, %v1088_v52  ;;  %v1077_v50 = vadd.f32 %v3492_v60, %v1076_v33  ;;  %v6567_v9 = vld [vmem:[#allocation31_spill] sm:$0xff]  ;;  %v6570_v52 = vld [vmem:[#allocation28_spill] sm:$0xff]  ;;  %v6580_v42 = vld [vmem:[#allocation73_spill] sm:$0xff] }
 0x33d   :  { %v6582_v33 = vld [vmem:[#allocation54_spill] sm:$0xff] }
 0x33e   :  { %3495 = vtanh.f32 %v4950_v49  ;;  %v1081_v32 = vsel %vm1080_vm14, %v3492_v60, %v1077_v50  ;;  %v6571_v60 = vld [vmem:[#allocation47_spill] sm:$0xff]  ;;  %v6583_v50 = vld [vmem:[#allocation22_spill] sm:$0xff] }
 0x33f   :  { %v1086_v41 = vsel %vm1083_vm15, %v1085_v10, %v1081_v32  ;;  %v316_v53 = vadd.f32 %v6583_v50, %v6582_v33  ;;  %v6584_v24 = vld [vmem:[#allocation62_spill] sm:$0xff]  ;;  %v6585_v32 = vld [vmem:[#allocation52_spill] sm:$0xff] }
 0x340   :  { %v357_v10 = vadd.f32 %v6585_v32, %v6584_v24 }
 0x344   :  { %v3496_v48 = vpop.eup %3495 }
 0x345   :  { %v4953_v11 = vmul.f32 %v3496_v48, %v1086_v41 }
 0x347   :  { %6555 = vst [vmem:[#allocation40_spill] sm:$0xff] %v4953_v11  ;;  %1110 = vmatmul.f32.vlgmr.msra.gmra.mxu0 %v4953_v11  ;;  %1130 = vmatmul.f32.vlgmr.msra.gmra.mxu1 %v4953_v11 }
 0x348   :  { %1150 = vmatmul.f32.vlgmr.msra.gmra.mxu2 %v4953_v11  ;;  %1170 = vmatmul.f32.vlgmr.msrb.gmra.mxu3 %v4953_v11  ;;  %v6587_v11 = vld [vmem:[#allocation45_spill] sm:$0xff] }
 0x349   :  { %1398 = vmatpush.msra.mxu0 %v4585_v35  ;;  %1418 = vmatpush.msra.mxu1 %v4810_v25  ;;  %v6556_v35 = vld [vmem:[#allocation35_spill] sm:$0xff] }
 0x34a   :  { %1438 = vmatpush.msra.mxu2 %v4813_v39  ;;  %1458 = vmatpush.msrb.mxu3 %v4700_v57 }
 0x34b   :  { %1399 = vmatpush.msra.mxu0 %v4591_v1  ;;  %1419 = vmatpush.msra.mxu1 %v4818_v36  ;;  %v6557_v1 = vld [vmem:[#allocation23_spill] sm:$0xff] }
 0x34c   :  { %1439 = vmatpush.msra.mxu2 %v4821_v23  ;;  %1459 = vmatpush.msrb.mxu3 %v4706_v62 }
 0x34d   :  { %1400 = vmatpush.msra.mxu0 %v4597_v19  ;;  %1420 = vmatpush.msra.mxu1 %v4826_v34  ;;  %v6558_v19 = vld [vmem:[#allocation67_spill] sm:$0xff] }
 0x34e   :  { %1440 = vmatpush.msra.mxu2 %v4829_v44  ;;  %1460 = vmatpush.msrb.mxu3 %v4712_v54 }
 0x34f   :  { %1401 = vmatpush.msra.mxu0 %v4603_v55  ;;  %1421 = vmatpush.msra.mxu1 %v4834_v6  ;;  %v6559_v55 = vld [vmem:[#allocation36_spill] sm:$0xff] }
 0x350   :  { %1441 = vmatpush.msra.mxu2 %v4837_v20  ;;  %1461 = vmatpush.msrb.mxu3 %v4718_v56 }
 0x351   :  { %1402 = vmatpush.msra.mxu0 %v4609_v59  ;;  %1422 = vmatpush.msra.mxu1 %v4842_v26  ;;  %v6560_v59 = vld [vmem:[#allocation30_spill] sm:$0xff] }
 0x352   :  { %1442 = vmatpush.msra.mxu2 %v4845_v29  ;;  %1462 = vmatpush.msrb.mxu3 %v4724_v58 }
 0x353   :  { %1403 = vmatpush.msra.mxu0 %v4615_v2  ;;  %1423 = vmatpush.msra.mxu1 %v4850_v17  ;;  %v6561_v2 = vld [vmem:[#allocation44_spill] sm:$0xff] }
 0x354   :  { %1443 = vmatpush.msra.mxu2 %v4853_v14  ;;  %1463 = vmatpush.msrb.mxu3 %v4730_v63 }
 0x355   :  { %1404 = vmatpush.msra.mxu0 %v4621_v7  ;;  %1424 = vmatpush.msra.mxu1 %v4858_v16  ;;  %v6562_v7 = vld [vmem:[#allocation68_spill] sm:$0xff] }
 0x356   :  { %1444 = vmatpush.msra.mxu2 %v4861_v47  ;;  %1464 = vmatpush.msrb.mxu3 %v4736_v0 }
 0x357   :  { %1405 = vmatpush.msra.mxu0 %v4627_v12  ;;  %1425 = vmatpush.msra.mxu1 %v4866_v18  ;;  %v6563_v12 = vld [vmem:[#allocation37_spill] sm:$0xff] }
 0x358   :  { %1445 = vmatpush.msra.mxu2 %v4869_v30  ;;  %1465 = vmatpush.msrb.mxu3 %v4742_v3 }
 0x359   :  { %1406 = vmatpush.msra.mxu0 %v4633_v22  ;;  %1426 = vmatpush.msra.mxu1 %v4874_v37  ;;  %v6564_v22 = vld [vmem:[#allocation38_spill] sm:$0xff] }
 0x35a   :  { %1446 = vmatpush.msra.mxu2 %v4877_v45  ;;  %1466 = vmatpush.msrb.mxu3 %v4748_v5 }
 0x35b   :  { %1407 = vmatpush.msra.mxu0 %v4639_v27  ;;  %1427 = vmatpush.msra.mxu1 %v4882_v15  ;;  %v6565_v27 = vld [vmem:[#allocation25_spill] sm:$0xff] }
 0x35c   :  { %1447 = vmatpush.msra.mxu2 %v6556_v35  ;;  %1467 = vmatpush.msrb.mxu3 %v6557_v1 }
 0x35d   :  { %1408 = vmatpush.msra.mxu0 %v6558_v19  ;;  %1428 = vmatpush.msra.mxu1 %v6559_v55 }
 0x35e   :  { %1448 = vmatpush.msra.mxu2 %v6560_v59  ;;  %1468 = vmatpush.msrb.mxu3 %v6561_v2 }
 0x35f   :  { %1409 = vmatpush.msra.mxu0 %v6562_v7  ;;  %1429 = vmatpush.msra.mxu1 %v6563_v12 }
 0x360   :  { %1449 = vmatpush.msra.mxu2 %v6564_v22  ;;  %1469 = vmatpush.msrb.mxu3 %v6565_v27 }
 0x361   :  { %1410 = vmatpush.msra.mxu0 %v6566_v31  ;;  %1430 = vmatpush.msra.mxu1 %v6567_v9 }
 0x362   :  { %1450 = vmatpush.msra.mxu2 %v6568_v28  ;;  %1470 = vmatpush.msrb.mxu3 %v6569_v51 }
 0x363   :  { %1411 = vmatpush.msra.mxu0 %v6570_v52  ;;  %1431 = vmatpush.msra.mxu1 %v6571_v60 }
 0x364   :  { %1451 = vmatpush.msra.mxu2 %v6572_v13  ;;  %1471 = vmatpush.msrb.mxu3 %v6573_v21 }
 0x365   :  { %1412 = vmatpush.msra.mxu0 %v6574_v4  ;;  %1432 = vmatpush.msra.mxu1 %v6575_v8  ;;  %v6586_v4 = vld [vmem:[#allocation60_spill] sm:$0xff] }
 0x366   :  { %1452 = vmatpush.msra.mxu2 %v6576_v46  ;;  %1472 = vmatpush.msrb.mxu3 %v6577_v38 }
 0x367   :  { %1413 = vmatpush.msra.mxu0 %v6578_v61  ;;  %1433 = vmatpush.msra.mxu1 %v6579_v43  ;;  %v439_v43 = vadd.f32 %v6587_v11, %v6586_v4 }
 0x368   :  { %1453 = vmatpush.msra.mxu2 %v6580_v42  ;;  %1473 = vmatpush.msrb.mxu3 %v6581_v40 }
 0x3c4   :  { %v1111_v48 = vpop.f32.mrf.mxu0  ;;  %v1131_v41 = vpop.f32.mrf.mxu1 }
 0x3c5   :  { %v1174_v19 = vadd.f32 %v1111_v48, %v316_v53  ;;  %v1175_v7 = vadd.f32 %v1131_v41, %v357_v10  ;;  %v6588_v10 = vld [vmem:[#allocation65_spill] sm:$0xff]  ;;  %v6589_v48 = vld [vmem:[#allocation55_spill] sm:$0xff] }
 0x3c6   :  { %v398_v41 = vadd.f32 %v6589_v48, %v6588_v10 }
 0x3c7   :  { %v3367_v31 = vmul.f32 -1.442695, %v1174_v19  ;;  %v3368_v52 = vmul.f32 -1.442695, %v1175_v7 }
 0x3c9   :  { %3497 = vpow2.f32 %v3367_v31 }
 0x3ca   :  { %3499 = vpow2.f32 %v3368_v52 }
 0x3cb   :  { %v1171_v42 = vpop.f32.mrf.mxu3  ;;  %v1151_v32 = vpop.f32.mrf.mxu2 }
 0x3cc   :  { %v1177_v61 = vadd.f32 %v1171_v42, %v439_v43  ;;  %v1176_v31 = vadd.f32 %v1151_v32, %v398_v41 }
 0x3ce   :  { %v3369_v40 = vmul.f32 -1.442695, %v1177_v61 }
 0x3cf   :  { %v3498_v38 = vpop.eup %3497 }
 0x3d0   :  { %v3500_v46 = vpop.eup %3499  ;;  %v1185_v50 = vadd.f32 1.0, %v3498_v38  ;;  %3501 = vpow2.f32 %v3369_v40 }
 0x3d1   :  { %v1204_v33 = vadd.f32 1.0, %v3500_v46 }
 0x3d2   :  { %3503 = vrcp.f32 %v1185_v50  ;;  %v1197_v4 = vand.u32 2147483648, %v1185_v50  ;;  %v1195_v40 = vand.u32 2147483647, %v1185_v50  ;;  %vm1191_vm2 = vweird.f32 %v1185_v50 }
 0x3d3   :  { %3505 = vrcp.f32 %v1204_v33  ;;  %v1216_v38 = vand.u32 2147483648, %v1204_v33  ;;  %v1214_v8 = vand.u32 2147483647, %v1204_v33  ;;  %vm1210_vm3 = vweird.f32 %v1204_v33 }
 0x3d4   :  { %v1198_v32 = vor.u32 1.1754944e-38, %v1197_v4  ;;  %vm1196_vm6 = vcmp.eq.f32.partialorder %v1195_v40, 8.507059e+37 }
 0x3d5   :  { %vm1215_vm7 = vcmp.eq.f32.partialorder %v1214_v8, 8.507059e+37 }
 0x3d6   :  { %v3502_v53 = vpop.eup %3501 }
 0x3d7   :  { %v1224_v19 = vadd.f32 1.0, %v3502_v53 }
 0x3d8   :  { %v3504_v7 = vpop.eup %3503 }
 0x3d9   :  { %v3506_v11 = vpop.eup %3505  ;;  %v1187_v52 = vmul.f32 %v3504_v7, %v1185_v50  ;;  %3507 = vrcp.f32 %v1224_v19  ;;  %vm1192_vm0 = vweird.f32 %v3504_v7  ;;  %vm1230_vm9 = vweird.f32 %v1224_v19 }
 0x3da   :  { %v1206_v43 = vmul.f32 %v3506_v11, %v1204_v33  ;;  %3509 = vtanh.f32 %v1176_v31  ;;  %vm1211_vm1 = vweird.f32 %v3506_v11  ;;  %vm1193_vm4 = vmor %vm1191_vm2, %vm1192_vm0  ;;  %v1234_v4 = vand.u32 2147483647, %v1224_v19 }
 0x3db   :  { %v1188_v61 = vsub.f32 1.0, %v1187_v52  ;;  %vm1212_vm5 = vmor %vm1210_vm3, %vm1211_vm1  ;;  %v1217_v52 = vor.u32 1.1754944e-38, %v1216_v38 }
 0x3dc   :  { %v1207_v42 = vsub.f32 1.0, %v1206_v43  ;;  %vm1235_vm11 = vcmp.eq.f32.partialorder %v1234_v4, 8.507059e+37 }
 0x3dd   :  { %v1189_v46 = vmul.f32 %v3504_v7, %v1188_v61 }
 0x3de   :  { %v1208_v24 = vmul.f32 %v3506_v11, %v1207_v42 }
 0x3df   :  { %v3508_v21 = vpop.eup %3507  ;;  %v1190_v48 = vadd.f32 %v3504_v7, %v1189_v46 }
 0x3e0   :  { %v1209_v53 = vadd.f32 %v3506_v11, %v1208_v24  ;;  %v1226_v41 = vmul.f32 %v3508_v21, %v1224_v19  ;;  %v3510_v31 = vpop.eup %3509  ;;  %vm1231_vm8 = vweird.f32 %v3508_v21  ;;  %v1236_v24 = vand.u32 2147483648, %v1224_v19 }
 0x3e1   :  { %v1194_v43 = vsel %vm1193_vm4, %v3504_v7, %v1190_v48  ;;  %vm1232_vm10 = vmor %vm1230_vm9, %vm1231_vm8 }
 0x3e2   :  { %v1199_v10 = vsel %vm1196_vm6, %v1198_v32, %v1194_v43  ;;  %v1213_v61 = vsel %vm1212_vm5, %v3506_v11, %v1209_v53  ;;  %v1227_v13 = vsub.f32 1.0, %v1226_v41  ;;  %v1237_v38 = vor.u32 1.1754944e-38, %v1236_v24  ;;  %v6607_v43 = vld [vmem:[#allocation65_spill] sm:$0xff] }
 0x3e3   :  { %v1218_v42 = vsel %vm1215_vm7, %v1217_v52, %v1213_v61  ;;  %v1241_v60 = vmul.f32 %v3510_v31, %v1199_v10  ;;  %v6608_v31 = vld [vmem:[#allocation59_spill] sm:$0xff] }
 0x3e4   :  { %v1240_v51 = vmul.f32 %v1218_v42, %v4950_v49  ;;  %v1228_v46 = vmul.f32 %v3508_v21, %v1227_v13  ;;  %v3753_v49 = vld [vmem:[#allocation9 + $0x1e0] sm:$0xff]  ;;  %v401_v61 = vadd.f32 %v6608_v31, %v6607_v43  ;;  %v6609_v31 = vld [vmem:[#allocation39_spill] sm:$0xff] }
 0x3e6   :  { %v5032_v50 = vadd.f32 %v1241_v60, %v1240_v51  ;;  %v1229_v33 = vadd.f32 %v3508_v21, %v1228_v46  ;;  %v3754_v51 = vld [vmem:[#allocation9 + $0x1c0] sm:$0xff] }
 0x3e7   :  { %v3755_v60 = vld [vmem:[#allocation9 + $0x1a0] sm:$0xff] }
 0x3e8   :  { %3511 = vtanh.f32 %v5032_v50  ;;  %v1233_v7 = vsel %vm1232_vm10, %v3508_v21, %v1229_v33 }
 0x3e9   :  { %v1238_v11 = vsel %vm1235_vm11, %v1237_v38, %v1233_v7 }
 0x3ee   :  { %v3512_v8 = vpop.eup %3511 }
 0x3ef   :  { %v5035_v40 = vmul.f32 %v3512_v8, %v1238_v11 }
 0x3f1   :  { %1262 = vmatmul.f32.vlgmr.msrb.gmra.mxu0 %v5035_v40  ;;  %1282 = vmatmul.f32.vlgmr.msrb.gmra.mxu1 %v5035_v40 }
 0x3f2   :  { %1302 = vmatmul.f32.vlgmr.msrb.gmra.mxu2 %v5035_v40  ;;  %1322 = vmatmul.f32.vlgmr.msra.gmra.mxu3 %v5035_v40 }
 0x3f3   :  { %1550 = vmatpush.msrb.mxu0 %v3753_v49  ;;  %1570 = vmatpush.msrb.mxu1 %v4810_v25  ;;  %v3756_v25 = vld [vmem:[#allocation9 + $0x180] sm:$0xff] }
 0x3f4   :  { %1590 = vmatpush.msrb.mxu2 %v4813_v39  ;;  %1610 = vmatpush.msra.mxu3 %v4700_v57  ;;  %v3757_v57 = vld [vmem:[#allocation9 + $0x160] sm:$0xff] }
 0x3f5   :  { %1551 = vmatpush.msrb.mxu0 %v3754_v51  ;;  %1571 = vmatpush.msrb.mxu1 %v4818_v36  ;;  %v6590_v39 = vld [vmem:[#allocation46_spill] sm:$0xff] }
 0x3f6   :  { %1591 = vmatpush.msrb.mxu2 %v4821_v23  ;;  %1611 = vmatpush.msra.mxu3 %v4706_v62  ;;  %v3758_v62 = vld [vmem:[#allocation9 + $0x140] sm:$0xff]  ;;  %v6591_v23 = vld [vmem:[#allocation47_spill] sm:$0xff] }
 0x3f7   :  { %1552 = vmatpush.msrb.mxu0 %v3755_v60  ;;  %1572 = vmatpush.msrb.mxu1 %v4826_v34  ;;  %v3766_v36 = vld [vmem:[#allocation9 + $0x40] sm:$0xff] }
 0x3f8   :  { %1592 = vmatpush.msrb.mxu2 %v4829_v44  ;;  %1612 = vmatpush.msra.mxu3 %v4712_v54  ;;  %v3759_v54 = vld [vmem:[#allocation9 + $0x120] sm:$0xff] }
 0x3f9   :  { %1553 = vmatpush.msrb.mxu0 %v3756_v25  ;;  %1573 = vmatpush.msrb.mxu1 %v4834_v6  ;;  %v6592_v34 = vld [vmem:[#allocation41_spill] sm:$0xff] }
 0x3fa   :  { %1593 = vmatpush.msrb.mxu2 %v4837_v20  ;;  %1613 = vmatpush.msra.mxu3 %v4718_v56  ;;  %v3760_v56 = vld [vmem:[#allocation9 + $0x100] sm:$0xff] }
 0x3fb   :  { %1554 = vmatpush.msrb.mxu0 %v3757_v57  ;;  %1574 = vmatpush.msrb.mxu1 %v4842_v26  ;;  %v6593_v44 = vld [vmem:[#allocation33_spill] sm:$0xff]  ;;  %v6595_v26 = vld [vmem:[#allocation70_spill] sm:$0xff] }
 0x3fc   :  { %1594 = vmatpush.msrb.mxu2 %v4845_v29  ;;  %1614 = vmatpush.msra.mxu3 %v4724_v58  ;;  %v3761_v58 = vld [vmem:[#allocation9 + $0xe0] sm:$0xff]  ;;  %v6596_v29 = vld [vmem:[#allocation71_spill] sm:$0xff] }
 0x3fd   :  { %1555 = vmatpush.msrb.mxu0 %v3758_v62  ;;  %1575 = vmatpush.msrb.mxu1 %v4850_v17  ;;  %v3767_v6 = vld [vmem:[#allocation9 + $0x20] sm:$0xff]  ;;  %v6597_v17 = vld [vmem:[#allocation32_spill] sm:$0xff] }
 0x3fe   :  { %1595 = vmatpush.msrb.mxu2 %v4853_v14  ;;  %1615 = vmatpush.msra.mxu3 %v4730_v63  ;;  %v3762_v63 = vld [vmem:[#allocation9 + $0xc0] sm:$0xff]  ;;  %v6598_v14 = vld [vmem:[#allocation72_spill] sm:$0xff] }
 0x3ff   :  { %1556 = vmatpush.msrb.mxu0 %v3759_v54  ;;  %1576 = vmatpush.msrb.mxu1 %v4858_v16  ;;  %v6594_v20 = vld [vmem:[#allocation49_spill] sm:$0xff] }
 0x400   :  { %1596 = vmatpush.msrb.mxu2 %v4861_v47  ;;  %1616 = vmatpush.msra.mxu3 %v4736_v0  ;;  %v3763_v0 = vld [vmem:[#allocation9 + $0xa0] sm:$0xff] }
 0x401   :  { %1557 = vmatpush.msrb.mxu0 %v3760_v56  ;;  %1577 = vmatpush.msrb.mxu1 %v4866_v18  ;;  %v6599_v16 = vld [vmem:[#allocation73_spill] sm:$0xff]  ;;  %v6600_v47 = vld [vmem:[#allocation74_spill] sm:$0xff] }
 0x402   :  { %1597 = vmatpush.msrb.mxu2 %v4869_v30  ;;  %1617 = vmatpush.msra.mxu3 %v4742_v3  ;;  %v3764_v3 = vld [vmem:[#allocation9 + $0x80] sm:$0xff]  ;;  %v6602_v30 = vld [vmem:[#allocation24_spill] sm:$0xff] }
 0x403   :  { %1558 = vmatpush.msrb.mxu0 %v3761_v58  ;;  %1578 = vmatpush.msrb.mxu1 %v4874_v37  ;;  %v6601_v18 = vld [vmem:[#allocation54_spill] sm:$0xff] }
 0x404   :  { %1598 = vmatpush.msrb.mxu2 %v4877_v45  ;;  %1618 = vmatpush.msra.mxu3 %v4748_v5  ;;  %v3765_v5 = vld [vmem:[#allocation9 + $0x60] sm:$0xff]  ;;  %v319_v37 = vadd.f32 %v6602_v30, %v6601_v18 }
 0x405   :  { %1559 = vmatpush.msrb.mxu0 %v3762_v63  ;;  %1579 = vmatpush.msrb.mxu1 %v4882_v15  ;;  %v6603_v45 = vld [vmem:[#allocation62_spill] sm:$0xff]  ;;  %v6604_v15 = vld [vmem:[#allocation56_spill] sm:$0xff] }
 0x406   :  { %1599 = vmatpush.msrb.mxu2 %v6556_v35  ;;  %1619 = vmatpush.msra.mxu3 %v6557_v1  ;;  %v360_v35 = vadd.f32 %v6604_v15, %v6603_v45 }
 0x407   :  { %1560 = vmatpush.msrb.mxu0 %v3763_v0  ;;  %1580 = vmatpush.msrb.mxu1 %v6559_v55 }
 0x408   :  { %1600 = vmatpush.msrb.mxu2 %v6560_v59  ;;  %1620 = vmatpush.msra.mxu3 %v6561_v2 }
 0x409   :  { %1561 = vmatpush.msrb.mxu0 %v3764_v3  ;;  %1581 = vmatpush.msrb.mxu1 %v6563_v12 }
 0x40a   :  { %1601 = vmatpush.msrb.mxu2 %v6564_v22  ;;  %1621 = vmatpush.msra.mxu3 %v6565_v27  ;;  %v6605_v27 = vld [vmem:[#allocation60_spill] sm:$0xff] }
 0x40b   :  { %1562 = vmatpush.msrb.mxu0 %v3765_v5  ;;  %1582 = vmatpush.msrb.mxu1 %v6567_v9  ;;  %v6606_v9 = vld [vmem:[#allocation48_spill] sm:$0xff] }
 0x40c   :  { %1602 = vmatpush.msrb.mxu2 %v6568_v28  ;;  %1622 = vmatpush.msra.mxu3 %v6590_v39  ;;  %v442_v28 = vadd.f32 %v6606_v9, %v6605_v27  ;;  %v1750_v9 = vld [vmem:[#allocation12 + $0x1a0] sm:$0xff] }
 0x40d   :  { %1563 = vmatpush.msrb.mxu0 %v3766_v36  ;;  %1583 = vmatpush.msrb.mxu1 %v6591_v23 }
 0x40e   :  { %1603 = vmatpush.msrb.mxu2 %v6592_v34  ;;  %1623 = vmatpush.msra.mxu3 %v6593_v44 }
 0x40f   :  { %1564 = vmatpush.msrb.mxu0 %v3767_v6  ;;  %1584 = vmatpush.msrb.mxu1 %v6594_v20 }
 0x410   :  { %1604 = vmatpush.msrb.mxu2 %v6595_v26  ;;  %1624 = vmatpush.msra.mxu3 %v6596_v29 }
 0x411   :  { %1565 = vmatpush.msrb.mxu0 %v6597_v17  ;;  %1585 = vmatpush.msrb.mxu1 %v6598_v14 }
 0x412   :  { %1605 = vmatpush.msrb.mxu2 %v6599_v16  ;;  %1625 = vmatpush.msra.mxu3 %v6600_v47 }
 0x46e   :  { %v1263_v1 = vpop.f32.mrf.mxu0  ;;  %v1283_v55 = vpop.f32.mrf.mxu1 }
 0x46f   :  { %v1326_v59 = vadd.f32 %v1263_v1, %v319_v37  ;;  %v1327_v2 = vadd.f32 %v1283_v55, %v360_v35  ;;  %v1759_v35 = vld [vmem:[#allocation12 + $0x1e8] sm:$0xff]  ;;  %v1760_v1 = vld [vmem:[#allocation12 + $0x1f0] sm:$0xff]  ;;  %v1761_v55 = vld [vmem:[#allocation12 + $0x1f8] sm:$0xff] }
 0x471   :  { %v3370_v12 = vmul.f32 -1.442695, %v1326_v59  ;;  %v3371_v22 = vmul.f32 -1.442695, %v1327_v2  ;;  %v1754_v59 = vld [vmem:[#allocation12 + $0x1c0] sm:$0xff]  ;;  %v1755_v2 = vld [vmem:[#allocation12 + $0x1c8] sm:$0xff] }
 0x473   :  { %3513 = vpow2.f32 %v3370_v12  ;;  %v1756_v12 = vld [vmem:[#allocation12 + $0x1d0] sm:$0xff] }
 0x474   :  { %3515 = vpow2.f32 %v3371_v22  ;;  %v1757_v22 = vld [vmem:[#allocation12 + $0x1d8] sm:$0xff] }
 0x475   :  { %v1323_v13 = vpop.f32.mrf.mxu3  ;;  %v1303_v41 = vpop.f32.mrf.mxu2 }
 0x476   :  { %v1329_v21 = vadd.f32 %v1323_v13, %v442_v28  ;;  %v1328_v33 = vadd.f32 %v1303_v41, %v401_v61  ;;  %v1751_v28 = vld [vmem:[#allocation12 + $0x1a8] sm:$0xff]  ;;  %v1752_v13 = vld [vmem:[#allocation12 + $0x1b0] sm:$0xff]  ;;  %v322_v61 = vadd.f32 %v6609_v31, %v6601_v18 }
 0x477   :  { %v1743_v41 = vld [vmem:[#allocation12 + $0x168] sm:$0xff] }
 0x478   :  { %v3372_v10 = vmul.f32 -1.442695, %v1329_v21  ;;  %v1753_v21 = vld [vmem:[#allocation12 + $0x1b8] sm:$0xff] }
 0x479   :  { %v3514_v19 = vpop.eup %3513 }
 0x47a   :  { %v3516_v48 = vpop.eup %3515  ;;  %v1337_v32 = vadd.f32 1.0, %v3514_v19  ;;  %3517 = vpow2.f32 %v3372_v10  ;;  %v1746_v10 = vld [vmem:[#allocation12 + $0x180] sm:$0xff]  ;;  %v1747_v19 = vld [vmem:[#allocation12 + $0x188] sm:$0xff] }
 0x47b   :  { %v1356_v53 = vadd.f32 1.0, %v3516_v48  ;;  %v1748_v48 = vld [vmem:[#allocation12 + $0x190] sm:$0xff] }
 0x47c   :  { %3519 = vrcp.f32 %v1337_v32  ;;  %v1349_v11 = vand.u32 2147483648, %v1337_v32  ;;  %v1347_v60 = vand.u32 2147483647, %v1337_v32  ;;  %vm1343_vm14 = vweird.f32 %v1337_v32 }
 0x47d   :  { %3521 = vrcp.f32 %v1356_v53  ;;  %v1368_v49 = vand.u32 2147483648, %v1356_v53  ;;  %v1366_v57 = vand.u32 2147483647, %v1356_v53  ;;  %vm1362_vm15 = vweird.f32 %v1356_v53 }
 0x47e   :  { %v1350_v56 = vor.u32 1.1754944e-38, %v1349_v11  ;;  %vm1348_vm2 = vcmp.eq.f32.partialorder %v1347_v60, 8.507059e+37  ;;  %v1734_v60 = vld [vmem:[#allocation12 + $0x120] sm:$0xff] }
 0x47f   :  { %v1369_v0 = vor.u32 1.1754944e-38, %v1368_v49  ;;  %vm1367_vm3 = vcmp.eq.f32.partialorder %v1366_v57, 8.507059e+37  ;;  %v1736_v57 = vld [vmem:[#allocation12 + $0x130] sm:$0xff] }
 0x480   :  { %v3518_v52 = vpop.eup %3517 }
 0x481   :  { %v1376_v42 = vadd.f32 1.0, %v3518_v52  ;;  %v1744_v52 = vld [vmem:[#allocation12 + $0x170] sm:$0xff] }
 0x482   :  { %v3520_v46 = vpop.eup %3519 }
 0x483   :  { %v3522_v24 = vpop.eup %3521  ;;  %v1339_v4 = vmul.f32 %v3520_v46, %v1337_v32  ;;  %3523 = vrcp.f32 %v1376_v42  ;;  %vm1344_vm12 = vweird.f32 %v3520_v46  ;;  %v1388_v17 = vand.u32 2147483648, %v1376_v42  ;;  %v1749_v32 = vld [vmem:[#allocation12 + $0x198] sm:$0xff] }
 0x484   :  { %v1358_v7 = vmul.f32 %v3522_v24, %v1356_v53  ;;  %3525 = vtanh.f32 %v1328_v33  ;;  %vm1363_vm13 = vweird.f32 %v3522_v24  ;;  %vm1345_vm0 = vmor %vm1343_vm14, %vm1344_vm12  ;;  %vm1382_vm5 = vweird.f32 %v1376_v42  ;;  %v1742_v53 = vld [vmem:[#allocation12 + $0x160] sm:$0xff]  ;;  %v1745_v33 = vld [vmem:[#allocation12 + $0x178] sm:$0xff] }
 0x485   :  { %v1340_v38 = vsub.f32 1.0, %v1339_v4  ;;  %vm1364_vm1 = vmor %vm1362_vm15, %vm1363_vm13  ;;  %v1386_v14 = vand.u32 2147483647, %v1376_v42  ;;  %v1389_v47 = vor.u32 1.1754944e-38, %v1388_v17  ;;  %v1723_v17 = vld [vmem:[#allocation12 + $0xc8] sm:$0xff] }
 0x486   :  { %v1359_v8 = vsub.f32 1.0, %v1358_v7  ;;  %v1738_v7 = vld [vmem:[#allocation12 + $0x140] sm:$0xff] }
 0x487   :  { %v1341_v51 = vmul.f32 %v3520_v46, %v1340_v38  ;;  %vm1387_vm7 = vcmp.eq.f32.partialorder %v1386_v14, 8.507059e+37  ;;  %v1739_v38 = vld [vmem:[#allocation12 + $0x148] sm:$0xff]  ;;  %v1724_v14 = vld [vmem:[#allocation12 + $0xd0] sm:$0xff] }
 0x488   :  { %v1360_v25 = vmul.f32 %v3522_v24, %v1359_v8  ;;  %v1740_v8 = vld [vmem:[#allocation12 + $0x150] sm:$0xff] }
 0x489   :  { %v3524_v62 = vpop.eup %3523  ;;  %v1342_v54 = vadd.f32 %v3520_v46, %v1341_v51  ;;  %v1741_v51 = vld [vmem:[#allocation12 + $0x158] sm:$0xff] }
 0x48a   :  { %v1361_v58 = vadd.f32 %v3522_v24, %v1360_v25  ;;  %v1378_v63 = vmul.f32 %v3524_v62, %v1376_v42  ;;  %v3526_v5 = vpop.eup %3525  ;;  %vm1383_vm4 = vweird.f32 %v3524_v62  ;;  %v6610_v42 = vld [vmem:[#allocation58_spill] sm:$0xff]  ;;  %v1735_v25 = vld [vmem:[#allocation12 + $0x128] sm:$0xff] }
 0x48b   :  { %v1346_v3 = vsel %vm1345_vm0, %v3520_v46, %v1342_v54  ;;  %vm1384_vm6 = vmor %vm1382_vm5, %vm1383_vm4  ;;  %v363_v46 = vadd.f32 %v6610_v42, %v6603_v45  ;;  %v1704_v42 = vld [vmem:[#allocation12 + $0x30] sm:$0xff] }
 0x48c   :  { %v1351_v39 = vsel %vm1348_vm2, %v1350_v56, %v1346_v3  ;;  %v1365_v36 = vsel %vm1364_vm1, %v3522_v24, %v1361_v58  ;;  %v1379_v23 = vsub.f32 1.0, %v1378_v63  ;;  %v1737_v56 = vld [vmem:[#allocation12 + $0x138] sm:$0xff]  ;;  %v1730_v58 = vld [vmem:[#allocation12 + $0x100] sm:$0xff]  ;;  %v1731_v63 = vld [vmem:[#allocation12 + $0x108] sm:$0xff] }
 0x48d   :  { %v1370_v34 = vsel %vm1367_vm3, %v1369_v0, %v1365_v36  ;;  %v1393_v44 = vmul.f32 %v3526_v5, %v1351_v39  ;;  %v1732_v0 = vld [vmem:[#allocation12 + $0x110] sm:$0xff]  ;;  %v1733_v3 = vld [vmem:[#allocation12 + $0x118] sm:$0xff]  ;;  %v1726_v36 = vld [vmem:[#allocation12 + $0xe0] sm:$0xff] }
 0x48e   :  { %v1392_v6 = vmul.f32 %v1370_v34, %v5032_v50  ;;  %v1380_v20 = vmul.f32 %v3524_v62, %v1379_v23  ;;  %v1758_v50 = vld [vmem:[#allocation12 + $0x1e0] sm:$0xff]  ;;  %v6611_v5 = vld [vmem:[#allocation53_spill] sm:$0xff]  ;;  %v1727_v23 = vld [vmem:[#allocation12 + $0xe8] sm:$0xff] }
 0x48f   :  { %v445_v39 = vadd.f32 %v6611_v5, %v6605_v27  ;;  %v1728_v34 = vld [vmem:[#allocation12 + $0xf0] sm:$0xff] }
 0x490   :  { %v5099_v26 = vadd.f32 %v1393_v44, %v1392_v6  ;;  %v1381_v29 = vadd.f32 %v3524_v62, %v1380_v20  ;;  %v1729_v6 = vld [vmem:[#allocation12 + $0xf8] sm:$0xff] }
 0x492   :  { %3527 = vtanh.f32 %v5099_v26  ;;  %v1385_v16 = vsel %vm1384_vm6, %v3524_v62, %v1381_v29  ;;  %v1722_v29 = vld [vmem:[#allocation12 + $0xc0] sm:$0xff] }
 0x493   :  { %v1390_v37 = vsel %vm1387_vm7, %v1389_v47, %v1385_v16  ;;  %v1725_v16 = vld [vmem:[#allocation12 + $0xd8] sm:$0xff] }
 0x498   :  { %v3528_v30 = vpop.eup %3527 }
 0x499   :  { %v5102_v15 = vmul.f32 %v3528_v30, %v1390_v37  ;;  %v1718_v30 = vld [vmem:[#allocation12 + $0xa0] sm:$0xff]  ;;  %v1719_v37 = vld [vmem:[#allocation12 + $0xa8] sm:$0xff] }
 0x49b   :  { %1414 = vmatmul.f32.vlgmr.msra.gmra.mxu0 %v5102_v15  ;;  %1434 = vmatmul.f32.vlgmr.msra.gmra.mxu1 %v5102_v15 }
 0x49c   :  { %1454 = vmatmul.f32.vlgmr.msra.gmra.mxu2 %v5102_v15  ;;  %1474 = vmatmul.f32.vlgmr.msrb.gmra.mxu3 %v5102_v15 }
 0x49d   :  { %1844 = vmatpush.msra.mxu0 %v1758_v50  ;;  %1885 = vmatpush.msra.mxu1 %v1759_v35  ;;  %v1720_v50 = vld [vmem:[#allocation12 + $0xb0] sm:$0xff] }
 0x49e   :  { %1926 = vmatpush.msra.mxu2 %v1760_v1  ;;  %1967 = vmatpush.msrb.mxu3 %v1761_v55  ;;  %v1721_v1 = vld [vmem:[#allocation12 + $0xb8] sm:$0xff]  ;;  %v1714_v55 = vld [vmem:[#allocation12 + $0x80] sm:$0xff] }
 0x49f   :  { %1845 = vmatpush.msra.mxu0 %v1754_v59  ;;  %1886 = vmatpush.msra.mxu1 %v1755_v2  ;;  %v1715_v59 = vld [vmem:[#allocation12 + $0x88] sm:$0xff] }
 0x4a0   :  { %1927 = vmatpush.msra.mxu2 %v1756_v12  ;;  %1968 = vmatpush.msrb.mxu3 %v1757_v22  ;;  %v1716_v22 = vld [vmem:[#allocation12 + $0x90] sm:$0xff] }
 0x4a1   :  { %1846 = vmatpush.msra.mxu0 %v1750_v9  ;;  %1887 = vmatpush.msra.mxu1 %v1751_v28  ;;  %v1717_v9 = vld [vmem:[#allocation12 + $0x98] sm:$0xff] }
 0x4a2   :  { %1928 = vmatpush.msra.mxu2 %v1752_v13  ;;  %1969 = vmatpush.msrb.mxu3 %v1753_v21  ;;  %v1710_v13 = vld [vmem:[#allocation12 + $0x60] sm:$0xff]  ;;  %v1711_v21 = vld [vmem:[#allocation12 + $0x68] sm:$0xff] }
 0x4a3   :  { %1847 = vmatpush.msra.mxu0 %v1746_v10  ;;  %1888 = vmatpush.msra.mxu1 %v1747_v19  ;;  %v1712_v10 = vld [vmem:[#allocation12 + $0x70] sm:$0xff]  ;;  %v1713_v19 = vld [vmem:[#allocation12 + $0x78] sm:$0xff] }
 0x4a4   :  { %1929 = vmatpush.msra.mxu2 %v1748_v48  ;;  %1970 = vmatpush.msrb.mxu3 %v1749_v32  ;;  %v1706_v48 = vld [vmem:[#allocation12 + $0x40] sm:$0xff]  ;;  %v1707_v32 = vld [vmem:[#allocation12 + $0x48] sm:$0xff] }
 0x4a5   :  { %1848 = vmatpush.msra.mxu0 %v1742_v53  ;;  %1889 = vmatpush.msra.mxu1 %v1743_v41  ;;  %v1708_v53 = vld [vmem:[#allocation12 + $0x50] sm:$0xff]  ;;  %v1709_v41 = vld [vmem:[#allocation12 + $0x58] sm:$0xff] }
 0x4a6   :  { %1930 = vmatpush.msra.mxu2 %v1744_v52  ;;  %1971 = vmatpush.msrb.mxu3 %v1745_v33  ;;  %v1702_v52 = vld [vmem:[#allocation12 + $0x20] sm:$0xff] }
 0x4a7   :  { %1849 = vmatpush.msra.mxu0 %v1738_v7  ;;  %1890 = vmatpush.msra.mxu1 %v1739_v38  ;;  %v1698_v7 = vld [vmem:[#allocation12] sm:$0xff]  ;;  %v1699_v38 = vld [vmem:[#allocation12 + $0x8] sm:$0xff] }
 0x4a8   :  { %1931 = vmatpush.msra.mxu2 %v1740_v8  ;;  %1972 = vmatpush.msrb.mxu3 %v1741_v51 }
 0x4a9   :  { %1850 = vmatpush.msra.mxu0 %v1734_v60  ;;  %1891 = vmatpush.msra.mxu1 %v1735_v25 }
 0x4aa   :  { %1932 = vmatpush.msra.mxu2 %v1736_v57  ;;  %1973 = vmatpush.msrb.mxu3 %v1737_v56 }
 0x4ab   :  { %1851 = vmatpush.msra.mxu0 %v1730_v58  ;;  %1892 = vmatpush.msra.mxu1 %v1731_v63 }
 0x4ac   :  { %1933 = vmatpush.msra.mxu2 %v1732_v0  ;;  %1974 = vmatpush.msrb.mxu3 %v1733_v3 }
 0x4ad   :  { %1852 = vmatpush.msra.mxu0 %v1726_v36  ;;  %1893 = vmatpush.msra.mxu1 %v1727_v23 }
 0x4ae   :  { %1934 = vmatpush.msra.mxu2 %v1728_v34  ;;  %1975 = vmatpush.msrb.mxu3 %v1729_v6 }
 0x4af   :  { %1853 = vmatpush.msra.mxu0 %v1722_v29  ;;  %1894 = vmatpush.msra.mxu1 %v1723_v17 }
 0x4b0   :  { %1935 = vmatpush.msra.mxu2 %v1724_v14  ;;  %1976 = vmatpush.msrb.mxu3 %v1725_v16 }
 0x4b1   :  { %1854 = vmatpush.msra.mxu0 %v1718_v30  ;;  %1895 = vmatpush.msra.mxu1 %v1719_v37 }
 0x4b2   :  { %1936 = vmatpush.msra.mxu2 %v1720_v50  ;;  %1977 = vmatpush.msrb.mxu3 %v1721_v1 }
 0x4b3   :  { %1855 = vmatpush.msra.mxu0 %v1714_v55  ;;  %1896 = vmatpush.msra.mxu1 %v1715_v59 }
 0x4b4   :  { %1937 = vmatpush.msra.mxu2 %v1716_v22  ;;  %1978 = vmatpush.msrb.mxu3 %v1717_v9 }
 0x4b5   :  { %1856 = vmatpush.msra.mxu0 %v1710_v13  ;;  %1897 = vmatpush.msra.mxu1 %v1711_v21  ;;  %v6614_v21 = vld [vmem:[#allocation27_spill] sm:$0xff] }
 0x4b6   :  { %1938 = vmatpush.msra.mxu2 %v1712_v10  ;;  %1979 = vmatpush.msrb.mxu3 %v1713_v19  ;;  %v6615_v10 = vld [vmem:[#allocation34_spill] sm:$0xff] }
 0x4b7   :  { %1857 = vmatpush.msra.mxu0 %v1706_v48  ;;  %1898 = vmatpush.msra.mxu1 %v1707_v32  ;;  %v5146_v19 = vld [vmem:[#allocation13 + $0x1e0] sm:$0xff]  ;;  %v5148_v48 = vld [vmem:[#allocation13 + $0x1e8] sm:$0xff] }
 0x4b8   :  { %1939 = vmatpush.msra.mxu2 %v1708_v53  ;;  %1980 = vmatpush.msrb.mxu3 %v1709_v41  ;;  %6616 = vst [vmem:[#allocation50_spill] sm:$0xff] %v5146_v19  ;;  %v5150_v32 = vld [vmem:[#allocation13 + $0x1c0] sm:$0xff]  ;;  %v5154_v53 = vld [vmem:[#allocation13 + $0x1c8] sm:$0xff]  ;;  %v5156_v41 = vld [vmem:[#allocation13 + $0x1f8] sm:$0xff] }
 0x4b9   :  { %1858 = vmatpush.msra.mxu0 %v1702_v52  ;;  %6617 = vst [vmem:[#allocation43_spill] sm:$0xff] %v5154_v53  ;;  %v5159_v52 = vld [vmem:[#allocation13 + $0x1a0] sm:$0xff] }
 0x4ba   :  { %1940 = vmatpush.msra.mxu2 %v1704_v42  ;;  %v6620_v42 = vld [vmem:[#allocation40_spill] sm:$0xff] }
 0x4bb   :  { %1859 = vmatpush.msra.mxu0 %v1698_v7  ;;  %v5194_v7 = vld [vmem:[#allocation13 + $0x188] sm:$0xff] }
 0x518   :  { %v1415_v24 = vpop.f32.mrf.mxu0  ;;  %v1435_v4 = vpop.f32.mrf.mxu1 }
 0x519   :  { %v1478_v11 = vadd.f32 %v1415_v24, %v322_v61  ;;  %v1479_v49 = vadd.f32 %v1435_v4, %v363_v46  ;;  %v1703_v61 = vld [vmem:[#allocation12 + $0x28] sm:$0xff]  ;;  %v1705_v46 = vld [vmem:[#allocation12 + $0x38] sm:$0xff] }
 0x51a   :  { %v6612_v24 = vld [vmem:[#allocation63_spill] sm:$0xff]  ;;  %1899 = vmatpush.msra.mxu1 %v1703_v61  ;;  %1981 = vmatpush.msrb.mxu3 %v1705_v46  ;;  %v5163_v61 = vld [vmem:[#allocation13 + $0x1d8] sm:$0xff]  ;;  %v5182_v46 = vld [vmem:[#allocation13 + $0x1f0] sm:$0xff] }
 0x51b   :  { %v3373_v62 = vmul.f32 -1.442695, %v1478_v11  ;;  %v3374_v54 = vmul.f32 -1.442695, %v1479_v49  ;;  %v404_v4 = vadd.f32 %v6612_v24, %v6607_v43  ;;  %v1700_v11 = vld [vmem:[#allocation12 + $0x10] sm:$0xff]  ;;  %v1701_v49 = vld [vmem:[#allocation12 + $0x18] sm:$0xff] }
 0x51c   :  { %1900 = vmatpush.msra.mxu1 %v1699_v38  ;;  %1941 = vmatpush.msra.mxu2 %v1700_v11  ;;  %6619 = vst [vmem:[#allocation35_spill] sm:$0xff] %v5163_v61  ;;  %v5190_v24 = vld [vmem:[#allocation13 + $0x1b0] sm:$0xff]  ;;  %v5202_v38 = vld [vmem:[#allocation13 + $0x168] sm:$0xff] }
 0x51d   :  { %3529 = vpow2.f32 %v3373_v62  ;;  %1982 = vmatpush.msrb.mxu3 %v1701_v49  ;;  %v5206_v11 = vld [vmem:[#allocation13 + $0x190] sm:$0xff]  ;;  %v5212_v49 = vld [vmem:[#allocation13 + $0x178] sm:$0xff] }
 0x51e   :  { %3531 = vpow2.f32 %v3374_v54 }
 0x51f   :  { %v1475_v44 = vpop.f32.mrf.mxu3  ;;  %v1455_v31 = vpop.f32.mrf.mxu2 }
 0x520   :  { %v1481_v20 = vadd.f32 %v1475_v44, %v445_v39  ;;  %v1480_v60 = vadd.f32 %v1455_v31, %v404_v4  ;;  %v5161_v31 = vld [vmem:[#allocation13 + $0x1a8] sm:$0xff]  ;;  %v5192_v4 = vld [vmem:[#allocation13 + $0x180] sm:$0xff] }
 0x521   :  { %6618 = vst [vmem:[#allocation51_spill] sm:$0xff] %v5161_v31 }
 0x522   :  { %v3375_v47 = vmul.f32 -1.442695, %v1481_v20  ;;  %6622 = vst [vmem:[#allocation67_spill] sm:$0xff] %v5192_v4 }
 0x523   :  { %v3530_v35 = vpop.eup %3529 }
 0x524   :  { %v3532_v2 = vpop.eup %3531  ;;  %v5114_v12 = vadd.f32 1.0, %v3530_v35  ;;  %3533 = vpow2.f32 %v3375_v47 }
 0x525   :  { %v5116_v28 = vadd.f32 1.0, %v3532_v2 }
 0x526   :  { %3535 = vrcp.f32 %v5114_v12  ;;  %v1501_v58 = vand.u32 2147483648, %v5114_v12  ;;  %v1499_v3 = vand.u32 2147483647, %v5114_v12  ;;  %vm1495_vm10 = vweird.f32 %v5114_v12 }
 0x527   :  { %3537 = vrcp.f32 %v5116_v28  ;;  %v1520_v63 = vand.u32 2147483648, %v5116_v28  ;;  %v1518_v39 = vand.u32 2147483647, %v5116_v28  ;;  %vm1514_vm11 = vweird.f32 %v5116_v28 }
 0x528   :  { %v1502_v34 = vor.u32 1.1754944e-38, %v1501_v58  ;;  %vm1500_vm14 = vcmp.eq.f32.partialorder %v1499_v3, 8.507059e+37  ;;  %v5226_v58 = vld [vmem:[#allocation13 + $0x158] sm:$0xff]  ;;  %v5230_v3 = vld [vmem:[#allocation13 + $0x150] sm:$0xff] }
 0x529   :  { %v1521_v20 = vor.u32 1.1754944e-38, %v1520_v63  ;;  %vm1519_vm15 = vcmp.eq.f32.partialorder %v1518_v39, 8.507059e+37 }
 0x52a   :  { %v3534_v33 = vpop.eup %3533 }
 0x52b   :  { %v1528_v8 = vadd.f32 1.0, %v3534_v33  ;;  %v5185_v33 = vld [vmem:[#allocation13 + $0x1d0] sm:$0xff] }
 0x52c   :  { %v3536_v51 = vpop.eup %3535 }
 0x52d   :  { %v3538_v25 = vpop.eup %3537  ;;  %v1491_v57 = vmul.f32 %v3536_v51, %v5114_v12  ;;  %3539 = vrcp.f32 %v1528_v8  ;;  %vm1496_vm8 = vweird.f32 %v3536_v51  ;;  %v1540_v59 = vand.u32 2147483648, %v1528_v8 }
 0x52e   :  { %v1510_v62 = vmul.f32 %v3538_v25, %v5116_v28  ;;  %3541 = vtanh.f32 %v1480_v60  ;;  %vm1515_vm9 = vweird.f32 %v3538_v25  ;;  %vm1497_vm12 = vmor %vm1495_vm10, %vm1496_vm8  ;;  %vm1534_vm1 = vweird.f32 %v1528_v8  ;;  %v6623_v60 = vld [vmem:[#allocation42_spill] sm:$0xff] }
 0x52f   :  { %v1492_v54 = vsub.f32 1.0, %v1491_v57  ;;  %vm1516_vm13 = vmor %vm1514_vm11, %vm1515_vm9  ;;  %v1538_v2 = vand.u32 2147483647, %v1528_v8  ;;  %v1541_v22 = vor.u32 1.1754944e-38, %v1540_v59  ;;  %v6624_v57 = vld [vmem:[#allocation61_spill] sm:$0xff]  ;;  %v5272_v59 = vld [vmem:[#allocation13 + $0xa0] sm:$0xff] }
 0x530   :  { %v1511_v56 = vsub.f32 1.0, %v1510_v62  ;;  %v366_v62 = vadd.f32 %v6624_v57, %v6603_v45  ;;  %v5237_v45 = vld [vmem:[#allocation13 + $0x138] sm:$0xff]  ;;  %6627 = vst [vmem:[#allocation30_spill] sm:$0xff] %v5272_v59 }
 0x531   :  { %v1493_v0 = vmul.f32 %v3536_v51, %v1492_v54  ;;  %vm1539_vm3 = vcmp.eq.f32.partialorder %v1538_v2, 8.507059e+37  ;;  %v5222_v54 = vld [vmem:[#allocation13 + $0x140] sm:$0xff]  ;;  %v5274_v2 = vld [vmem:[#allocation13 + $0xa8] sm:$0xff] }
 0x532   :  { %v1512_v5 = vmul.f32 %v3538_v25, %v1511_v56  ;;  %v5224_v56 = vld [vmem:[#allocation13 + $0x148] sm:$0xff]  ;;  %6628 = vst [vmem:[#allocation44_spill] sm:$0xff] %v5274_v2 }
 0x533   :  { %v3540_v36 = vpop.eup %3539  ;;  %v1494_v23 = vadd.f32 %v3536_v51, %v1493_v0 }
 0x534   :  { %v1513_v44 = vadd.f32 %v3538_v25, %v1512_v5  ;;  %v1530_v6 = vmul.f32 %v3540_v36, %v1528_v8  ;;  %v3542_v17 = vpop.eup %3541  ;;  %vm1535_vm0 = vweird.f32 %v3540_v36  ;;  %v5204_v8 = vld [vmem:[#allocation13 + $0x198] sm:$0xff] }
 0x535   :  { %v1498_v29 = vsel %vm1497_vm12, %v3536_v51, %v1494_v23  ;;  %vm1536_vm2 = vmor %vm1534_vm1, %vm1535_vm0  ;;  %v5214_v51 = vld [vmem:[#allocation13 + $0x170] sm:$0xff] }
 0x536   :  { %v1503_v14 = vsel %vm1500_vm14, %v1502_v34, %v1498_v29  ;;  %v1517_v16 = vsel %vm1516_vm13, %v3538_v25, %v1513_v44  ;;  %v1531_v47 = vsub.f32 1.0, %v1530_v6  ;;  %v325_v25 = vadd.f32 %v6623_v60, %v6601_v18  ;;  %v5232_v18 = vld [vmem:[#allocation13 + $0x120] sm:$0xff]  ;;  %v5242_v23 = vld [vmem:[#allocation13 + $0x130] sm:$0xff] }
 0x537   :  { %v1522_v30 = vsel %vm1519_vm15, %v1521_v20, %v1517_v16  ;;  %v1545_v37 = vmul.f32 %v3542_v17, %v1503_v14  ;;  %v5244_v6 = vld [vmem:[#allocation13 + $0x100] sm:$0xff]  ;;  %v5246_v20 = vld [vmem:[#allocation13 + $0x108] sm:$0xff]  ;;  %v5256_v14 = vld [vmem:[#allocation13 + $0x118] sm:$0xff] }
 0x538   :  { %v1544_v50 = vmul.f32 %v1522_v30, %v5099_v26  ;;  %v1532_v35 = vmul.f32 %v3540_v36, %v1531_v47  ;;  %v6613_v26 = vld [vmem:[#allocation66_spill] sm:$0xff]  ;;  %v5254_v17 = vld [vmem:[#allocation13 + $0xe8] sm:$0xff]  ;;  %v5263_v30 = vld [vmem:[#allocation13 + $0xf8] sm:$0xff] }
 0x539   :  { %v5252_v29 = vld [vmem:[#allocation13 + $0xe0] sm:$0xff]  ;;  %v5261_v47 = vld [vmem:[#allocation13 + $0xc8] sm:$0xff] }
 0x53a   :  { %v5131_v1 = vadd.f32 %v1545_v37, %v1544_v50  ;;  %v1533_v55 = vadd.f32 %v3540_v36, %v1532_v35  ;;  %v5259_v16 = vld [vmem:[#allocation13 + $0xc0] sm:$0xff]  ;;  %v6625_v37 = vld [vmem:[#allocation57_spill] sm:$0xff] }
 0x53b   :  { %v448_v50 = vadd.f32 %v6625_v37, %v6605_v27  ;;  %v5269_v35 = vld [vmem:[#allocation13 + $0xd8] sm:$0xff]  ;;  %v5298_v60 = vld [vmem:[#allocation13 + $0x60] sm:$0xff] }
 0x53c   :  { %3543 = vtanh.f32 %v5131_v1  ;;  %v1537_v12 = vsel %vm1536_vm2, %v3540_v36, %v1533_v55  ;;  %v5234_v36 = vld [vmem:[#allocation13 + $0x128] sm:$0xff]  ;;  %6626 = vst [vmem:[#allocation36_spill] sm:$0xff] %v5269_v35  ;;  %v5280_v27 = vld [vmem:[#allocation13 + $0xb8] sm:$0xff]  ;;  %v5326_v37 = vld [vmem:[#allocation13 + $0x20] sm:$0xff] }
 0x53d   :  { %v1542_v28 = vsel %vm1539_vm3, %v1541_v22, %v1537_v12  ;;  %v5276_v12 = vld [vmem:[#allocation13 + $0x110] sm:$0xff]  ;;  %6629 = vst [vmem:[#allocation68_spill] sm:$0xff] %v5280_v27 }
 0x53e   :  { %6634 = vst [vmem:[#allocation31_spill] sm:$0xff] %v5298_v60 }
 0x53f   :  { %6641 = vst [vmem:[#allocation55_spill] sm:$0xff] %v5326_v37 }
 0x542   :  { %v3544_v9 = vpop.eup %3543 }
 0x543   :  { %v1548_v13 = vmul.f32 %v3544_v9, %v1542_v28  ;;  %v5282_v9 = vld [vmem:[#allocation13 + $0xf0] sm:$0xff]  ;;  %v5286_v28 = vld [vmem:[#allocation13 + $0x80] sm:$0xff] }
 0x544   :  { %6630 = vst [vmem:[#allocation37_spill] sm:$0xff] %v5286_v28 }
 0x545   :  { %1566 = vmatmul.f32.vlgmr.msrb.gmra.mxu0 %v1548_v13  ;;  %1586 = vmatmul.f32.vlgmr.msrb.gmra.mxu1 %v1548_v13 }
 0x546   :  { %1606 = vmatmul.f32.vlgmr.msrb.gmra.mxu2 %v1548_v13  ;;  %1626 = vmatmul.f32.vlgmr.msra.gmra.mxu3 %v1548_v13 }
 0x547   :  { %2044 = vmatpush.msrb.mxu0 %v5146_v19  ;;  %2064 = vmatpush.msrb.mxu1 %v5148_v48 }
 0x548   :  { %2104 = vmatpush.msra.mxu3 %v5156_v41  ;;  %2084 = vmatpush.msrb.mxu2 %v5182_v46 }
 0x549   :  { %2045 = vmatpush.msrb.mxu0 %v5150_v32  ;;  %2065 = vmatpush.msrb.mxu1 %v5154_v53 }
 0x54a   :  { %2105 = vmatpush.msra.mxu3 %v5163_v61  ;;  %2085 = vmatpush.msrb.mxu2 %v5185_v33 }
 0x54b   :  { %2046 = vmatpush.msrb.mxu0 %v5159_v52  ;;  %2066 = vmatpush.msrb.mxu1 %v5161_v31 }
 0x54c   :  { %2086 = vmatpush.msrb.mxu2 %v5190_v24 }
 0x54d   :  { %1860 = vmatmul.f32.vlgmr.msra.gmra.mxu0 %v6613_v26  ;;  %1901 = vmatmul.f32.vlgmr.msra.gmra.mxu1 %v6613_v26 }
 0x54e   :  { %1942 = vmatmul.f32.vlgmr.msra.gmra.mxu2 %v6613_v26  ;;  %1983 = vmatmul.f32.vlgmr.msrb.gmra.mxu3 %v6613_v26 }
 0x54f   :  { %2047 = vmatpush.msrb.mxu0 %v5192_v4  ;;  %2067 = vmatpush.msrb.mxu1 %v5194_v7 }
 0x550   :  { %2087 = vmatpush.msrb.mxu2 %v5206_v11 }
 0x551   :  { %2068 = vmatpush.msrb.mxu1 %v5202_v38 }
 0x552   :  { %2088 = vmatpush.msrb.mxu2 %v5214_v51 }
 0x553   :  { %2069 = vmatpush.msrb.mxu1 %v5224_v56 }
 0x554   :  { %2089 = vmatpush.msrb.mxu2 %v5230_v3 }
 0x555   :  { %1863 = vmatmul.f32.gmra.mxu0 %v6614_v21  ;;  %1904 = vmatmul.f32.gmra.mxu1 %v6614_v21 }
 0x556   :  { %1945 = vmatmul.f32.gmra.mxu2 %v6614_v21  ;;  %1986 = vmatmul.f32.gmra.mxu3 %v6614_v21  ;;  %v5292_v21 = vld [vmem:[#allocation13 + $0x98] sm:$0xff] }
 0x557   :  { %2070 = vmatpush.msrb.mxu1 %v5234_v36  ;;  %2090 = vmatpush.msrb.mxu2 %v5242_v23  ;;  %6632 = vst [vmem:[#allocation25_spill] sm:$0xff] %v5292_v21 }
 0x559   :  { %2071 = vmatpush.msrb.mxu1 %v5246_v20  ;;  %2091 = vmatpush.msrb.mxu2 %v5276_v12 }
 0x55b   :  { %2072 = vmatpush.msrb.mxu1 %v5254_v17  ;;  %2092 = vmatpush.msrb.mxu2 %v5282_v9 }
 0x55d   :  { %1866 = vmatmul.f32.gmra.mxu0 %v6615_v10  ;;  %1907 = vmatmul.f32.gmra.mxu1 %v6615_v10 }
 0x55e   :  { %1948 = vmatmul.f32.gmra.mxu2 %v6615_v10  ;;  %1989 = vmatmul.f32.gmra.mxu3 %v6615_v10  ;;  %v5294_v10 = vld [vmem:[#allocation13 + $0xd0] sm:$0xff] }
 0x55f   :  { %2073 = vmatpush.msrb.mxu1 %v5261_v47  ;;  %6633 = vst [vmem:[#allocation69_spill] sm:$0xff] %v5294_v10  ;;  %2093 = vmatpush.msrb.mxu2 %v5294_v10 }
 0x561   :  { %2074 = vmatpush.msrb.mxu1 %v5274_v2 }
 0x565   :  { %1869 = vmatmul.f32.gmra.mxu0 %v6620_v42  ;;  %1910 = vmatmul.f32.gmra.mxu1 %v6620_v42 }
 0x566   :  { %1951 = vmatmul.f32.gmra.mxu2 %v6620_v42  ;;  %1992 = vmatmul.f32.gmra.mxu3 %v6620_v42 }
 0x56d   :  { %1872 = vmatmul.f32.gmra.mxu0 %v5035_v40  ;;  %1913 = vmatmul.f32.gmra.mxu1 %v5035_v40 }
 0x56e   :  { %1954 = vmatmul.f32.gmra.mxu2 %v5035_v40  ;;  %1995 = vmatmul.f32.gmra.mxu3 %v5035_v40  ;;  %v5188_v40 = vld [vmem:[#allocation13 + $0x1b8] sm:$0xff] }
 0x56f   :  { %6621 = vst [vmem:[#allocation23_spill] sm:$0xff] %v5188_v40  ;;  %2106 = vmatpush.msra.mxu3 %v5188_v40 }
 0x571   :  { %2107 = vmatpush.msra.mxu3 %v5204_v8 }
 0x573   :  { %2108 = vmatpush.msra.mxu3 %v5212_v49 }
 0x575   :  { %1875 = vmatmul.f32.gmra.mxu0 %v5102_v15  ;;  %1916 = vmatmul.f32.gmra.mxu1 %v5102_v15 }
 0x576   :  { %1957 = vmatmul.f32.gmra.mxu2 %v5102_v15  ;;  %1998 = vmatmul.f32.gmra.mxu3 %v5102_v15  ;;  %v5197_v15 = vld [vmem:[#allocation13 + $0x160] sm:$0xff] }
 0x577   :  { %2048 = vmatpush.msrb.mxu0 %v5197_v15  ;;  %2109 = vmatpush.msra.mxu3 %v5226_v58 }
 0x579   :  { %2049 = vmatpush.msrb.mxu0 %v5222_v54  ;;  %2110 = vmatpush.msra.mxu3 %v5237_v45 }
 0x57b   :  { %2050 = vmatpush.msrb.mxu0 %v5232_v18  ;;  %2111 = vmatpush.msra.mxu3 %v5256_v14 }
 0x57d   :  { %1878 = vmatmul.f32.gmra.mxu0 %v1548_v13  ;;  %1919 = vmatmul.f32.gmra.mxu1 %v1548_v13 }
 0x57e   :  { %1960 = vmatmul.f32.gmra.mxu2 %v1548_v13  ;;  %2001 = vmatmul.f32.gmra.mxu3 %v1548_v13  ;;  %v5288_v13 = vld [vmem:[#allocation13 + $0x88] sm:$0xff] }
 0x57f   :  { %2051 = vmatpush.msrb.mxu0 %v5244_v6  ;;  %2112 = vmatpush.msra.mxu3 %v5263_v30  ;;  %6631 = vst [vmem:[#allocation38_spill] sm:$0xff] %v5288_v13 }
 0x580   :  { %2075 = vmatpush.msrb.mxu1 %v5288_v13 }
 0x581   :  { %2052 = vmatpush.msrb.mxu0 %v5252_v29  ;;  %2113 = vmatpush.msra.mxu3 %v5269_v35 }
 0x583   :  { %2053 = vmatpush.msrb.mxu0 %v5259_v16  ;;  %2114 = vmatpush.msra.mxu3 %v5280_v27 }
 0x585   :  { %2054 = vmatpush.msrb.mxu0 %v5272_v59  ;;  %2115 = vmatpush.msra.mxu3 %v5292_v21  ;;  %v5350_v21 = vld [vmem:[#allocation13 + $0x18] sm:$0xff] }
 0x586   :  { %6650 = vst [vmem:[#allocation32_spill] sm:$0xff] %v5350_v21 }
 0x587   :  { %2055 = vmatpush.msrb.mxu0 %v5286_v28 }
 0x589   :  { %2056 = vmatpush.msrb.mxu0 %v5298_v60 }
 0x5c2   :  { %v1567_v63 = vpop.f32.mrf.mxu0  ;;  %v1587_v0 = vpop.f32.mrf.mxu1 }
 0x5c3   :  { %v1630_v5 = vadd.f32 %v1567_v63, %v325_v25  ;;  %v1631_v39 = vadd.f32 %v1587_v0, %v366_v62  ;;  %v5300_v25 = vld [vmem:[#allocation13 + $0x68] sm:$0xff]  ;;  %v5306_v63 = vld [vmem:[#allocation13 + $0xb0] sm:$0xff]  ;;  %v5308_v0 = vld [vmem:[#allocation13 + $0x78] sm:$0xff] }
 0x5c4   :  { %6635 = vst [vmem:[#allocation26_spill] sm:$0xff] %v5300_v25  ;;  %2076 = vmatpush.msrb.mxu1 %v5300_v25  ;;  %2094 = vmatpush.msrb.mxu2 %v5306_v63  ;;  %v6647_v25 = vld [vmem:[#allocation64_spill] sm:$0xff] }
 0x5c5   :  { %v3376_v34 = vmul.f32 -1.442695, %v1630_v5  ;;  %v3377_v44 = vmul.f32 -1.442695, %v1631_v39  ;;  %6636 = vst [vmem:[#allocation28_spill] sm:$0xff] %v5306_v63  ;;  %v5314_v39 = vld [vmem:[#allocation13 + $0x40] sm:$0xff]  ;;  %2116 = vmatpush.msra.mxu3 %v5308_v0  ;;  %v407_v60 = vadd.f32 %v6647_v25, %v6607_v43 }
 0x5c6   :  { %6637 = vst [vmem:[#allocation29_spill] sm:$0xff] %v5308_v0  ;;  %2057 = vmatpush.msrb.mxu0 %v5314_v39  ;;  %v5358_v43 = vld [vmem:[#allocation13 + $0x30] sm:$0xff] }
 0x5c7   :  { %3545 = vpow2.f32 %v3376_v34  ;;  %6638 = vst [vmem:[#allocation22_spill] sm:$0xff] %v5314_v39  ;;  %v5316_v34 = vld [vmem:[#allocation13 + $0x48] sm:$0xff]  ;;  %v5348_v39 = vld [vmem:[#allocation13 + $0x38] sm:$0xff] }
 0x5c8   :  { %3547 = vpow2.f32 %v3377_v44  ;;  %6639 = vst [vmem:[#allocation52_spill] sm:$0xff] %v5316_v34  ;;  %v5321_v44 = vld [vmem:[#allocation13 + $0x90] sm:$0xff]  ;;  %2077 = vmatpush.msrb.mxu1 %v5316_v34  ;;  %2058 = vmatpush.msrb.mxu0 %v5326_v37 }
 0x5c9   :  { %v1627_v55 = vpop.f32.mrf.mxu3  ;;  %6640 = vst [vmem:[#allocation45_spill] sm:$0xff] %v5321_v44  ;;  %2095 = vmatpush.msrb.mxu2 %v5321_v44  ;;  %v5346_v34 = vld [vmem:[#allocation13 + $0x50] sm:$0xff] }
 0x5ca   :  { %v1633_v22 = vadd.f32 %v1627_v55, %v448_v50  ;;  %v5328_v50 = vld [vmem:[#allocation13 + $0x28] sm:$0xff]  ;;  %v5330_v55 = vld [vmem:[#allocation13 + $0x58] sm:$0xff]  ;;  %6648 = vst [vmem:[#allocation70_spill] sm:$0xff] %v5346_v34 }
 0x5cb   :  { %6642 = vst [vmem:[#allocation46_spill] sm:$0xff] %v5328_v50  ;;  %2117 = vmatpush.msra.mxu3 %v5330_v55  ;;  %2078 = vmatpush.msrb.mxu1 %v5328_v50 }
 0x5cc   :  { %v3378_v26 = vmul.f32 -1.442695, %v1633_v22  ;;  %6643 = vst [vmem:[#allocation47_spill] sm:$0xff] %v5330_v55  ;;  %v5334_v22 = vld [vmem:[#allocation13 + $0x70] sm:$0xff] }
 0x5cd   :  { %v3546_v42 = vpop.eup %3545  ;;  %6644 = vst [vmem:[#allocation41_spill] sm:$0xff] %v5334_v22  ;;  %2096 = vmatpush.msrb.mxu2 %v5334_v22  ;;  %2118 = vmatpush.msra.mxu3 %v5348_v39 }
 0x5ce   :  { %v3548_v57 = vpop.eup %3547  ;;  %v5302_v62 = vadd.f32 1.0, %v3546_v42  ;;  %3549 = vpow2.f32 %v3378_v26  ;;  %v1607_v26 = vpop.f32.mrf.mxu2  ;;  %v5338_v42 = vld [vmem:[#allocation13] sm:$0xff]  ;;  %6649 = vst [vmem:[#allocation71_spill] sm:$0xff] %v5348_v39  ;;  %v5365_v39 = vld [vmem:[#allocation13 + $0x10] sm:$0xff] }
 0x5cf   :  { %v5310_v5 = vadd.f32 1.0, %v3548_v57  ;;  %6645 = vst [vmem:[#allocation33_spill] sm:$0xff] %v5338_v42  ;;  %v5340_v57 = vld [vmem:[#allocation13 + $0x8] sm:$0xff]  ;;  %v1632_v13 = vadd.f32 %v1607_v26, %v407_v60  ;;  %2059 = vmatpush.msrb.mxu0 %v5338_v42  ;;  %2097 = vmatpush.msrb.mxu2 %v5346_v34 }
 0x5d0   :  { %3551 = vrcp.f32 %v5302_v62  ;;  %6646 = vst [vmem:[#allocation49_spill] sm:$0xff] %v5340_v57  ;;  %2079 = vmatpush.msrb.mxu1 %v5340_v57  ;;  %2119 = vmatpush.msra.mxu3 %v5350_v21  ;;  %v1649_v57 = vand.u32 2147483648, %v5302_v62  ;;  %vm1643_vm6 = vweird.f32 %v5302_v62 }
 0x5d1   :  { %3553 = vrcp.f32 %v5310_v5  ;;  %6651 = vst [vmem:[#allocation72_spill] sm:$0xff] %v5358_v43  ;;  %2196 = vmatpush.msra.mxu0 %v5146_v19  ;;  %2098 = vmatpush.msrb.mxu2 %v5358_v43  ;;  %v1668_v21 = vand.u32 2147483648, %v5310_v5  ;;  %v1647_v19 = vand.u32 2147483647, %v5302_v62  ;;  %vm1662_vm7 = vweird.f32 %v5310_v5 }
 0x5d2   :  { %6652 = vst [vmem:[#allocation73_spill] sm:$0xff] %v5365_v39  ;;  %2216 = vmatpush.msra.mxu1 %v5148_v48  ;;  %2256 = vmatpush.msrb.mxu3 %v5156_v41 }
 0x5d3   :  { %2197 = vmatpush.msra.mxu0 %v5150_v32  ;;  %2099 = vmatpush.msrb.mxu2 %v5365_v39  ;;  %vm1648_vm10 = vcmp.eq.f32.partialorder %v1647_v19, 8.507059e+37 }
 0x5d4   :  { %v3550_v0 = vpop.eup %3549  ;;  %2217 = vmatpush.msra.mxu1 %v5154_v53  ;;  %2257 = vmatpush.msrb.mxu3 %v5163_v61 }
 0x5d5   :  { %v5352_v44 = vadd.f32 1.0, %v3550_v0  ;;  %2236 = vmatpush.msra.mxu2 %v5182_v46  ;;  %2198 = vmatpush.msra.mxu0 %v5159_v52 }
 0x5d6   :  { %v3552_v55 = vpop.eup %3551  ;;  %2218 = vmatpush.msra.mxu1 %v5161_v31  ;;  %2258 = vmatpush.msrb.mxu3 %v5188_v40 }
 0x5d7   :  { %v3554_v25 = vpop.eup %3553  ;;  %v1639_v50 = vmul.f32 %v3552_v55, %v5302_v62  ;;  %3555 = vrcp.f32 %v5352_v44  ;;  %vm1644_vm4 = vweird.f32 %v3552_v55  ;;  %2237 = vmatpush.msra.mxu2 %v5185_v33  ;;  %2199 = vmatpush.msra.mxu0 %v5192_v4  ;;  %v1669_v62 = vor.u32 1.1754944e-38, %v1668_v21 }
 0x5d8   :  { %v1658_v0 = vmul.f32 %v3554_v25, %v5310_v5  ;;  %3557 = vtanh.f32 %v1632_v13  ;;  %vm1663_vm5 = vweird.f32 %v3554_v25  ;;  %vm1645_vm8 = vmor %vm1643_vm6, %vm1644_vm4  ;;  %2219 = vmatpush.msra.mxu1 %v5194_v7  ;;  %2259 = vmatpush.msrb.mxu3 %v5204_v8  ;;  %vm1682_vm13 = vweird.f32 %v5352_v44 }
 0x5d9   :  { %v1640_v60 = vsub.f32 1.0, %v1639_v50  ;;  %vm1664_vm9 = vmor %vm1662_vm7, %vm1663_vm5  ;;  %2238 = vmatpush.msra.mxu2 %v5190_v24  ;;  %2200 = vmatpush.msra.mxu0 %v5197_v15 }
 0x5da   :  { %v1659_v26 = vsub.f32 1.0, %v1658_v0  ;;  %v1666_v0 = vand.u32 2147483647, %v5310_v5  ;;  %2220 = vmatpush.msra.mxu1 %v5202_v38  ;;  %2260 = vmatpush.msrb.mxu3 %v5212_v49 }
 0x5db   :  { %v1641_v42 = vmul.f32 %v3552_v55, %v1640_v60  ;;  %v1650_v60 = vor.u32 1.1754944e-38, %v1649_v57  ;;  %2239 = vmatpush.msra.mxu2 %v5206_v11  ;;  %2201 = vmatpush.msra.mxu0 %v5222_v54 }
 0x5dc   :  { %v1660_v50 = vmul.f32 %v3554_v25, %v1659_v26  ;;  %vm1667_vm11 = vcmp.eq.f32.partialorder %v1666_v0, 8.507059e+37  ;;  %2221 = vmatpush.msra.mxu1 %v5224_v56  ;;  %2261 = vmatpush.msrb.mxu3 %v5226_v58  ;;  %v6653_v0 = vld [vmem:[#allocation38_spill] sm:$0xff] }
 0x5dd   :  { %v5381_v13 = vpop.eup %3555  ;;  %v1642_v53 = vadd.f32 %v3552_v55, %v1641_v42  ;;  %2240 = vmatpush.msra.mxu2 %v5214_v51  ;;  %2202 = vmatpush.msra.mxu0 %v5232_v18 }
 0x5de   :  { %v1661_v26 = vadd.f32 %v3554_v25, %v1660_v50  ;;  %v1678_v61 = vmul.f32 %v5381_v13, %v5352_v44  ;;  %v3558_v5 = vpop.eup %3557  ;;  %vm1683_vm12 = vweird.f32 %v5381_v13  ;;  %2222 = vmatpush.msra.mxu1 %v5234_v36  ;;  %2262 = vmatpush.msrb.mxu3 %v5237_v45 }
 0x5df   :  { %v1646_v42 = vsel %vm1645_vm8, %v3552_v55, %v1642_v53  ;;  %2241 = vmatpush.msra.mxu2 %v5230_v3  ;;  %2203 = vmatpush.msra.mxu0 %v5244_v6  ;;  %vm1684_vm14 = vmor %vm1682_vm13, %vm1683_vm12 }
 0x5e0   :  { %v1651_v40 = vsel %vm1648_vm10, %v1650_v60, %v1646_v42  ;;  %v1665_v57 = vsel %vm1664_vm9, %v3554_v25, %v1661_v26  ;;  %v1679_v50 = vsub.f32 1.0, %v1678_v61  ;;  %2223 = vmatpush.msra.mxu1 %v5246_v20  ;;  %2263 = vmatpush.msrb.mxu3 %v5256_v14  ;;  %v6655_v60 = vld [vmem:[#allocation45_spill] sm:$0xff]  ;;  %v6656_v26 = vld [vmem:[#allocation31_spill] sm:$0xff] }
 0x5e1   :  { %v1670_v31 = vsel %vm1667_vm11, %v1669_v62, %v1665_v57  ;;  %v1693_v4 = vmul.f32 %v3558_v5, %v1651_v40  ;;  %2242 = vmatpush.msra.mxu2 %v5242_v23  ;;  %2204 = vmatpush.msra.mxu0 %v5252_v29  ;;  %v6657_v62 = vld [vmem:[#allocation26_spill] sm:$0xff]  ;;  %v6658_v42 = vld [vmem:[#allocation29_spill] sm:$0xff]  ;;  %v6660_v57 = vld [vmem:[#allocation52_spill] sm:$0xff] }
 0x5e2   :  { %v1692_v19 = vmul.f32 %v1670_v31, %v5131_v1  ;;  %v1680_v53 = vmul.f32 %v5381_v13, %v1679_v50  ;;  %v1688_v1 = vand.u32 2147483648, %v5352_v44  ;;  %v1686_v31 = vand.u32 2147483647, %v5352_v44  ;;  %2224 = vmatpush.msra.mxu1 %v5254_v17  ;;  %2264 = vmatpush.msrb.mxu3 %v5263_v30  ;;  %v6659_v5 = vld [vmem:[#allocation22_spill] sm:$0xff]  ;;  %v6661_v50 = vld [vmem:[#allocation47_spill] sm:$0xff] }
 0x5e3   :  { %2243 = vmatpush.msra.mxu2 %v5276_v12  ;;  %2205 = vmatpush.msra.mxu0 %v5259_v16 }
 0x5e4   :  { %v1694_v61 = vadd.f32 %v1693_v4, %v1692_v19  ;;  %v1681_v40 = vadd.f32 %v5381_v13, %v1680_v53  ;;  %v1689_v21 = vor.u32 1.1754944e-38, %v1688_v1  ;;  %vm1687_vm15 = vcmp.eq.f32.partialorder %v1686_v31, 8.507059e+37  ;;  %2225 = vmatpush.msra.mxu1 %v5261_v47  ;;  %2265 = vmatpush.msrb.mxu3 %v5269_v35  ;;  %v6663_v53 = vld [vmem:[#allocation46_spill] sm:$0xff]  ;;  %v6666_v1 = vld [vmem:[#allocation49_spill] sm:$0xff]  ;;  %v6667_v31 = vld [vmem:[#allocation32_spill] sm:$0xff] }
 0x5e5   :  { %2244 = vmatpush.msra.mxu2 %v5282_v9  ;;  %2206 = vmatpush.msra.mxu0 %v5272_v59  ;;  %v6662_v19 = vmov 0.0  }
 0x5e6   :  { %3559 = vtanh.f32 %v1694_v61  ;;  %v1685_v4 = vsel %vm1684_vm14, %v5381_v13, %v1681_v40  ;;  %2226 = vmatpush.msra.mxu1 %v5274_v2  ;;  %2266 = vmatpush.msrb.mxu3 %v5280_v27  ;;  %v6654_v13 = vld [vmem:[#allocation25_spill] sm:$0xff]  ;;  %v6664_v61 = vld [vmem:[#allocation71_spill] sm:$0xff] }
 0x5e7   :  { %v1690_v55 = vsel %vm1687_vm15, %v1689_v21, %v1685_v4  ;;  %2245 = vmatpush.msra.mxu2 %v5294_v10  ;;  %2207 = vmatpush.msra.mxu0 %v5286_v28  ;;  %v6665_v40 = vld [vmem:[#allocation33_spill] sm:$0xff]  ;;  %v6668_v4 = vld [vmem:[#allocation50_spill] sm:$0xff]  ;;  %v6669_v21 = vld [vmem:[#allocation43_spill] sm:$0xff] }
 0x5e8   :  { %2227 = vmatpush.msra.mxu1 %v6653_v0  ;;  %2267 = vmatpush.msrb.mxu3 %v6654_v13 }
 0x5e9   :  { %2246 = vmatpush.msra.mxu2 %v5306_v63  ;;  %2208 = vmatpush.msra.mxu0 %v6656_v26 }
 0x5ea   :  { %2228 = vmatpush.msra.mxu1 %v6657_v62  ;;  %2268 = vmatpush.msrb.mxu3 %v6658_v42 }
 0x5eb   :  { %2247 = vmatpush.msra.mxu2 %v6655_v60  ;;  %2209 = vmatpush.msra.mxu0 %v6659_v5 }
 0x5ec   :  { %v3560_v44 = vpop.eup %3559  ;;  %2229 = vmatpush.msra.mxu1 %v6660_v57  ;;  %2269 = vmatpush.msrb.mxu3 %v6661_v50 }
 0x5ed   :  { %v1696_v25 = vmul.f32 %v3560_v44, %v1690_v55  ;;  %2248 = vmatpush.msra.mxu2 %v5334_v22  ;;  %2210 = vmatpush.msra.mxu0 %v5326_v37  ;;  %v6670_v44 = vld [vmem:[#allocation35_spill] sm:$0xff] }
 0x5ee   :  { %2230 = vmatpush.msra.mxu1 %v6663_v53  ;;  %2270 = vmatpush.msrb.mxu3 %v6664_v61  ;;  %v6671_v55 = vld [vmem:[#allocation51_spill] sm:$0xff] }
 0x5ef   :  { %1881 = vmatmul.f32.gmra.mxu0 %v1696_v25  ;;  %1922 = vmatmul.f32.gmra.mxu1 %v1696_v25 }
 0x5f0   :  { %1963 = vmatmul.f32.gmra.mxu2 %v1696_v25  ;;  %2004 = vmatmul.f32.gmra.mxu3 %v1696_v25  ;;  %v6672_v25 = vld [vmem:[#allocation23_spill] sm:$0xff] }
 0x5f1   :  { %2249 = vmatpush.msra.mxu2 %v5346_v34  ;;  %2211 = vmatpush.msra.mxu0 %v6665_v40 }
 0x5f2   :  { %2231 = vmatpush.msra.mxu1 %v6666_v1  ;;  %2271 = vmatpush.msrb.mxu3 %v6667_v31 }
 0x5f3   :  { %2250 = vmatpush.msra.mxu2 %v5358_v43 }
 0x5f5   :  { %2251 = vmatpush.msra.mxu2 %v5365_v39 }
 0x5f7   :  { %2060 = vmatmul.f32.vlgmr.msrb.gmra.mxu0 %v6662_v19  ;;  %2080 = vmatmul.f32.vlgmr.msrb.gmra.mxu1 %v6662_v19 }
 0x5f8   :  { %2100 = vmatmul.f32.vlgmr.msrb.gmra.mxu2 %v6662_v19  ;;  %2120 = vmatmul.f32.vlgmr.msra.gmra.mxu3 %v6662_v19  ;;  %v6673_v19 = vld [vmem:[#allocation67_spill] sm:$0xff] }
 0x5f9   :  { %2348 = vmatpush.msrb.mxu0 %v6668_v4  ;;  %2368 = vmatpush.msrb.mxu1 %v5148_v48 }
 0x5fa   :  { %2388 = vmatpush.msrb.mxu2 %v5182_v46  ;;  %2408 = vmatpush.msra.mxu3 %v5156_v41 }
 0x5fb   :  { %2349 = vmatpush.msrb.mxu0 %v5150_v32  ;;  %2369 = vmatpush.msrb.mxu1 %v6669_v21 }
 0x5fc   :  { %2389 = vmatpush.msrb.mxu2 %v5185_v33  ;;  %2409 = vmatpush.msra.mxu3 %v6670_v44 }
 0x5fd   :  { %2350 = vmatpush.msrb.mxu0 %v5159_v52  ;;  %2370 = vmatpush.msrb.mxu1 %v6671_v55 }
 0x5fe   :  { %2390 = vmatpush.msrb.mxu2 %v5190_v24  ;;  %2410 = vmatpush.msra.mxu3 %v6672_v25 }
 0x5ff   :  { %2351 = vmatpush.msrb.mxu0 %v6673_v19  ;;  %2371 = vmatpush.msrb.mxu1 %v5194_v7 }
 0x600   :  { %2391 = vmatpush.msrb.mxu2 %v5206_v11  ;;  %2411 = vmatpush.msra.mxu3 %v5204_v8 }
 0x601   :  { %2352 = vmatpush.msrb.mxu0 %v5197_v15  ;;  %2372 = vmatpush.msrb.mxu1 %v5202_v38 }
 0x602   :  { %2392 = vmatpush.msrb.mxu2 %v5214_v51  ;;  %2412 = vmatpush.msra.mxu3 %v5212_v49 }
 0x603   :  { %2353 = vmatpush.msrb.mxu0 %v5222_v54  ;;  %2373 = vmatpush.msrb.mxu1 %v5224_v56 }
 0x604   :  { %2393 = vmatpush.msrb.mxu2 %v5230_v3  ;;  %2413 = vmatpush.msra.mxu3 %v5226_v58 }
 0x605   :  { %2354 = vmatpush.msrb.mxu0 %v5232_v18  ;;  %2374 = vmatpush.msrb.mxu1 %v5234_v36 }
 0x606   :  { %2394 = vmatpush.msrb.mxu2 %v5242_v23  ;;  %2414 = vmatpush.msra.mxu3 %v5237_v45 }
 0x607   :  { %2355 = vmatpush.msrb.mxu0 %v5244_v6  ;;  %2375 = vmatpush.msrb.mxu1 %v5246_v20 }
 0x608   :  { %2395 = vmatpush.msrb.mxu2 %v5276_v12  ;;  %2415 = vmatpush.msra.mxu3 %v5256_v14 }
 0x609   :  { %2356 = vmatpush.msrb.mxu0 %v5252_v29  ;;  %2376 = vmatpush.msrb.mxu1 %v5254_v17 }
 0x60a   :  { %2396 = vmatpush.msrb.mxu2 %v5282_v9  ;;  %2416 = vmatpush.msra.mxu3 %v5263_v30 }
 0x60b   :  { %2357 = vmatpush.msrb.mxu0 %v5259_v16  ;;  %2377 = vmatpush.msrb.mxu1 %v5261_v47 }
 0x60c   :  { %2397 = vmatpush.msrb.mxu2 %v5294_v10  ;;  %2417 = vmatpush.msra.mxu3 %v5269_v35 }
 0x60d   :  { %2358 = vmatpush.msrb.mxu0 %v5272_v59  ;;  %2378 = vmatpush.msrb.mxu1 %v5274_v2 }
 0x60e   :  { %2398 = vmatpush.msrb.mxu2 %v5306_v63  ;;  %2418 = vmatpush.msra.mxu3 %v5280_v27 }
 0x60f   :  { %2359 = vmatpush.msrb.mxu0 %v5286_v28  ;;  %2379 = vmatpush.msrb.mxu1 %v6653_v0 }
 0x610   :  { %2399 = vmatpush.msrb.mxu2 %v6655_v60  ;;  %2419 = vmatpush.msra.mxu3 %v6654_v13 }
 0x611   :  { %2360 = vmatpush.msrb.mxu0 %v6656_v26  ;;  %2380 = vmatpush.msrb.mxu1 %v6657_v62 }
 0x612   :  { %2400 = vmatpush.msrb.mxu2 %v5334_v22  ;;  %2420 = vmatpush.msra.mxu3 %v6658_v42 }
 0x613   :  { %2361 = vmatpush.msrb.mxu0 %v6659_v5  ;;  %2381 = vmatpush.msrb.mxu1 %v6660_v57  ;;  %v1861_v57 = vpop.f32.mrf.mxu0  ;;  %v1984_v5 = vpop.f32.mrf.mxu3 }
 0x614   :  { %2401 = vmatpush.msrb.mxu2 %v5346_v34  ;;  %2421 = vmatpush.msra.mxu3 %v6661_v50  ;;  %v1902_v34 = vpop.f32.mrf.mxu1 }
 0x615   :  { %2362 = vmatpush.msrb.mxu0 %v5326_v37  ;;  %2382 = vmatpush.msrb.mxu1 %v6663_v53  ;;  %v1943_v53 = vpop.f32.mrf.mxu2 }
 0x616   :  { %2402 = vmatpush.msrb.mxu2 %v5358_v43  ;;  %2422 = vmatpush.msra.mxu3 %v6664_v61 }
 0x617   :  { %2363 = vmatpush.msrb.mxu0 %v6665_v40  ;;  %2383 = vmatpush.msrb.mxu1 %v6666_v1 }
 0x618   :  { %2403 = vmatpush.msrb.mxu2 %v5365_v39  ;;  %2423 = vmatpush.msra.mxu3 %v6667_v31 }
 0x61b   :  { %v5521_v50 = vpop.f32.mrf.mxu0  ;;  %v5525_v42 = vpop.f32.mrf.mxu3 }
 0x61c   :  { %6674 = vst [vmem:[#allocation74_spill] sm:$0xff] %v5521_v50  ;;  %v5523_v37 = vpop.f32.mrf.mxu1 }
 0x61d   :  { %6675 = vst [vmem:[#allocation54_spill] sm:$0xff] %v5523_v37  ;;  %v5531_v40 = vpop.f32.mrf.mxu2 }
 0x61e   :  { %6676 = vst [vmem:[#allocation24_spill] sm:$0xff] %v5525_v42 }
 0x61f   :  { %6679 = vst [vmem:[#allocation60_spill] sm:$0xff] %v5531_v40 }
 0x623   :  { %v5527_v43 = vpop.f32.mrf.mxu0  ;;  %v5533_v1 = vpop.f32.mrf.mxu3 }
 0x624   :  { %6677 = vst [vmem:[#allocation62_spill] sm:$0xff] %v5527_v43  ;;  %v5529_v61 = vpop.f32.mrf.mxu1 }
 0x625   :  { %6678 = vst [vmem:[#allocation56_spill] sm:$0xff] %v5529_v61  ;;  %v5539_v22 = vpop.f32.mrf.mxu2 }
 0x626   :  { %6680 = vst [vmem:[#allocation48_spill] sm:$0xff] %v5533_v1 }
 0x627   :  { %6683 = vst [vmem:[#allocation39_spill] sm:$0xff] %v5539_v22 }
 0x62b   :  { %v5535_v39 = vpop.f32.mrf.mxu0  ;;  %v5541_v50 = vpop.f32.mrf.mxu3 }
 0x62c   :  { %6681 = vst [vmem:[#allocation65_spill] sm:$0xff] %v5535_v39  ;;  %v5537_v31 = vpop.f32.mrf.mxu1 }
 0x62d   :  { %6682 = vst [vmem:[#allocation59_spill] sm:$0xff] %v5537_v31  ;;  %v5547_v42 = vpop.f32.mrf.mxu2 }
 0x62e   :  { %6684 = vst [vmem:[#allocation58_spill] sm:$0xff] %v5541_v50 }
 0x62f   :  { %6687 = vst [vmem:[#allocation66_spill] sm:$0xff] %v5547_v42 }
 0x633   :  { %v5543_v37 = vpop.f32.mrf.mxu0  ;;  %v5549_v43 = vpop.f32.mrf.mxu3 }
 0x634   :  { %6685 = vst [vmem:[#allocation53_spill] sm:$0xff] %v5543_v37  ;;  %v5545_v62 = vpop.f32.mrf.mxu1 }
 0x635   :  { %6686 = vst [vmem:[#allocation63_spill] sm:$0xff] %v5545_v62  ;;  %v5555_v1 = vpop.f32.mrf.mxu2 }
 0x636   :  { %6688 = vst [vmem:[#allocation27_spill] sm:$0xff] %v5549_v43  ;;  %v1826_v43 = vld [vmem:[%s6191_s6] sm:$0xf] }
 0x637   :  { %6691 = vst [vmem:[#allocation42_spill] sm:$0xff] %v5555_v1  ;;  %v5576_v1 = vperm.slane %v1826_v43, 1  ;;  %v5584_v60 = vperm.slane %v1826_v43, 3 }
 0x639   :  { %6700 = vst [vmem:[#allocation67_spill] sm:$0xff] %v5576_v1  ;;  %v1985_v0 = vadd.f32 %v1984_v5, %v5584_v60 }
 0x63a   :  { %6703 = vst [vmem:[#allocation77_spill] sm:$0xff] %v5584_v60 }
 0x63b   :  { %v5551_v61 = vpop.f32.mrf.mxu0  ;;  %v5557_v39 = vpop.f32.mrf.mxu3 }
 0x63c   :  { %6689 = vst [vmem:[#allocation34_spill] sm:$0xff] %v5551_v61  ;;  %v5553_v40 = vpop.f32.mrf.mxu1 }
 0x63d   :  { %6690 = vst [vmem:[#allocation40_spill] sm:$0xff] %v5553_v40  ;;  %v5563_v50 = vpop.f32.mrf.mxu2  ;;  %v5574_v40 = vperm.slane %v1826_v43, 0 }
 0x63e   :  { %6692 = vst [vmem:[#allocation61_spill] sm:$0xff] %v5557_v39 }
 0x63f   :  { %6695 = vst [vmem:[#allocation50_spill] sm:$0xff] %v5563_v50 }
 0x640   :  { %6699 = vst [vmem:[#allocation23_spill] sm:$0xff] %v5574_v40 }
 0x643   :  { %v5559_v31 = vpop.f32.mrf.mxu0  ;;  %v5565_v37 = vpop.f32.mrf.mxu3 }
 0x644   :  { %6693 = vst [vmem:[#allocation57_spill] sm:$0xff] %v5559_v31  ;;  %v5561_v22 = vpop.f32.mrf.mxu1  ;;  %v1862_v31 = vadd.f32 %v1861_v57, %v5574_v40 }
 0x645   :  { %6694 = vst [vmem:[#allocation64_spill] sm:$0xff] %v5561_v22  ;;  %v1903_v22 = vadd.f32 %v1902_v34, %v5576_v1  ;;  %v5580_v39 = vpop.f32.mrf.mxu2 }
 0x646   :  { %6696 = vst [vmem:[#allocation43_spill] sm:$0xff] %v5565_v37 }
 0x647   :  { %6701 = vst [vmem:[#allocation75_spill] sm:$0xff] %v5580_v39 }
 0x66c   :  { %v5570_v62 = vpop.f32.mrf.mxu0  ;;  %v5572_v61 = vpop.f32.mrf.mxu1 }
 0x66d   :  { %6697 = vst [vmem:[#allocation35_spill] sm:$0xff] %v5570_v62 }
 0x66e   :  { %6698 = vst [vmem:[#allocation51_spill] sm:$0xff] %v5572_v61 }
 0x673   :  { %v5582_v50 = vpop.f32.mrf.mxu3  ;;  %v5587_v28 = vpop.f32.mrf.mxu2 }
 0x674   :  { %6702 = vst [vmem:[#allocation76_spill] sm:$0xff] %v5582_v50  ;;  %v2061_v37 = vpop.f32.mrf.mxu0  ;;  %v2081_v42 = vpop.f32.mrf.mxu1 }
 0x675   :  { %v2124_v26 = vadd.f32 %v2061_v37, %v1862_v31  ;;  %v2125_v13 = vadd.f32 %v2081_v42, %v1903_v22  ;;  %6704 = vst [vmem:[#allocation78_spill] sm:$0xff] %v5587_v28  ;;  %v5589_v37 = vperm.slane %v1826_v43, 2 }
 0x677   :  { %v3379_v62 = vmul.f32 -1.442695, %v2124_v26  ;;  %v3380_v61 = vmul.f32 -1.442695, %v2125_v13  ;;  %6705 = vst [vmem:[#allocation79_spill] sm:$0xff] %v5589_v37  ;;  %v1944_v26 = vadd.f32 %v1943_v53, %v5589_v37 }
 0x679   :  { %3561 = vpow2.f32 %v3379_v62 }
 0x67a   :  { %3563 = vpow2.f32 %v3380_v61 }
 0x67b   :  { %v2121_v57 = vpop.f32.mrf.mxu3  ;;  %v2101_v22 = vpop.f32.mrf.mxu2 }
 0x67c   :  { %v2127_v34 = vadd.f32 %v2121_v57, %v1985_v0  ;;  %v2126_v5 = vadd.f32 %v2101_v22, %v1944_v26 }
 0x67e   :  { %v3381_v1 = vmul.f32 -1.442695, %v2127_v34 }
 0x67f   :  { %v3562_v39 = vpop.eup %3561 }
 0x680   :  { %v3564_v40 = vpop.eup %3563  ;;  %v2135_v50 = vadd.f32 1.0, %v3562_v39  ;;  %3565 = vpow2.f32 %v3381_v1 }
 0x681   :  { %v2154_v27 = vadd.f32 1.0, %v3564_v40 }
 0x682   :  { %3567 = vrcp.f32 %v2135_v50  ;;  %v2147_v39 = vand.u32 2147483648, %v2135_v50  ;;  %v2145_v1 = vand.u32 2147483647, %v2135_v50  ;;  %vm2141_vm2 = vweird.f32 %v2135_v50 }
 0x683   :  { %3569 = vrcp.f32 %v2154_v27  ;;  %v2166_v40 = vand.u32 2147483648, %v2154_v27  ;;  %v2164_v60 = vand.u32 2147483647, %v2154_v27  ;;  %vm2160_vm3 = vweird.f32 %v2154_v27 }
 0x684   :  { %v2148_v22 = vor.u32 1.1754944e-38, %v2147_v39  ;;  %vm2146_vm5 = vcmp.eq.f32.partialorder %v2145_v1, 8.507059e+37 }
 0x685   :  { %v2167_v37 = vor.u32 1.1754944e-38, %v2166_v40  ;;  %vm2165_vm7 = vcmp.eq.f32.partialorder %v2164_v60, 8.507059e+37 }
 0x686   :  { %v3566_v13 = vpop.eup %3565 }
 0x687   :  { %v2174_v62 = vadd.f32 1.0, %v3566_v13 }
 0x688   :  { %v3568_v42 = vpop.eup %3567 }
 0x689   :  { %v3570_v61 = vpop.eup %3569  ;;  %v2137_v31 = vmul.f32 %v3568_v42, %v2135_v50  ;;  %3571 = vrcp.f32 %v2174_v62  ;;  %vm2142_vm0 = vweird.f32 %v3568_v42  ;;  %vm2180_vm9 = vweird.f32 %v2174_v62 }
 0x68a   :  { %v2156_v0 = vmul.f32 %v3570_v61, %v2154_v27  ;;  %3573 = vtanh.f32 %v2126_v5  ;;  %vm2161_vm1 = vweird.f32 %v3570_v61  ;;  %vm2143_vm4 = vmor %vm2141_vm2, %vm2142_vm0  ;;  %v2184_v50 = vand.u32 2147483647, %v2174_v62 }
 0x68b   :  { %v2138_v57 = vsub.f32 1.0, %v2137_v31  ;;  %vm2162_vm6 = vmor %vm2160_vm3, %vm2161_vm1 }
 0x68c   :  { %v2157_v34 = vsub.f32 1.0, %v2156_v0  ;;  %vm2185_vm11 = vcmp.eq.f32.partialorder %v2184_v50, 8.507059e+37 }
 0x68d   :  { %v2139_v43 = vmul.f32 %v3568_v42, %v2138_v57 }
 0x68e   :  { %v2158_v28 = vmul.f32 %v3570_v61, %v2157_v34 }
 0x68f   :  { %v3572_v63 = vpop.eup %3571  ;;  %v2140_v53 = vadd.f32 %v3568_v42, %v2139_v43 }
 0x690   :  { %v2159_v13 = vadd.f32 %v3570_v61, %v2158_v28  ;;  %v2176_v26 = vmul.f32 %v3572_v63, %v2174_v62  ;;  %v3574_v5 = vpop.eup %3573  ;;  %vm2181_vm8 = vweird.f32 %v3572_v63  ;;  %v2186_v28 = vand.u32 2147483648, %v2174_v62 }
 0x691   :  { %v2144_v31 = vsel %vm2143_vm4, %v3568_v42, %v2140_v53  ;;  %vm2182_vm10 = vmor %vm2180_vm9, %vm2181_vm8 }
 0x692   :  { %v2149_v0 = vsel %vm2146_vm5, %v2148_v22, %v2144_v31  ;;  %v2163_v57 = vsel %vm2162_vm6, %v3570_v61, %v2159_v13  ;;  %v2177_v2 = vsub.f32 1.0, %v2176_v26  ;;  %v2187_v39 = vor.u32 1.1754944e-38, %v2186_v28  ;;  %v6739_v31 = vld [vmem:[#allocation79_spill] sm:$0xff] }
 0x693   :  { %v2168_v34 = vsel %vm2165_vm7, %v2167_v37, %v2163_v57  ;;  %v2191_v59 = vmul.f32 %v3574_v5, %v2149_v0  ;;  %v6740_v5 = vld [vmem:[#allocation60_spill] sm:$0xff] }
 0x694   :  { %v2190_v35 = vmul.f32 0.0, %v2168_v34  ;;  %v2178_v10 = vmul.f32 %v3572_v63, %v2177_v2  ;;  %v1947_v0 = vadd.f32 %v6740_v5, %v6739_v31  ;;  %v5737_v5 = vld [vmem:[#allocation13 + $0x170] sm:$0xff] }
 0x696   :  { %v5592_v43 = vadd.f32 %v2191_v59, %v2190_v35  ;;  %v2179_v27 = vadd.f32 %v3572_v63, %v2178_v10  ;;  %v6736_v35 = vld [vmem:[#allocation54_spill] sm:$0xff] }
 0x698   :  { %3575 = vtanh.f32 %v5592_v43  ;;  %v2183_v42 = vsel %vm2182_vm10, %v3572_v63, %v2179_v27 }
 0x699   :  { %v2188_v60 = vsel %vm2185_vm11, %v2187_v39, %v2183_v42 }
 0x69e   :  { %v3576_v61 = vpop.eup %3575 }
 0x69f   :  { %v5595_v40 = vmul.f32 %v3576_v61, %v2188_v60 }
 0x6a1   :  { %6706 = vst [vmem:[#allocation80_spill] sm:$0xff] %v5595_v40  ;;  %2212 = vmatmul.f32.vlgmr.msra.gmra.mxu0 %v5595_v40  ;;  %2232 = vmatmul.f32.vlgmr.msra.gmra.mxu1 %v5595_v40 }
 0x6a2   :  { %2252 = vmatmul.f32.vlgmr.msra.gmra.mxu2 %v5595_v40  ;;  %2272 = vmatmul.f32.vlgmr.msrb.gmra.mxu3 %v5595_v40  ;;  %v5854_v40 = vld [vmem:[#allocation13 + $0x28] sm:$0xff] }
 0x6a3   :  { %2500 = vmatpush.msra.mxu0 %v6668_v4  ;;  %2520 = vmatpush.msra.mxu1 %v5148_v48  ;;  %v6707_v48 = vld [vmem:[#allocation69_spill] sm:$0xff] }
 0x6a4   :  { %2540 = vmatpush.msra.mxu2 %v5182_v46  ;;  %2560 = vmatpush.msrb.mxu3 %v5156_v41  ;;  %v6709_v41 = vld [vmem:[#allocation30_spill] sm:$0xff]  ;;  %v6711_v46 = vld [vmem:[#allocation28_spill] sm:$0xff] }
 0x6a5   :  { %2501 = vmatpush.msra.mxu0 %v5150_v32  ;;  %2521 = vmatpush.msra.mxu1 %v6669_v21  ;;  %v6708_v32 = vld [vmem:[#allocation36_spill] sm:$0xff]  ;;  %v6737_v21 = vld [vmem:[#allocation77_spill] sm:$0xff] }
 0x6a6   :  { %2541 = vmatpush.msra.mxu2 %v5185_v33  ;;  %2561 = vmatpush.msrb.mxu3 %v6670_v44  ;;  %v6712_v33 = vld [vmem:[#allocation68_spill] sm:$0xff] }
 0x6a7   :  { %2502 = vmatpush.msra.mxu0 %v5159_v52  ;;  %2522 = vmatpush.msra.mxu1 %v6671_v55  ;;  %v6710_v52 = vld [vmem:[#allocation44_spill] sm:$0xff] }
 0x6a8   :  { %2542 = vmatpush.msra.mxu2 %v5190_v24  ;;  %2562 = vmatpush.msrb.mxu3 %v6672_v25  ;;  %v6713_v24 = vld [vmem:[#allocation37_spill] sm:$0xff]  ;;  %v6738_v44 = vld [vmem:[#allocation24_spill] sm:$0xff] }
 0x6a9   :  { %2503 = vmatpush.msra.mxu0 %v6673_v19  ;;  %2523 = vmatpush.msra.mxu1 %v5194_v7  ;;  %v6714_v7 = vld [vmem:[#allocation38_spill] sm:$0xff]  ;;  %v1988_v55 = vadd.f32 %v6738_v44, %v6737_v21  ;;  %v5704_v44 = vld [vmem:[#allocation13 + $0x1d8] sm:$0xff] }
 0x6aa   :  { %2543 = vmatpush.msra.mxu2 %v5206_v11  ;;  %2563 = vmatpush.msrb.mxu3 %v5204_v8  ;;  %v6717_v8 = vld [vmem:[#allocation31_spill] sm:$0xff]  ;;  %v6718_v11 = vld [vmem:[#allocation26_spill] sm:$0xff] }
 0x6ab   :  { %2504 = vmatpush.msra.mxu0 %v5197_v15  ;;  %2524 = vmatpush.msra.mxu1 %v5202_v38  ;;  %v6715_v15 = vld [vmem:[#allocation45_spill] sm:$0xff] }
 0x6ac   :  { %2544 = vmatpush.msra.mxu2 %v5214_v51  ;;  %2564 = vmatpush.msrb.mxu3 %v5212_v49  ;;  %v6716_v38 = vld [vmem:[#allocation25_spill] sm:$0xff] }
 0x6ad   :  { %2505 = vmatpush.msra.mxu0 %v5222_v54  ;;  %2525 = vmatpush.msra.mxu1 %v5224_v56  ;;  %v6719_v49 = vld [vmem:[#allocation41_spill] sm:$0xff]  ;;  %v6721_v54 = vld [vmem:[#allocation22_spill] sm:$0xff]  ;;  %v6722_v56 = vld [vmem:[#allocation52_spill] sm:$0xff] }
 0x6ae   :  { %2545 = vmatpush.msra.mxu2 %v5230_v3  ;;  %2565 = vmatpush.msrb.mxu3 %v5226_v58  ;;  %v6720_v51 = vld [vmem:[#allocation29_spill] sm:$0xff]  ;;  %v6723_v58 = vld [vmem:[#allocation70_spill] sm:$0xff]  ;;  %v6724_v3 = vld [vmem:[#allocation47_spill] sm:$0xff] }
 0x6af   :  { %2506 = vmatpush.msra.mxu0 %v5232_v18  ;;  %2526 = vmatpush.msra.mxu1 %v5234_v36  ;;  %v6725_v18 = vld [vmem:[#allocation55_spill] sm:$0xff]  ;;  %v6726_v36 = vld [vmem:[#allocation46_spill] sm:$0xff] }
 0x6b0   :  { %2546 = vmatpush.msra.mxu2 %v5242_v23  ;;  %2566 = vmatpush.msrb.mxu3 %v5237_v45  ;;  %v6727_v45 = vld [vmem:[#allocation72_spill] sm:$0xff]  ;;  %v6728_v23 = vld [vmem:[#allocation71_spill] sm:$0xff] }
 0x6b1   :  { %2507 = vmatpush.msra.mxu0 %v5244_v6  ;;  %2527 = vmatpush.msra.mxu1 %v5246_v20  ;;  %v6729_v6 = vld [vmem:[#allocation33_spill] sm:$0xff]  ;;  %6761 = vst [vmem:[#allocation72_spill] sm:$0xff] %v5854_v40 }
 0x6b2   :  { %2547 = vmatpush.msra.mxu2 %v5276_v12  ;;  %2567 = vmatpush.msrb.mxu3 %v5256_v14  ;;  %v6730_v20 = vld [vmem:[#allocation49_spill] sm:$0xff]  ;;  %v6733_v14 = vld [vmem:[#allocation23_spill] sm:$0xff] }
 0x6b3   :  { %2508 = vmatpush.msra.mxu0 %v5252_v29  ;;  %2528 = vmatpush.msra.mxu1 %v5254_v17  ;;  %v6731_v29 = vld [vmem:[#allocation73_spill] sm:$0xff]  ;;  %v6732_v17 = vld [vmem:[#allocation32_spill] sm:$0xff] }
 0x6b4   :  { %2548 = vmatpush.msra.mxu2 %v5282_v9  ;;  %2568 = vmatpush.msrb.mxu3 %v5263_v30  ;;  %v6735_v30 = vld [vmem:[#allocation67_spill] sm:$0xff] }
 0x6b5   :  { %2509 = vmatpush.msra.mxu0 %v5259_v16  ;;  %2529 = vmatpush.msra.mxu1 %v5261_v47  ;;  %v6734_v16 = vld [vmem:[#allocation74_spill] sm:$0xff]  ;;  %v1906_v59 = vadd.f32 %v6736_v35, %v6735_v30 }
 0x6b6   :  { %2549 = vmatpush.msra.mxu2 %v6707_v48  ;;  %2569 = vmatpush.msrb.mxu3 %v6708_v32  ;;  %v1865_v47 = vadd.f32 %v6734_v16, %v6733_v14 }
 0x6b7   :  { %2510 = vmatpush.msra.mxu0 %v6709_v41  ;;  %2530 = vmatpush.msra.mxu1 %v6710_v52 }
 0x6b8   :  { %2550 = vmatpush.msra.mxu2 %v6711_v46  ;;  %2570 = vmatpush.msrb.mxu3 %v6712_v33 }
 0x6b9   :  { %2511 = vmatpush.msra.mxu0 %v6713_v24  ;;  %2531 = vmatpush.msra.mxu1 %v6714_v7 }
 0x6ba   :  { %2551 = vmatpush.msra.mxu2 %v6715_v15  ;;  %2571 = vmatpush.msrb.mxu3 %v6716_v38 }
 0x6bb   :  { %2512 = vmatpush.msra.mxu0 %v6717_v8  ;;  %2532 = vmatpush.msra.mxu1 %v6718_v11 }
 0x6bc   :  { %2552 = vmatpush.msra.mxu2 %v6719_v49  ;;  %2572 = vmatpush.msrb.mxu3 %v6720_v51 }
 0x6bd   :  { %2513 = vmatpush.msra.mxu0 %v6721_v54  ;;  %2533 = vmatpush.msra.mxu1 %v6722_v56 }
 0x6be   :  { %2553 = vmatpush.msra.mxu2 %v6723_v58  ;;  %2573 = vmatpush.msrb.mxu3 %v6724_v3 }
 0x6bf   :  { %2514 = vmatpush.msra.mxu0 %v6725_v18  ;;  %2534 = vmatpush.msra.mxu1 %v6726_v36 }
 0x6c0   :  { %2554 = vmatpush.msra.mxu2 %v6727_v45  ;;  %2574 = vmatpush.msrb.mxu3 %v6728_v23 }
 0x6c1   :  { %2515 = vmatpush.msra.mxu0 %v6729_v6  ;;  %2535 = vmatpush.msra.mxu1 %v6730_v20 }
 0x6c2   :  { %2555 = vmatpush.msra.mxu2 %v6731_v29  ;;  %2575 = vmatpush.msrb.mxu3 %v6732_v17 }
 0x71e   :  { %v2213_v2 = vpop.f32.mrf.mxu0  ;;  %v2233_v12 = vpop.f32.mrf.mxu1 }
 0x71f   :  { %v2276_v9 = vadd.f32 %v2213_v2, %v1865_v47  ;;  %v2277_v10 = vadd.f32 %v2233_v12, %v1906_v59  ;;  %v5686_v2 = vld [vmem:[#allocation13 + $0x1e8] sm:$0xff]  ;;  %v5689_v12 = vld [vmem:[#allocation13 + $0x1f0] sm:$0xff] }
 0x721   :  { %v3382_v63 = vmul.f32 -1.442695, %v2276_v9  ;;  %v3383_v4 = vmul.f32 -1.442695, %v2277_v10  ;;  %v5692_v9 = vld [vmem:[#allocation13 + $0x1f8] sm:$0xff]  ;;  %v5695_v10 = vld [vmem:[#allocation13 + $0x1c0] sm:$0xff] }
 0x723   :  { %3577 = vpow2.f32 %v3382_v63  ;;  %v5698_v63 = vld [vmem:[#allocation13 + $0x1c8] sm:$0xff] }
 0x724   :  { %3579 = vpow2.f32 %v3383_v4  ;;  %v5701_v4 = vld [vmem:[#allocation13 + $0x1d0] sm:$0xff] }
 0x725   :  { %v2273_v25 = vpop.f32.mrf.mxu3  ;;  %v2253_v13 = vpop.f32.mrf.mxu2 }
 0x726   :  { %v2279_v19 = vadd.f32 %v2273_v25, %v1988_v55  ;;  %v2278_v27 = vadd.f32 %v2253_v13, %v1947_v0  ;;  %v5707_v55 = vld [vmem:[#allocation13 + $0x1a0] sm:$0xff]  ;;  %v5710_v25 = vld [vmem:[#allocation13 + $0x1a8] sm:$0xff]  ;;  %v5740_v0 = vld [vmem:[#allocation13 + $0x178] sm:$0xff] }
 0x727   :  { %v5731_v13 = vld [vmem:[#allocation13 + $0x160] sm:$0xff] }
 0x728   :  { %v3384_v37 = vmul.f32 -1.442695, %v2279_v19  ;;  %v5713_v19 = vld [vmem:[#allocation13 + $0x1b0] sm:$0xff] }
 0x729   :  { %v3578_v62 = vpop.eup %3577 }
 0x72a   :  { %v3580_v1 = vpop.eup %3579  ;;  %v2287_v53 = vadd.f32 1.0, %v3578_v62  ;;  %3581 = vpow2.f32 %v3384_v37  ;;  %v5716_v37 = vld [vmem:[#allocation13 + $0x1b8] sm:$0xff]  ;;  %v5719_v62 = vld [vmem:[#allocation13 + $0x180] sm:$0xff] }
 0x72b   :  { %v2306_v22 = vadd.f32 1.0, %v3580_v1  ;;  %v5722_v1 = vld [vmem:[#allocation13 + $0x188] sm:$0xff] }
 0x72c   :  { %3583 = vrcp.f32 %v2287_v53  ;;  %v2299_v60 = vand.u32 2147483648, %v2287_v53  ;;  %v2297_v41 = vand.u32 2147483647, %v2287_v53  ;;  %vm2293_vm14 = vweird.f32 %v2287_v53 }
 0x72d   :  { %3585 = vrcp.f32 %v2306_v22  ;;  %v2318_v48 = vand.u32 2147483648, %v2306_v22  ;;  %v2316_v46 = vand.u32 2147483647, %v2306_v22  ;;  %vm2312_vm15 = vweird.f32 %v2306_v22 }
 0x72e   :  { %v2300_v7 = vor.u32 1.1754944e-38, %v2299_v60  ;;  %vm2298_vm2 = vcmp.eq.f32.partialorder %v2297_v41, 8.507059e+37  ;;  %v5767_v60 = vld [vmem:[#allocation13 + $0x100] sm:$0xff]  ;;  %v5776_v41 = vld [vmem:[#allocation13 + $0x118] sm:$0xff] }
 0x72f   :  { %v2319_v8 = vor.u32 1.1754944e-38, %v2318_v48  ;;  %vm2317_vm3 = vcmp.eq.f32.partialorder %v2316_v46, 8.507059e+37  ;;  %v5770_v48 = vld [vmem:[#allocation13 + $0x108] sm:$0xff] }
 0x730   :  { %v3582_v26 = vpop.eup %3581  ;;  %v5782_v46 = vld [vmem:[#allocation13 + $0xe8] sm:$0xff] }
 0x731   :  { %v2326_v57 = vadd.f32 1.0, %v3582_v26  ;;  %v5734_v26 = vld [vmem:[#allocation13 + $0x168] sm:$0xff] }
 0x732   :  { %v3584_v34 = vpop.eup %3583 }
 0x733   :  { %v3586_v28 = vpop.eup %3585  ;;  %v2289_v50 = vmul.f32 %v3584_v34, %v2287_v53  ;;  %3587 = vrcp.f32 %v2326_v57  ;;  %vm2294_vm12 = vweird.f32 %v3584_v34  ;;  %v2338_v6 = vand.u32 2147483648, %v2326_v57  ;;  %v5725_v53 = vld [vmem:[#allocation13 + $0x190] sm:$0xff] }
 0x734   :  { %v2308_v42 = vmul.f32 %v3586_v28, %v2306_v22  ;;  %3589 = vtanh.f32 %v2278_v27  ;;  %vm2313_vm13 = vweird.f32 %v3586_v28  ;;  %vm2295_vm0 = vmor %vm2293_vm14, %vm2294_vm12  ;;  %vm2332_vm5 = vweird.f32 %v2326_v57  ;;  %v5728_v22 = vld [vmem:[#allocation13 + $0x198] sm:$0xff]  ;;  %v5749_v27 = vld [vmem:[#allocation13 + $0x150] sm:$0xff] }
 0x735   :  { %v2290_v39 = vsub.f32 1.0, %v2289_v50  ;;  %vm2314_vm1 = vmor %vm2312_vm15, %vm2313_vm13  ;;  %v2336_v20 = vand.u32 2147483647, %v2326_v57  ;;  %v2339_v16 = vor.u32 1.1754944e-38, %v2338_v6  ;;  %v5755_v50 = vld [vmem:[#allocation13 + $0x120] sm:$0xff]  ;;  %v5833_v6 = vld [vmem:[#allocation13 + $0x70] sm:$0xff] }
 0x736   :  { %v2309_v61 = vsub.f32 1.0, %v2308_v42  ;;  %v5758_v42 = vld [vmem:[#allocation13 + $0x128] sm:$0xff]  ;;  %6754 = vst [vmem:[#allocation29_spill] sm:$0xff] %v5833_v6 }
 0x737   :  { %v2291_v32 = vmul.f32 %v3584_v34, %v2290_v39  ;;  %vm2337_vm7 = vcmp.eq.f32.partialorder %v2336_v20, 8.507059e+37  ;;  %v5761_v39 = vld [vmem:[#allocation13 + $0x130] sm:$0xff]  ;;  %v5836_v20 = vld [vmem:[#allocation13 + $0x78] sm:$0xff] }
 0x738   :  { %v2310_v52 = vmul.f32 %v3586_v28, %v2309_v61  ;;  %v5764_v61 = vld [vmem:[#allocation13 + $0x138] sm:$0xff]  ;;  %6755 = vst [vmem:[#allocation22_spill] sm:$0xff] %v5836_v20 }
 0x739   :  { %v3588_v33 = vpop.eup %3587  ;;  %v2292_v24 = vadd.f32 %v3584_v34, %v2291_v32  ;;  %v5773_v32 = vld [vmem:[#allocation13 + $0x110] sm:$0xff] }
 0x73a   :  { %v2311_v15 = vadd.f32 %v3586_v28, %v2310_v52  ;;  %v2328_v38 = vmul.f32 %v3588_v33, %v2326_v57  ;;  %v3590_v49 = vpop.eup %3589  ;;  %vm2333_vm4 = vweird.f32 %v3588_v33  ;;  %v5743_v57 = vld [vmem:[#allocation13 + $0x140] sm:$0xff] }
 0x73b   :  { %v2296_v11 = vsel %vm2295_vm0, %v3584_v34, %v2292_v24  ;;  %vm2334_vm6 = vmor %vm2332_vm5, %vm2333_vm4  ;;  %v5746_v34 = vld [vmem:[#allocation13 + $0x148] sm:$0xff]  ;;  %v5779_v52 = vld [vmem:[#allocation13 + $0xe0] sm:$0xff] }
 0x73c   :  { %v2301_v51 = vsel %vm2298_vm2, %v2300_v7, %v2296_v11  ;;  %v2315_v54 = vsel %vm2314_vm1, %v3586_v28, %v2311_v15  ;;  %v2329_v56 = vsub.f32 1.0, %v2328_v38  ;;  %v5752_v28 = vld [vmem:[#allocation13 + $0x158] sm:$0xff]  ;;  %v5791_v7 = vld [vmem:[#allocation13 + $0xc0] sm:$0xff]  ;;  %v5794_v15 = vld [vmem:[#allocation13 + $0xc8] sm:$0xff] }
 0x73d   :  { %v2320_v58 = vsel %vm2317_vm3, %v2319_v8, %v2315_v54  ;;  %v2343_v3 = vmul.f32 %v3590_v49, %v2301_v51  ;;  %v5788_v24 = vld [vmem:[#allocation13 + $0xf8] sm:$0xff]  ;;  %v5797_v38 = vld [vmem:[#allocation13 + $0xd0] sm:$0xff]  ;;  %v5803_v11 = vld [vmem:[#allocation13 + $0xa0] sm:$0xff] }
 0x73e   :  { %v2342_v18 = vmul.f32 %v2320_v58, %v5592_v43  ;;  %v2330_v36 = vmul.f32 %v3588_v33, %v2329_v56  ;;  %v5683_v43 = vld [vmem:[#allocation13 + $0x1e0] sm:$0xff]  ;;  %6742 = vst [vmem:[#allocation36_spill] sm:$0xff] %v5797_v38  ;;  %v5800_v8 = vld [vmem:[#allocation13 + $0xd8] sm:$0xff]  ;;  %v5806_v49 = vld [vmem:[#allocation13 + $0xa8] sm:$0xff] }
 0x73f   :  { %6743 = vst [vmem:[#allocation30_spill] sm:$0xff] %v5800_v8  ;;  %v5809_v51 = vld [vmem:[#allocation13 + $0xb0] sm:$0xff]  ;;  %v5812_v54 = vld [vmem:[#allocation13 + $0xb8] sm:$0xff]  ;;  %v5815_v56 = vld [vmem:[#allocation13 + $0x80] sm:$0xff] }
 0x740   :  { %v5674_v45 = vadd.f32 %v2343_v3, %v2342_v18  ;;  %v2331_v23 = vadd.f32 %v3588_v33, %v2330_v36  ;;  %6744 = vst [vmem:[#allocation44_spill] sm:$0xff] %v5803_v11  ;;  %v5818_v58 = vld [vmem:[#allocation13 + $0x88] sm:$0xff]  ;;  %v5821_v3 = vld [vmem:[#allocation13 + $0x90] sm:$0xff]  ;;  %v5824_v18 = vld [vmem:[#allocation13 + $0x98] sm:$0xff] }
 0x741   :  { %6745 = vst [vmem:[#allocation28_spill] sm:$0xff] %v5806_v49  ;;  %v5827_v36 = vld [vmem:[#allocation13 + $0x60] sm:$0xff] }
 0x742   :  { %3591 = vtanh.f32 %v5674_v45  ;;  %v2335_v17 = vsel %vm2334_vm6, %v3588_v33, %v2331_v23  ;;  %v5785_v33 = vld [vmem:[#allocation13 + $0xf0] sm:$0xff]  ;;  %6746 = vst [vmem:[#allocation68_spill] sm:$0xff] %v5809_v51  ;;  %v5830_v23 = vld [vmem:[#allocation13 + $0x68] sm:$0xff] }
 0x743   :  { %v2340_v35 = vsel %vm2337_vm7, %v2339_v16, %v2335_v17  ;;  %6747 = vst [vmem:[#allocation37_spill] sm:$0xff] %v5812_v54  ;;  %v5839_v17 = vld [vmem:[#allocation13 + $0x40] sm:$0xff]  ;;  %v5842_v16 = vld [vmem:[#allocation13 + $0x48] sm:$0xff] }
 0x744   :  { %6748 = vst [vmem:[#allocation38_spill] sm:$0xff] %v5815_v56 }
 0x745   :  { %6749 = vst [vmem:[#allocation45_spill] sm:$0xff] %v5818_v58 }
 0x746   :  { %6750 = vst [vmem:[#allocation25_spill] sm:$0xff] %v5821_v3 }
 0x747   :  { %6751 = vst [vmem:[#allocation31_spill] sm:$0xff] %v5824_v18 }
 0x748   :  { %v3592_v47 = vpop.eup %3591  ;;  %6752 = vst [vmem:[#allocation26_spill] sm:$0xff] %v5827_v36 }
 0x749   :  { %v5677_v59 = vmul.f32 %v3592_v47, %v2340_v35  ;;  %6753 = vst [vmem:[#allocation41_spill] sm:$0xff] %v5830_v23  ;;  %v5845_v47 = vld [vmem:[#allocation13 + $0x50] sm:$0xff]  ;;  %v5848_v35 = vld [vmem:[#allocation13 + $0x58] sm:$0xff] }
 0x74a   :  { %6756 = vst [vmem:[#allocation52_spill] sm:$0xff] %v5839_v17 }
 0x74b   :  { %6741 = vst [vmem:[#allocation69_spill] sm:$0xff] %v5677_v59  ;;  %2364 = vmatmul.f32.vlgmr.msrb.gmra.mxu0 %v5677_v59  ;;  %2384 = vmatmul.f32.vlgmr.msrb.gmra.mxu1 %v5677_v59 }
 0x74c   :  { %2404 = vmatmul.f32.vlgmr.msrb.gmra.mxu2 %v5677_v59  ;;  %2424 = vmatmul.f32.vlgmr.msra.gmra.mxu3 %v5677_v59  ;;  %6757 = vst [vmem:[#allocation70_spill] sm:$0xff] %v5842_v16  ;;  %v5851_v59 = vld [vmem:[#allocation13 + $0x20] sm:$0xff] }
 0x74d   :  { %2652 = vmatpush.msrb.mxu0 %v5683_v43  ;;  %2672 = vmatpush.msrb.mxu1 %v5686_v2  ;;  %6758 = vst [vmem:[#allocation47_spill] sm:$0xff] %v5845_v47 }
 0x74e   :  { %2692 = vmatpush.msrb.mxu2 %v5689_v12  ;;  %2712 = vmatpush.msra.mxu3 %v5692_v9  ;;  %6759 = vst [vmem:[#allocation55_spill] sm:$0xff] %v5848_v35 }
 0x74f   :  { %2653 = vmatpush.msrb.mxu0 %v5695_v10  ;;  %2673 = vmatpush.msrb.mxu1 %v5698_v63  ;;  %6760 = vst [vmem:[#allocation46_spill] sm:$0xff] %v5851_v59 }
 0x750   :  { %2693 = vmatpush.msrb.mxu2 %v5701_v4  ;;  %2713 = vmatpush.msra.mxu3 %v5704_v44 }
 0x751   :  { %2654 = vmatpush.msrb.mxu0 %v5707_v55  ;;  %2674 = vmatpush.msrb.mxu1 %v5710_v25 }
 0x752   :  { %2694 = vmatpush.msrb.mxu2 %v5713_v19  ;;  %2714 = vmatpush.msra.mxu3 %v5716_v37 }
 0x753   :  { %2655 = vmatpush.msrb.mxu0 %v5719_v62  ;;  %2675 = vmatpush.msrb.mxu1 %v5722_v1 }
 0x754   :  { %2695 = vmatpush.msrb.mxu2 %v5725_v53  ;;  %2715 = vmatpush.msra.mxu3 %v5728_v22 }
 0x755   :  { %2656 = vmatpush.msrb.mxu0 %v5731_v13  ;;  %2676 = vmatpush.msrb.mxu1 %v5734_v26 }
 0x756   :  { %2696 = vmatpush.msrb.mxu2 %v5737_v5  ;;  %2716 = vmatpush.msra.mxu3 %v5740_v0 }
 0x757   :  { %2657 = vmatpush.msrb.mxu0 %v5743_v57  ;;  %2677 = vmatpush.msrb.mxu1 %v5746_v34 }
 0x758   :  { %2697 = vmatpush.msrb.mxu2 %v5749_v27  ;;  %2717 = vmatpush.msra.mxu3 %v5752_v28 }
 0x759   :  { %2658 = vmatpush.msrb.mxu0 %v5755_v50  ;;  %2678 = vmatpush.msrb.mxu1 %v5758_v42 }
 0x75a   :  { %2698 = vmatpush.msrb.mxu2 %v5761_v39  ;;  %2718 = vmatpush.msra.mxu3 %v5764_v61 }
 0x75b   :  { %2659 = vmatpush.msrb.mxu0 %v5767_v60  ;;  %2679 = vmatpush.msrb.mxu1 %v5770_v48 }
 0x75c   :  { %2699 = vmatpush.msrb.mxu2 %v5773_v32  ;;  %2719 = vmatpush.msra.mxu3 %v5776_v41 }
 0x75d   :  { %2660 = vmatpush.msrb.mxu0 %v5779_v52  ;;  %2680 = vmatpush.msrb.mxu1 %v5782_v46 }
 0x75e   :  { %2700 = vmatpush.msrb.mxu2 %v5785_v33  ;;  %2720 = vmatpush.msra.mxu3 %v5788_v24 }
 0x75f   :  { %2661 = vmatpush.msrb.mxu0 %v5791_v7  ;;  %2681 = vmatpush.msrb.mxu1 %v5794_v15 }
 0x760   :  { %2701 = vmatpush.msrb.mxu2 %v5797_v38  ;;  %2721 = vmatpush.msra.mxu3 %v5800_v8 }
 0x761   :  { %2662 = vmatpush.msrb.mxu0 %v5803_v11  ;;  %2682 = vmatpush.msrb.mxu1 %v5806_v49 }
 0x762   :  { %2702 = vmatpush.msrb.mxu2 %v5809_v51  ;;  %2722 = vmatpush.msra.mxu3 %v5812_v54 }
 0x763   :  { %2663 = vmatpush.msrb.mxu0 %v5815_v56  ;;  %2683 = vmatpush.msrb.mxu1 %v5818_v58 }
 0x764   :  { %2703 = vmatpush.msrb.mxu2 %v5821_v3  ;;  %2723 = vmatpush.msra.mxu3 %v5824_v18 }
 0x765   :  { %2664 = vmatpush.msrb.mxu0 %v5827_v36  ;;  %2684 = vmatpush.msrb.mxu1 %v5830_v23 }
 0x766   :  { %2704 = vmatpush.msrb.mxu2 %v5833_v6  ;;  %2724 = vmatpush.msra.mxu3 %v5836_v20  ;;  %v6768_v20 = vld [vmem:[#allocation56_spill] sm:$0xff] }
 0x767   :  { %2665 = vmatpush.msrb.mxu0 %v5839_v17  ;;  %2685 = vmatpush.msrb.mxu1 %v5842_v16  ;;  %v5857_v17 = vld [vmem:[#allocation13 + $0x30] sm:$0xff]  ;;  %v5860_v16 = vld [vmem:[#allocation13 + $0x38] sm:$0xff] }
 0x768   :  { %2705 = vmatpush.msrb.mxu2 %v5845_v47  ;;  %2725 = vmatpush.msra.mxu3 %v5848_v35  ;;  %6762 = vst [vmem:[#allocation71_spill] sm:$0xff] %v5857_v17  ;;  %v5863_v47 = vld [vmem:[#allocation13] sm:$0xff]  ;;  %v5866_v35 = vld [vmem:[#allocation13 + $0x8] sm:$0xff] }
 0x769   :  { %2666 = vmatpush.msrb.mxu0 %v5851_v59  ;;  %2686 = vmatpush.msrb.mxu1 %v5854_v40  ;;  %6763 = vst [vmem:[#allocation33_spill] sm:$0xff] %v5860_v16  ;;  %v5870_v59 = vld [vmem:[#allocation13 + $0x18] sm:$0xff] }
 0x76a   :  { %2706 = vmatpush.msrb.mxu2 %v5857_v17  ;;  %2726 = vmatpush.msra.mxu3 %v5860_v16  ;;  %6764 = vst [vmem:[#allocation49_spill] sm:$0xff] %v5863_v47  ;;  %v6767_v17 = vld [vmem:[#allocation62_spill] sm:$0xff]  ;;  %v1909_v16 = vadd.f32 %v6768_v20, %v6735_v30 }
 0x76b   :  { %2667 = vmatpush.msrb.mxu0 %v5863_v47  ;;  %6765 = vst [vmem:[#allocation73_spill] sm:$0xff] %v5866_v35  ;;  %2687 = vmatpush.msrb.mxu1 %v5866_v35  ;;  %v1868_v40 = vadd.f32 %v6767_v17, %v6733_v14  ;;  %v6769_v35 = vld [vmem:[#allocation48_spill] sm:$0xff] }
 0x76c   :  { %2707 = vmatpush.msrb.mxu2 %v6731_v29  ;;  %6766 = vst [vmem:[#allocation32_spill] sm:$0xff] %v5870_v59  ;;  %2727 = vmatpush.msra.mxu3 %v5870_v59  ;;  %v1991_v29 = vadd.f32 %v6769_v35, %v6737_v21 }
 0x7c8   :  { %v2365_v6 = vpop.f32.mrf.mxu0  ;;  %v2385_v23 = vpop.f32.mrf.mxu1 }
 0x7c9   :  { %v2428_v36 = vadd.f32 %v2365_v6, %v1868_v40  ;;  %v2429_v47 = vadd.f32 %v2385_v23, %v1909_v16 }
 0x7cb   :  { %v3385_v18 = vmul.f32 -1.442695, %v2428_v36  ;;  %v3386_v3 = vmul.f32 -1.442695, %v2429_v47  ;;  %v6770_v36 = vld [vmem:[#allocation39_spill] sm:$0xff] }
 0x7cc   :  { %v1950_v23 = vadd.f32 %v6770_v36, %v6739_v31 }
 0x7cd   :  { %3593 = vpow2.f32 %v3385_v18 }
 0x7ce   :  { %3595 = vpow2.f32 %v3386_v3 }
 0x7cf   :  { %v2425_v58 = vpop.f32.mrf.mxu3  ;;  %v2405_v20 = vpop.f32.mrf.mxu2 }
 0x7d0   :  { %v2431_v56 = vadd.f32 %v2425_v58, %v1991_v29  ;;  %v2430_v16 = vadd.f32 %v2405_v20, %v1950_v23 }
 0x7d2   :  { %v3387_v59 = vmul.f32 -1.442695, %v2431_v56 }
 0x7d3   :  { %v3594_v54 = vpop.eup %3593 }
 0x7d4   :  { %v3596_v51 = vpop.eup %3595  ;;  %v2439_v17 = vadd.f32 1.0, %v3594_v54  ;;  %3597 = vpow2.f32 %v3387_v59 }
 0x7d5   :  { %v2458_v14 = vadd.f32 1.0, %v3596_v51 }
 0x7d6   :  { %3599 = vrcp.f32 %v2439_v17  ;;  %v2451_v29 = vand.u32 2147483648, %v2439_v17  ;;  %v2449_v54 = vand.u32 2147483647, %v2439_v17  ;;  %vm2445_vm10 = vweird.f32 %v2439_v17 }
 0x7d7   :  { %3601 = vrcp.f32 %v2458_v14  ;;  %v2470_v59 = vand.u32 2147483648, %v2458_v14  ;;  %v2468_v30 = vand.u32 2147483647, %v2458_v14  ;;  %vm2464_vm11 = vweird.f32 %v2458_v14 }
 0x7d8   :  { %v2452_v20 = vor.u32 1.1754944e-38, %v2451_v29  ;;  %vm2450_vm14 = vcmp.eq.f32.partialorder %v2449_v54, 8.507059e+37 }
 0x7d9   :  { %vm2469_vm15 = vcmp.eq.f32.partialorder %v2468_v30, 8.507059e+37 }
 0x7da   :  { %v3598_v40 = vpop.eup %3597 }
 0x7db   :  { %v2478_v18 = vadd.f32 1.0, %v3598_v40 }
 0x7dc   :  { %v3600_v6 = vpop.eup %3599 }
 0x7dd   :  { %v3602_v47 = vpop.eup %3601  ;;  %v2441_v3 = vmul.f32 %v3600_v6, %v2439_v17  ;;  %3603 = vrcp.f32 %v2478_v18  ;;  %vm2446_vm8 = vweird.f32 %v3600_v6  ;;  %vm2484_vm1 = vweird.f32 %v2478_v18 }
 0x7de   :  { %v2460_v58 = vmul.f32 %v3602_v47, %v2458_v14  ;;  %3605 = vtanh.f32 %v2430_v16  ;;  %vm2465_vm9 = vweird.f32 %v3602_v47  ;;  %vm2447_vm12 = vmor %vm2445_vm10, %vm2446_vm8 }
 0x7df   :  { %v2442_v56 = vsub.f32 1.0, %v2441_v3  ;;  %vm2466_vm13 = vmor %vm2464_vm11, %vm2465_vm9  ;;  %v2471_v3 = vor.u32 1.1754944e-38, %v2470_v59 }
 0x7e0   :  { %v2461_v35 = vsub.f32 1.0, %v2460_v58 }
 0x7e1   :  { %v2443_v51 = vmul.f32 %v3600_v6, %v2442_v56 }
 0x7e2   :  { %v2462_v21 = vmul.f32 %v3602_v47, %v2461_v35 }
 0x7e3   :  { %v3604_v49 = vpop.eup %3603  ;;  %v2444_v36 = vadd.f32 %v3600_v6, %v2443_v51 }
 0x7e4   :  { %v2463_v40 = vadd.f32 %v3602_v47, %v2462_v21  ;;  %v2480_v23 = vmul.f32 %v3604_v49, %v2478_v18  ;;  %v3606_v16 = vpop.eup %3605  ;;  %vm2485_vm0 = vweird.f32 %v3604_v49  ;;  %v2490_v21 = vand.u32 2147483648, %v2478_v18 }
 0x7e5   :  { %v2448_v58 = vsel %vm2447_vm12, %v3600_v6, %v2444_v36  ;;  %v2488_v6 = vand.u32 2147483647, %v2478_v18  ;;  %vm2486_vm2 = vmor %vm2484_vm1, %vm2485_vm0  ;;  %v6778_v18 = vld [vmem:[#allocation38_spill] sm:$0xff]  ;;  %v6779_v36 = vld [vmem:[#allocation45_spill] sm:$0xff] }
 0x7e6   :  { %v2453_v31 = vsel %vm2450_vm14, %v2452_v20, %v2448_v58  ;;  %v2467_v56 = vsel %vm2466_vm13, %v3602_v47, %v2463_v40  ;;  %v2481_v11 = vsub.f32 1.0, %v2480_v23  ;;  %v2491_v59 = vor.u32 1.1754944e-38, %v2490_v21  ;;  %v6780_v20 = vld [vmem:[#allocation25_spill] sm:$0xff]  ;;  %v6781_v40 = vld [vmem:[#allocation31_spill] sm:$0xff]  ;;  %v6782_v23 = vld [vmem:[#allocation26_spill] sm:$0xff] }
 0x7e7   :  { %v2472_v35 = vsel %vm2469_vm15, %v2471_v3, %v2467_v56  ;;  %v2495_v8 = vmul.f32 %v3606_v16, %v2453_v31  ;;  %vm2489_vm3 = vcmp.eq.f32.partialorder %v2488_v6, 8.507059e+37  ;;  %v6772_v31 = vld [vmem:[#allocation36_spill] sm:$0xff]  ;;  %v6783_v3 = vld [vmem:[#allocation41_spill] sm:$0xff]  ;;  %v6785_v16 = vld [vmem:[#allocation22_spill] sm:$0xff] }
 0x7e8   :  { %v2494_v38 = vmul.f32 %v2472_v35, %v5674_v45  ;;  %v2482_v51 = vmul.f32 %v3604_v49, %v2481_v11  ;;  %v6773_v45 = vld [vmem:[#allocation30_spill] sm:$0xff]  ;;  %v6776_v11 = vld [vmem:[#allocation68_spill] sm:$0xff]  ;;  %v6784_v58 = vld [vmem:[#allocation29_spill] sm:$0xff] }
 0x7e9   :  { %v6786_v56 = vld [vmem:[#allocation52_spill] sm:$0xff]  ;;  %v6787_v35 = vld [vmem:[#allocation70_spill] sm:$0xff] }
 0x7ea   :  { %v5882_v17 = vadd.f32 %v2495_v8, %v2494_v38  ;;  %v2483_v14 = vadd.f32 %v3604_v49, %v2482_v51  ;;  %v6774_v38 = vld [vmem:[#allocation44_spill] sm:$0xff]  ;;  %v6788_v51 = vld [vmem:[#allocation47_spill] sm:$0xff]  ;;  %v6790_v21 = vld [vmem:[#allocation46_spill] sm:$0xff] }
 0x7eb   :  { %v6775_v8 = vld [vmem:[#allocation28_spill] sm:$0xff] }
 0x7ec   :  { %3607 = vtanh.f32 %v5882_v17  ;;  %v2487_v29 = vsel %vm2486_vm2, %v3604_v49, %v2483_v14  ;;  %v6777_v49 = vld [vmem:[#allocation37_spill] sm:$0xff]  ;;  %v6789_v14 = vld [vmem:[#allocation55_spill] sm:$0xff]  ;;  %v6791_v6 = vld [vmem:[#allocation72_spill] sm:$0xff] }
 0x7ed   :  { %v2492_v47 = vsel %vm2489_vm3, %v2491_v59, %v2487_v29  ;;  %v6792_v29 = vld [vmem:[#allocation71_spill] sm:$0xff]  ;;  %v6793_v59 = vld [vmem:[#allocation33_spill] sm:$0xff] }
 0x7f2   :  { %v3608_v30 = vpop.eup %3607 }
 0x7f3   :  { %v5885_v54 = vmul.f32 %v3608_v30, %v2492_v47  ;;  %v6794_v30 = vld [vmem:[#allocation49_spill] sm:$0xff] }
 0x7f4   :  { %v6795_v47 = vld [vmem:[#allocation73_spill] sm:$0xff] }
 0x7f5   :  { %6771 = vst [vmem:[#allocation74_spill] sm:$0xff] %v5885_v54  ;;  %2516 = vmatmul.f32.vlgmr.msra.gmra.mxu0 %v5885_v54  ;;  %2536 = vmatmul.f32.vlgmr.msra.gmra.mxu1 %v5885_v54 }
 0x7f6   :  { %2556 = vmatmul.f32.vlgmr.msra.gmra.mxu2 %v5885_v54  ;;  %2576 = vmatmul.f32.vlgmr.msrb.gmra.mxu3 %v5885_v54  ;;  %v5953_v54 = vld [vmem:[#allocation13 + $0x10] sm:$0xff] }
 0x7f7   :  { %2804 = vmatpush.msra.mxu0 %v5683_v43  ;;  %2824 = vmatpush.msra.mxu1 %v5686_v2  ;;  %6796 = vst [vmem:[#allocation54_spill] sm:$0xff] %v5953_v54 }
 0x7f8   :  { %2844 = vmatpush.msra.mxu2 %v5689_v12  ;;  %2864 = vmatpush.msrb.mxu3 %v5692_v9 }
 0x7f9   :  { %2805 = vmatpush.msra.mxu0 %v5695_v10  ;;  %2825 = vmatpush.msra.mxu1 %v5698_v63 }
 0x7fa   :  { %2845 = vmatpush.msra.mxu2 %v5701_v4  ;;  %2865 = vmatpush.msrb.mxu3 %v5704_v44 }
 0x7fb   :  { %2806 = vmatpush.msra.mxu0 %v5707_v55  ;;  %2826 = vmatpush.msra.mxu1 %v5710_v25 }
 0x7fc   :  { %2846 = vmatpush.msra.mxu2 %v5713_v19  ;;  %2866 = vmatpush.msrb.mxu3 %v5716_v37 }
 0x7fd   :  { %2807 = vmatpush.msra.mxu0 %v5719_v62  ;;  %2827 = vmatpush.msra.mxu1 %v5722_v1 }
 0x7fe   :  { %2847 = vmatpush.msra.mxu2 %v5725_v53  ;;  %2867 = vmatpush.msrb.mxu3 %v5728_v22 }
 0x7ff   :  { %2808 = vmatpush.msra.mxu0 %v5731_v13  ;;  %2828 = vmatpush.msra.mxu1 %v5734_v26 }
 0x800   :  { %2848 = vmatpush.msra.mxu2 %v5737_v5  ;;  %2868 = vmatpush.msrb.mxu3 %v5740_v0 }
 0x801   :  { %2809 = vmatpush.msra.mxu0 %v5743_v57  ;;  %2829 = vmatpush.msra.mxu1 %v5746_v34 }
 0x802   :  { %2849 = vmatpush.msra.mxu2 %v5749_v27  ;;  %2869 = vmatpush.msrb.mxu3 %v5752_v28 }
 0x803   :  { %2810 = vmatpush.msra.mxu0 %v5755_v50  ;;  %2830 = vmatpush.msra.mxu1 %v5758_v42 }
 0x804   :  { %2850 = vmatpush.msra.mxu2 %v5761_v39  ;;  %2870 = vmatpush.msrb.mxu3 %v5764_v61 }
 0x805   :  { %2811 = vmatpush.msra.mxu0 %v5767_v60  ;;  %2831 = vmatpush.msra.mxu1 %v5770_v48 }
 0x806   :  { %2851 = vmatpush.msra.mxu2 %v5773_v32  ;;  %2871 = vmatpush.msrb.mxu3 %v5776_v41 }
 0x807   :  { %2812 = vmatpush.msra.mxu0 %v5779_v52  ;;  %2832 = vmatpush.msra.mxu1 %v5782_v46 }
 0x808   :  { %2852 = vmatpush.msra.mxu2 %v5785_v33  ;;  %2872 = vmatpush.msrb.mxu3 %v5788_v24 }
 0x809   :  { %2813 = vmatpush.msra.mxu0 %v5791_v7  ;;  %2833 = vmatpush.msra.mxu1 %v5794_v15 }
 0x80a   :  { %2853 = vmatpush.msra.mxu2 %v6772_v31  ;;  %2873 = vmatpush.msrb.mxu3 %v6773_v45 }
 0x80b   :  { %2814 = vmatpush.msra.mxu0 %v6774_v38  ;;  %2834 = vmatpush.msra.mxu1 %v6775_v8 }
 0x80c   :  { %2854 = vmatpush.msra.mxu2 %v6776_v11  ;;  %2874 = vmatpush.msrb.mxu3 %v6777_v49 }
 0x80d   :  { %2815 = vmatpush.msra.mxu0 %v6778_v18  ;;  %2835 = vmatpush.msra.mxu1 %v6779_v36 }
 0x80e   :  { %2855 = vmatpush.msra.mxu2 %v6780_v20  ;;  %2875 = vmatpush.msrb.mxu3 %v6781_v40  ;;  %v6803_v40 = vld [vmem:[#allocation58_spill] sm:$0xff] }
 0x80f   :  { %2816 = vmatpush.msra.mxu0 %v6782_v23  ;;  %2836 = vmatpush.msra.mxu1 %v6783_v3 }
 0x810   :  { %2856 = vmatpush.msra.mxu2 %v6784_v58  ;;  %2876 = vmatpush.msrb.mxu3 %v6785_v16  ;;  %v6801_v16 = vld [vmem:[#allocation59_spill] sm:$0xff] }
 0x811   :  { %2817 = vmatpush.msra.mxu0 %v6786_v56  ;;  %2837 = vmatpush.msra.mxu1 %v6787_v35  ;;  %v6797_v35 = vld [vmem:[#allocation32_spill] sm:$0xff] }
 0x812   :  { %2857 = vmatpush.msra.mxu2 %v6788_v51  ;;  %2877 = vmatpush.msrb.mxu3 %v6789_v14  ;;  %v6798_v51 = vld [vmem:[#allocation23_spill] sm:$0xff]  ;;  %v6799_v14 = vld [vmem:[#allocation65_spill] sm:$0xff] }
 0x813   :  { %2818 = vmatpush.msra.mxu0 %v6790_v21  ;;  %2838 = vmatpush.msra.mxu1 %v6791_v6  ;;  %v1871_v56 = vadd.f32 %v6799_v14, %v6798_v51  ;;  %v6800_v21 = vld [vmem:[#allocation67_spill] sm:$0xff] }
 0x814   :  { %2858 = vmatpush.msra.mxu2 %v6792_v29  ;;  %2878 = vmatpush.msrb.mxu3 %v6793_v59  ;;  %v1912_v6 = vadd.f32 %v6801_v16, %v6800_v21 }
 0x815   :  { %2819 = vmatpush.msra.mxu0 %v6794_v30  ;;  %2839 = vmatpush.msra.mxu1 %v6795_v47  ;;  %v6802_v47 = vld [vmem:[#allocation77_spill] sm:$0xff] }
 0x816   :  { %2859 = vmatpush.msra.mxu2 %v5953_v54  ;;  %2879 = vmatpush.msrb.mxu3 %v6797_v35  ;;  %v1994_v20 = vadd.f32 %v6803_v40, %v6802_v47 }
 0x872   :  { %v2517_v58 = vpop.f32.mrf.mxu0  ;;  %v2537_v29 = vpop.f32.mrf.mxu1 }
 0x873   :  { %v2580_v3 = vadd.f32 %v2517_v58, %v1871_v56  ;;  %v2581_v59 = vadd.f32 %v2537_v29, %v1912_v6  ;;  %v6804_v56 = vld [vmem:[#allocation79_spill] sm:$0xff] }
 0x875   :  { %v3388_v23 = vmul.f32 -1.442695, %v2580_v3  ;;  %v3389_v30 = vmul.f32 -1.442695, %v2581_v59  ;;  %v6805_v3 = vld [vmem:[#allocation66_spill] sm:$0xff] }
 0x876   :  { %v1953_v6 = vadd.f32 %v6805_v3, %v6804_v56 }
 0x877   :  { %3609 = vpow2.f32 %v3388_v23 }
 0x878   :  { %3611 = vpow2.f32 %v3389_v30 }
 0x879   :  { %v2577_v54 = vpop.f32.mrf.mxu3  ;;  %v2557_v16 = vpop.f32.mrf.mxu2 }
 0x87a   :  { %v2583_v36 = vadd.f32 %v2577_v54, %v1994_v20  ;;  %v2582_v59 = vadd.f32 %v2557_v16, %v1953_v6 }
 0x87c   :  { %v3390_v35 = vmul.f32 -1.442695, %v2583_v36 }
 0x87d   :  { %v3610_v18 = vpop.eup %3609 }
 0x87e   :  { %v3612_v49 = vpop.eup %3611  ;;  %v2591_v14 = vadd.f32 1.0, %v3610_v18  ;;  %3613 = vpow2.f32 %v3390_v35 }
 0x87f   :  { %v2610_v51 = vadd.f32 1.0, %v3612_v49 }
 0x880   :  { %3615 = vrcp.f32 %v2591_v14  ;;  %v2603_v47 = vand.u32 2147483648, %v2591_v14  ;;  %v2601_v35 = vand.u32 2147483647, %v2591_v14  ;;  %vm2597_vm6 = vweird.f32 %v2591_v14 }
 0x881   :  { %3617 = vrcp.f32 %v2610_v51  ;;  %v2622_v18 = vand.u32 2147483648, %v2610_v51  ;;  %v2620_v11 = vand.u32 2147483647, %v2610_v51  ;;  %vm2616_vm7 = vweird.f32 %v2610_v51 }
 0x882   :  { %v2604_v16 = vor.u32 1.1754944e-38, %v2603_v47  ;;  %vm2602_vm10 = vcmp.eq.f32.partialorder %v2601_v35, 8.507059e+37 }
 0x883   :  { %vm2621_vm11 = vcmp.eq.f32.partialorder %v2620_v11, 8.507059e+37 }
 0x884   :  { %v3614_v58 = vpop.eup %3613 }
 0x885   :  { %v2630_v23 = vadd.f32 1.0, %v3614_v58 }
 0x886   :  { %v3616_v29 = vpop.eup %3615 }
 0x887   :  { %v3618_v40 = vpop.eup %3617  ;;  %v2593_v30 = vmul.f32 %v3616_v29, %v2591_v14  ;;  %3619 = vrcp.f32 %v2630_v23  ;;  %vm2598_vm4 = vweird.f32 %v3616_v29  ;;  %vm2636_vm13 = vweird.f32 %v2630_v23 }
 0x888   :  { %v2612_v54 = vmul.f32 %v3618_v40, %v2610_v51  ;;  %3621 = vtanh.f32 %v2582_v59  ;;  %vm2617_vm5 = vweird.f32 %v3618_v40  ;;  %vm2599_vm8 = vmor %vm2597_vm6, %vm2598_vm4  ;;  %v2640_v47 = vand.u32 2147483647, %v2630_v23 }
 0x889   :  { %v2594_v36 = vsub.f32 1.0, %v2593_v30  ;;  %vm2618_vm9 = vmor %vm2616_vm7, %vm2617_vm5  ;;  %v2623_v30 = vor.u32 1.1754944e-38, %v2622_v18 }
 0x88a   :  { %v2613_v20 = vsub.f32 1.0, %v2612_v54  ;;  %vm2641_vm15 = vcmp.eq.f32.partialorder %v2640_v47, 8.507059e+37  ;;  %v6826_v47 = vld [vmem:[#allocation72_spill] sm:$0xff] }
 0x88b   :  { %v2595_v49 = vmul.f32 %v3616_v29, %v2594_v36 }
 0x88c   :  { %v2614_v21 = vmul.f32 %v3618_v40, %v2613_v20 }
 0x88d   :  { %v3620_v8 = vpop.eup %3619  ;;  %v2596_v3 = vadd.f32 %v3616_v29, %v2595_v49 }
 0x88e   :  { %v2615_v58 = vadd.f32 %v3618_v40, %v2614_v21  ;;  %v2632_v6 = vmul.f32 %v3620_v8, %v2630_v23  ;;  %v3622_v59 = vpop.eup %3621  ;;  %vm2637_vm12 = vweird.f32 %v3620_v8  ;;  %v2642_v21 = vand.u32 2147483648, %v2630_v23  ;;  %v6813_v23 = vld [vmem:[#allocation38_spill] sm:$0xff] }
 0x88f   :  { %v2600_v54 = vsel %vm2599_vm8, %v3616_v29, %v2596_v3  ;;  %vm2638_vm14 = vmor %vm2636_vm13, %vm2637_vm12  ;;  %v6814_v3 = vld [vmem:[#allocation45_spill] sm:$0xff] }
 0x890   :  { %v2605_v56 = vsel %vm2602_vm10, %v2604_v16, %v2600_v54  ;;  %v2619_v36 = vsel %vm2618_vm9, %v3618_v40, %v2615_v58  ;;  %v2633_v38 = vsub.f32 1.0, %v2632_v6  ;;  %v2643_v18 = vor.u32 1.1754944e-38, %v2642_v21  ;;  %v6815_v16 = vld [vmem:[#allocation25_spill] sm:$0xff]  ;;  %v6816_v58 = vld [vmem:[#allocation31_spill] sm:$0xff]  ;;  %v6817_v6 = vld [vmem:[#allocation26_spill] sm:$0xff] }
 0x891   :  { %v2624_v20 = vsel %vm2621_vm11, %v2623_v30, %v2619_v36  ;;  %v2647_v45 = vmul.f32 %v3622_v59, %v2605_v56  ;;  %v6812_v56 = vld [vmem:[#allocation37_spill] sm:$0xff]  ;;  %v6820_v59 = vld [vmem:[#allocation22_spill] sm:$0xff]  ;;  %v6821_v36 = vld [vmem:[#allocation52_spill] sm:$0xff] }
 0x892   :  { %v2646_v31 = vmul.f32 %v2624_v20, %v5882_v17  ;;  %v2634_v49 = vmul.f32 %v3620_v8, %v2633_v38  ;;  %v6807_v17 = vld [vmem:[#allocation36_spill] sm:$0xff]  ;;  %v6818_v30 = vld [vmem:[#allocation41_spill] sm:$0xff]  ;;  %v6822_v20 = vld [vmem:[#allocation70_spill] sm:$0xff] }
 0x893   :  { %v6810_v38 = vld [vmem:[#allocation28_spill] sm:$0xff]  ;;  %v6819_v54 = vld [vmem:[#allocation29_spill] sm:$0xff]  ;;  %v6825_v21 = vld [vmem:[#allocation46_spill] sm:$0xff] }
 0x894   :  { %v5966_v14 = vadd.f32 %v2647_v45, %v2646_v31  ;;  %v2635_v51 = vadd.f32 %v3620_v8, %v2634_v49  ;;  %v6808_v31 = vld [vmem:[#allocation30_spill] sm:$0xff]  ;;  %v6809_v45 = vld [vmem:[#allocation44_spill] sm:$0xff]  ;;  %v6823_v49 = vld [vmem:[#allocation47_spill] sm:$0xff] }
 0x896   :  { %3623 = vtanh.f32 %v5966_v14  ;;  %v2639_v29 = vsel %vm2638_vm14, %v3620_v8, %v2635_v51  ;;  %v6811_v8 = vld [vmem:[#allocation68_spill] sm:$0xff]  ;;  %v6824_v51 = vld [vmem:[#allocation55_spill] sm:$0xff] }
 0x897   :  { %v2644_v40 = vsel %vm2641_vm15, %v2643_v18, %v2639_v29  ;;  %v6827_v29 = vld [vmem:[#allocation71_spill] sm:$0xff]  ;;  %v6828_v18 = vld [vmem:[#allocation33_spill] sm:$0xff] }
 0x89c   :  { %v3624_v11 = vpop.eup %3623 }
 0x89d   :  { %v5969_v35 = vmul.f32 %v3624_v11, %v2644_v40  ;;  %v6829_v11 = vld [vmem:[#allocation49_spill] sm:$0xff] }
 0x89e   :  { %v6830_v40 = vld [vmem:[#allocation73_spill] sm:$0xff] }
 0x89f   :  { %6806 = vst [vmem:[#allocation24_spill] sm:$0xff] %v5969_v35  ;;  %2668 = vmatmul.f32.vlgmr.msrb.gmra.mxu0 %v5969_v35  ;;  %2688 = vmatmul.f32.vlgmr.msrb.gmra.mxu1 %v5969_v35 }
 0x8a0   :  { %2708 = vmatmul.f32.vlgmr.msrb.gmra.mxu2 %v5969_v35  ;;  %2728 = vmatmul.f32.vlgmr.msra.gmra.mxu3 %v5969_v35  ;;  %v6831_v35 = vld [vmem:[#allocation54_spill] sm:$0xff] }
 0x8a1   :  { %2956 = vmatpush.msrb.mxu0 %v5683_v43  ;;  %2976 = vmatpush.msrb.mxu1 %v5686_v2 }
 0x8a2   :  { %2996 = vmatpush.msrb.mxu2 %v5689_v12  ;;  %3016 = vmatpush.msra.mxu3 %v5692_v9 }
 0x8a3   :  { %2957 = vmatpush.msrb.mxu0 %v5695_v10  ;;  %2977 = vmatpush.msrb.mxu1 %v5698_v63 }
 0x8a4   :  { %2997 = vmatpush.msrb.mxu2 %v5701_v4  ;;  %3017 = vmatpush.msra.mxu3 %v5704_v44 }
 0x8a5   :  { %2958 = vmatpush.msrb.mxu0 %v5707_v55  ;;  %2978 = vmatpush.msrb.mxu1 %v5710_v25 }
 0x8a6   :  { %2998 = vmatpush.msrb.mxu2 %v5713_v19  ;;  %3018 = vmatpush.msra.mxu3 %v5716_v37 }
 0x8a7   :  { %2959 = vmatpush.msrb.mxu0 %v5719_v62  ;;  %2979 = vmatpush.msrb.mxu1 %v5722_v1 }
 0x8a8   :  { %2999 = vmatpush.msrb.mxu2 %v5725_v53  ;;  %3019 = vmatpush.msra.mxu3 %v5728_v22 }
 0x8a9   :  { %2960 = vmatpush.msrb.mxu0 %v5731_v13  ;;  %2980 = vmatpush.msrb.mxu1 %v5734_v26 }
 0x8aa   :  { %3000 = vmatpush.msrb.mxu2 %v5737_v5  ;;  %3020 = vmatpush.msra.mxu3 %v5740_v0 }
 0x8ab   :  { %2961 = vmatpush.msrb.mxu0 %v5743_v57  ;;  %2981 = vmatpush.msrb.mxu1 %v5746_v34 }
 0x8ac   :  { %3001 = vmatpush.msrb.mxu2 %v5749_v27  ;;  %3021 = vmatpush.msra.mxu3 %v5752_v28 }
 0x8ad   :  { %2962 = vmatpush.msrb.mxu0 %v5755_v50  ;;  %2982 = vmatpush.msrb.mxu1 %v5758_v42 }
 0x8ae   :  { %3002 = vmatpush.msrb.mxu2 %v5761_v39  ;;  %3022 = vmatpush.msra.mxu3 %v5764_v61 }
 0x8af   :  { %2963 = vmatpush.msrb.mxu0 %v5767_v60  ;;  %2983 = vmatpush.msrb.mxu1 %v5770_v48 }
 0x8b0   :  { %3003 = vmatpush.msrb.mxu2 %v5773_v32  ;;  %3023 = vmatpush.msra.mxu3 %v5776_v41 }
 0x8b1   :  { %2964 = vmatpush.msrb.mxu0 %v5779_v52  ;;  %2984 = vmatpush.msrb.mxu1 %v5782_v46 }
 0x8b2   :  { %3004 = vmatpush.msrb.mxu2 %v5785_v33  ;;  %3024 = vmatpush.msra.mxu3 %v5788_v24 }
 0x8b3   :  { %2965 = vmatpush.msrb.mxu0 %v5791_v7  ;;  %2985 = vmatpush.msrb.mxu1 %v5794_v15 }
 0x8b4   :  { %3005 = vmatpush.msrb.mxu2 %v6807_v17  ;;  %3025 = vmatpush.msra.mxu3 %v6808_v31 }
 0x8b5   :  { %2966 = vmatpush.msrb.mxu0 %v6809_v45  ;;  %2986 = vmatpush.msrb.mxu1 %v6810_v38 }
 0x8b6   :  { %3006 = vmatpush.msrb.mxu2 %v6811_v8  ;;  %3026 = vmatpush.msra.mxu3 %v6812_v56 }
 0x8b7   :  { %2967 = vmatpush.msrb.mxu0 %v6813_v23  ;;  %2987 = vmatpush.msrb.mxu1 %v6814_v3 }
 0x8b8   :  { %3007 = vmatpush.msrb.mxu2 %v6815_v16  ;;  %3027 = vmatpush.msra.mxu3 %v6816_v58  ;;  %v6838_v16 = vld [vmem:[#allocation27_spill] sm:$0xff] }
 0x8b9   :  { %2968 = vmatpush.msrb.mxu0 %v6817_v6  ;;  %2988 = vmatpush.msrb.mxu1 %v6818_v30 }
 0x8ba   :  { %3008 = vmatpush.msrb.mxu2 %v6819_v54  ;;  %3028 = vmatpush.msra.mxu3 %v6820_v59  ;;  %v6836_v54 = vld [vmem:[#allocation63_spill] sm:$0xff] }
 0x8bb   :  { %2969 = vmatpush.msrb.mxu0 %v6821_v36  ;;  %2989 = vmatpush.msrb.mxu1 %v6822_v20  ;;  %v6832_v36 = vld [vmem:[#allocation32_spill] sm:$0xff]  ;;  %v6833_v20 = vld [vmem:[#allocation23_spill] sm:$0xff] }
 0x8bc   :  { %3009 = vmatpush.msrb.mxu2 %v6823_v49  ;;  %3029 = vmatpush.msra.mxu3 %v6824_v51  ;;  %v6834_v49 = vld [vmem:[#allocation53_spill] sm:$0xff]  ;;  %v6835_v51 = vld [vmem:[#allocation67_spill] sm:$0xff] }
 0x8bd   :  { %2970 = vmatpush.msrb.mxu0 %v6825_v21  ;;  %2990 = vmatpush.msrb.mxu1 %v6826_v47  ;;  %v1874_v59 = vadd.f32 %v6834_v49, %v6833_v20  ;;  %v1915_v21 = vadd.f32 %v6836_v54, %v6835_v51 }
 0x8be   :  { %3010 = vmatpush.msrb.mxu2 %v6827_v29  ;;  %3030 = vmatpush.msra.mxu3 %v6828_v18 }
 0x8bf   :  { %2971 = vmatpush.msrb.mxu0 %v6829_v11  ;;  %2991 = vmatpush.msrb.mxu1 %v6830_v40  ;;  %v6837_v11 = vld [vmem:[#allocation77_spill] sm:$0xff] }
 0x8c0   :  { %3011 = vmatpush.msrb.mxu2 %v6831_v35  ;;  %3031 = vmatpush.msra.mxu3 %v6832_v36  ;;  %v1997_v40 = vadd.f32 %v6838_v16, %v6837_v11 }
 0x91c   :  { %v2669_v30 = vpop.f32.mrf.mxu0  ;;  %v2689_v47 = vpop.f32.mrf.mxu1 }
 0x91d   :  { %v2732_v6 = vadd.f32 %v2669_v30, %v1874_v59  ;;  %v2733_v29 = vadd.f32 %v2689_v47, %v1915_v21  ;;  %v6839_v59 = vld [vmem:[#allocation79_spill] sm:$0xff] }
 0x91f   :  { %v3391_v58 = vmul.f32 -1.442695, %v2732_v6  ;;  %v3392_v18 = vmul.f32 -1.442695, %v2733_v29  ;;  %v6840_v6 = vld [vmem:[#allocation42_spill] sm:$0xff] }
 0x920   :  { %v1956_v21 = vadd.f32 %v6840_v6, %v6839_v59 }
 0x921   :  { %3625 = vpow2.f32 %v3391_v58 }
 0x922   :  { %3627 = vpow2.f32 %v3392_v18 }
 0x923   :  { %v2729_v35 = vpop.f32.mrf.mxu3  ;;  %v2709_v54 = vpop.f32.mrf.mxu2 }
 0x924   :  { %v2735_v3 = vadd.f32 %v2729_v35, %v1997_v40  ;;  %v2734_v29 = vadd.f32 %v2709_v54, %v1956_v21 }
 0x926   :  { %v3393_v36 = vmul.f32 -1.442695, %v2735_v3 }
 0x927   :  { %v3626_v23 = vpop.eup %3625 }
 0x928   :  { %v3628_v56 = vpop.eup %3627  ;;  %v2743_v49 = vadd.f32 1.0, %v3626_v23  ;;  %3629 = vpow2.f32 %v3393_v36 }
 0x929   :  { %v2762_v20 = vadd.f32 1.0, %v3628_v56 }
 0x92a   :  { %3631 = vrcp.f32 %v2743_v49  ;;  %v2755_v11 = vand.u32 2147483648, %v2743_v49  ;;  %v2753_v36 = vand.u32 2147483647, %v2743_v49  ;;  %vm2749_vm2 = vweird.f32 %v2743_v49 }
 0x92b   :  { %3633 = vrcp.f32 %v2762_v20  ;;  %v2774_v23 = vand.u32 2147483648, %v2762_v20  ;;  %v2772_v8 = vand.u32 2147483647, %v2762_v20  ;;  %vm2768_vm3 = vweird.f32 %v2762_v20 }
 0x92c   :  { %v2756_v54 = vor.u32 1.1754944e-38, %v2755_v11  ;;  %vm2754_vm6 = vcmp.eq.f32.partialorder %v2753_v36, 8.507059e+37 }
 0x92d   :  { %vm2773_vm7 = vcmp.eq.f32.partialorder %v2772_v8, 8.507059e+37 }
 0x92e   :  { %v3630_v30 = vpop.eup %3629 }
 0x92f   :  { %v2782_v58 = vadd.f32 1.0, %v3630_v30 }
 0x930   :  { %v3632_v47 = vpop.eup %3631 }
 0x931   :  { %v3634_v16 = vpop.eup %3633  ;;  %v2745_v18 = vmul.f32 %v3632_v47, %v2743_v49  ;;  %3635 = vrcp.f32 %v2782_v58  ;;  %vm2750_vm0 = vweird.f32 %v3632_v47  ;;  %vm2788_vm9 = vweird.f32 %v2782_v58 }
 0x932   :  { %v2764_v35 = vmul.f32 %v3634_v16, %v2762_v20  ;;  %3637 = vtanh.f32 %v2734_v29  ;;  %vm2769_vm1 = vweird.f32 %v3634_v16  ;;  %vm2751_vm4 = vmor %vm2749_vm2, %vm2750_vm0  ;;  %v2792_v11 = vand.u32 2147483647, %v2782_v58 }
 0x933   :  { %v2746_v3 = vsub.f32 1.0, %v2745_v18  ;;  %vm2770_vm5 = vmor %vm2768_vm3, %vm2769_vm1  ;;  %v2775_v18 = vor.u32 1.1754944e-38, %v2774_v23 }
 0x934   :  { %v2765_v40 = vsub.f32 1.0, %v2764_v35  ;;  %vm2793_vm11 = vcmp.eq.f32.partialorder %v2792_v11, 8.507059e+37 }
 0x935   :  { %v2747_v56 = vmul.f32 %v3632_v47, %v2746_v3 }
 0x936   :  { %v2766_v51 = vmul.f32 %v3634_v16, %v2765_v40 }
 0x937   :  { %v3636_v38 = vpop.eup %3635  ;;  %v2748_v6 = vadd.f32 %v3632_v47, %v2747_v56 }
 0x938   :  { %v2767_v30 = vadd.f32 %v3634_v16, %v2766_v51  ;;  %v2784_v21 = vmul.f32 %v3636_v38, %v2782_v58  ;;  %v3638_v29 = vpop.eup %3637  ;;  %vm2789_vm8 = vweird.f32 %v3636_v38  ;;  %v2794_v51 = vand.u32 2147483648, %v2782_v58 }
 0x939   :  { %v2752_v35 = vsel %vm2751_vm4, %v3632_v47, %v2748_v6  ;;  %vm2790_vm10 = vmor %vm2788_vm9, %vm2789_vm8 }
 0x93a   :  { %v2757_v59 = vsel %vm2754_vm6, %v2756_v54, %v2752_v35  ;;  %v2771_v3 = vsel %vm2770_vm5, %v3634_v16, %v2767_v30  ;;  %v2785_v45 = vsub.f32 1.0, %v2784_v21  ;;  %v2795_v23 = vor.u32 1.1754944e-38, %v2794_v51  ;;  %v6873_v35 = vld [vmem:[#allocation79_spill] sm:$0xff] }
 0x93b   :  { %v2776_v40 = vsel %vm2773_vm7, %v2775_v18, %v2771_v3  ;;  %v2799_v31 = vmul.f32 %v3638_v29, %v2757_v59  ;;  %v6874_v29 = vld [vmem:[#allocation50_spill] sm:$0xff] }
 0x93c   :  { %v2798_v17 = vmul.f32 %v2776_v40, %v5966_v14  ;;  %v2786_v56 = vmul.f32 %v3636_v38, %v2785_v45  ;;  %v6871_v14 = vld [vmem:[#allocation77_spill] sm:$0xff]  ;;  %v1959_v3 = vadd.f32 %v6874_v29, %v6873_v35  ;;  %v6877_v29 = vld [vmem:[#allocation43_spill] sm:$0xff] }
 0x93e   :  { %v6048_v49 = vadd.f32 %v2799_v31, %v2798_v17  ;;  %v2787_v20 = vadd.f32 %v3636_v38, %v2786_v56  ;;  %v6872_v17 = vld [vmem:[#allocation61_spill] sm:$0xff] }
 0x93f   :  { %v2000_v31 = vadd.f32 %v6872_v17, %v6871_v14 }
 0x940   :  { %3639 = vtanh.f32 %v6048_v49  ;;  %v2791_v47 = vsel %vm2790_vm10, %v3636_v38, %v2787_v20 }
 0x941   :  { %v2796_v16 = vsel %vm2793_vm11, %v2795_v23, %v2791_v47 }
 0x946   :  { %v3640_v8 = vpop.eup %3639 }
 0x947   :  { %v6051_v36 = vmul.f32 %v3640_v8, %v2796_v16 }
 0x949   :  { %2820 = vmatmul.f32.vlgmr.msra.gmra.mxu0 %v6051_v36  ;;  %2840 = vmatmul.f32.vlgmr.msra.gmra.mxu1 %v6051_v36 }
 0x94a   :  { %2860 = vmatmul.f32.vlgmr.msra.gmra.mxu2 %v6051_v36  ;;  %2880 = vmatmul.f32.vlgmr.msrb.gmra.mxu3 %v6051_v36 }
 0x94b   :  { %3108 = vmatpush.msra.mxu0 %v5683_v43  ;;  %3128 = vmatpush.msra.mxu1 %v5686_v2  ;;  %v6841_v43 = vld [vmem:[#allocation36_spill] sm:$0xff]  ;;  %v6842_v2 = vld [vmem:[#allocation30_spill] sm:$0xff] }
 0x94c   :  { %3148 = vmatpush.msra.mxu2 %v5689_v12  ;;  %3168 = vmatpush.msrb.mxu3 %v5692_v9  ;;  %v6843_v12 = vld [vmem:[#allocation44_spill] sm:$0xff] }
 0x94d   :  { %3109 = vmatpush.msra.mxu0 %v5695_v10  ;;  %3129 = vmatpush.msra.mxu1 %v5698_v63  ;;  %v6844_v9 = vld [vmem:[#allocation28_spill] sm:$0xff]  ;;  %v6846_v63 = vld [vmem:[#allocation37_spill] sm:$0xff] }
 0x94e   :  { %3149 = vmatpush.msra.mxu2 %v5701_v4  ;;  %3169 = vmatpush.msrb.mxu3 %v5704_v44  ;;  %v6845_v10 = vld [vmem:[#allocation68_spill] sm:$0xff]  ;;  %v6847_v4 = vld [vmem:[#allocation38_spill] sm:$0xff]  ;;  %v6848_v44 = vld [vmem:[#allocation45_spill] sm:$0xff] }
 0x94f   :  { %3110 = vmatpush.msra.mxu0 %v5707_v55  ;;  %3130 = vmatpush.msra.mxu1 %v5710_v25  ;;  %v6849_v55 = vld [vmem:[#allocation25_spill] sm:$0xff]  ;;  %v6850_v25 = vld [vmem:[#allocation31_spill] sm:$0xff] }
 0x950   :  { %3150 = vmatpush.msra.mxu2 %v5713_v19  ;;  %3170 = vmatpush.msrb.mxu3 %v5716_v37  ;;  %v6851_v19 = vld [vmem:[#allocation26_spill] sm:$0xff]  ;;  %v6852_v37 = vld [vmem:[#allocation41_spill] sm:$0xff] }
 0x951   :  { %3111 = vmatpush.msra.mxu0 %v5719_v62  ;;  %3131 = vmatpush.msra.mxu1 %v5722_v1  ;;  %v6853_v62 = vld [vmem:[#allocation29_spill] sm:$0xff]  ;;  %v6854_v1 = vld [vmem:[#allocation22_spill] sm:$0xff] }
 0x952   :  { %3151 = vmatpush.msra.mxu2 %v5725_v53  ;;  %3171 = vmatpush.msrb.mxu3 %v5728_v22  ;;  %v6855_v53 = vld [vmem:[#allocation52_spill] sm:$0xff]  ;;  %v6856_v22 = vld [vmem:[#allocation70_spill] sm:$0xff] }
 0x953   :  { %3112 = vmatpush.msra.mxu0 %v5731_v13  ;;  %3132 = vmatpush.msra.mxu1 %v5734_v26  ;;  %v6857_v13 = vld [vmem:[#allocation47_spill] sm:$0xff] }
 0x954   :  { %3152 = vmatpush.msra.mxu2 %v5737_v5  ;;  %3172 = vmatpush.msrb.mxu3 %v5740_v0  ;;  %v6858_v26 = vld [vmem:[#allocation55_spill] sm:$0xff]  ;;  %v6859_v5 = vld [vmem:[#allocation46_spill] sm:$0xff]  ;;  %v6860_v0 = vld [vmem:[#allocation72_spill] sm:$0xff] }
 0x955   :  { %3113 = vmatpush.msra.mxu0 %v5743_v57  ;;  %3133 = vmatpush.msra.mxu1 %v5746_v34  ;;  %v6861_v57 = vld [vmem:[#allocation71_spill] sm:$0xff]  ;;  %v6862_v34 = vld [vmem:[#allocation33_spill] sm:$0xff] }
 0x956   :  { %3153 = vmatpush.msra.mxu2 %v5749_v27  ;;  %3173 = vmatpush.msrb.mxu3 %v5752_v28  ;;  %v6863_v27 = vld [vmem:[#allocation49_spill] sm:$0xff] }
 0x957   :  { %3114 = vmatpush.msra.mxu0 %v5755_v50  ;;  %3134 = vmatpush.msra.mxu1 %v5758_v42  ;;  %v6864_v28 = vld [vmem:[#allocation73_spill] sm:$0xff]  ;;  %v6865_v50 = vld [vmem:[#allocation54_spill] sm:$0xff]  ;;  %v6866_v42 = vld [vmem:[#allocation32_spill] sm:$0xff] }
 0x958   :  { %3154 = vmatpush.msra.mxu2 %v5761_v39  ;;  %3174 = vmatpush.msrb.mxu3 %v5764_v61  ;;  %v6867_v39 = vld [vmem:[#allocation23_spill] sm:$0xff]  ;;  %v6868_v61 = vld [vmem:[#allocation34_spill] sm:$0xff] }
 0x959   :  { %3115 = vmatpush.msra.mxu0 %v5767_v60  ;;  %3135 = vmatpush.msra.mxu1 %v5770_v48  ;;  %v1877_v60 = vadd.f32 %v6868_v61, %v6867_v39  ;;  %v6869_v48 = vld [vmem:[#allocation67_spill] sm:$0xff] }
 0x95a   :  { %3155 = vmatpush.msra.mxu2 %v5773_v32  ;;  %3175 = vmatpush.msrb.mxu3 %v5776_v41  ;;  %v6870_v32 = vld [vmem:[#allocation40_spill] sm:$0xff] }
 0x95b   :  { %3116 = vmatpush.msra.mxu0 %v5779_v52  ;;  %3136 = vmatpush.msra.mxu1 %v5782_v46  ;;  %v1918_v41 = vadd.f32 %v6870_v32, %v6869_v48 }
 0x95c   :  { %3156 = vmatpush.msra.mxu2 %v5785_v33  ;;  %3176 = vmatpush.msrb.mxu3 %v5788_v24 }
 0x95d   :  { %3117 = vmatpush.msra.mxu0 %v5791_v7  ;;  %3137 = vmatpush.msra.mxu1 %v5794_v15 }
 0x95e   :  { %3157 = vmatpush.msra.mxu2 %v6841_v43  ;;  %3177 = vmatpush.msrb.mxu3 %v6842_v2 }
 0x95f   :  { %3118 = vmatpush.msra.mxu0 %v6843_v12  ;;  %3138 = vmatpush.msra.mxu1 %v6844_v9 }
 0x960   :  { %3158 = vmatpush.msra.mxu2 %v6845_v10  ;;  %3178 = vmatpush.msrb.mxu3 %v6846_v63 }
 0x961   :  { %3119 = vmatpush.msra.mxu0 %v6847_v4  ;;  %3139 = vmatpush.msra.mxu1 %v6848_v44 }
 0x962   :  { %3159 = vmatpush.msra.mxu2 %v6849_v55  ;;  %3179 = vmatpush.msrb.mxu3 %v6850_v25 }
 0x963   :  { %3120 = vmatpush.msra.mxu0 %v6851_v19  ;;  %3140 = vmatpush.msra.mxu1 %v6852_v37 }
 0x964   :  { %3160 = vmatpush.msra.mxu2 %v6853_v62  ;;  %3180 = vmatpush.msrb.mxu3 %v6854_v1 }
 0x965   :  { %3121 = vmatpush.msra.mxu0 %v6855_v53  ;;  %3141 = vmatpush.msra.mxu1 %v6856_v22 }
 0x966   :  { %3161 = vmatpush.msra.mxu2 %v6857_v13  ;;  %3181 = vmatpush.msrb.mxu3 %v6858_v26 }
 0x967   :  { %3122 = vmatpush.msra.mxu0 %v6859_v5  ;;  %3142 = vmatpush.msra.mxu1 %v6860_v0 }
 0x968   :  { %3162 = vmatpush.msra.mxu2 %v6861_v57  ;;  %3182 = vmatpush.msrb.mxu3 %v6862_v34 }
 0x969   :  { %3123 = vmatpush.msra.mxu0 %v6863_v27  ;;  %3143 = vmatpush.msra.mxu1 %v6864_v28 }
 0x96a   :  { %3163 = vmatpush.msra.mxu2 %v6865_v50  ;;  %3183 = vmatpush.msrb.mxu3 %v6866_v42 }
 0x9c6   :  { %v2821_v52 = vpop.f32.mrf.mxu0  ;;  %v2841_v46 = vpop.f32.mrf.mxu1 }
 0x9c7   :  { %v2884_v33 = vadd.f32 %v2821_v52, %v1877_v60  ;;  %v2885_v24 = vadd.f32 %v2841_v46, %v1918_v41  ;;  %v3278_v41 = vld [vmem:[#allocation15 + $0x70] sm:$0xff]  ;;  %v3277_v52 = vld [vmem:[#allocation15 + $0x68] sm:$0xff]  ;;  %v3276_v46 = vld [vmem:[#allocation15 + $0x60] sm:$0xff] }
 0x9c9   :  { %v3394_v7 = vmul.f32 -1.442695, %v2884_v33  ;;  %v3395_v15 = vmul.f32 -1.442695, %v2885_v24  ;;  %v3275_v33 = vld [vmem:[#allocation15 + $0x58] sm:$0xff] }
 0x9ca   :  { %v6875_v24 = vld [vmem:[#allocation57_spill] sm:$0xff] }
 0x9cb   :  { %3641 = vpow2.f32 %v3394_v7  ;;  %v1880_v7 = vadd.f32 %v6875_v24, %v6867_v39 }
 0x9cc   :  { %3643 = vpow2.f32 %v3395_v15  ;;  %v6876_v15 = vld [vmem:[#allocation64_spill] sm:$0xff] }
 0x9cd   :  { %v2881_v45 = vpop.f32.mrf.mxu3  ;;  %v2861_v21 = vpop.f32.mrf.mxu2  ;;  %v1921_v17 = vadd.f32 %v6876_v15, %v6869_v48 }
 0x9ce   :  { %v2887_v38 = vadd.f32 %v2881_v45, %v2000_v31  ;;  %v2886_v20 = vadd.f32 %v2861_v21, %v1959_v3  ;;  %v3272_v21 = vld [vmem:[#allocation15 + $0x40] sm:$0xff]  ;;  %v2003_v3 = vadd.f32 %v6877_v29, %v6871_v14 }
 0x9d0   :  { %v3396_v59 = vmul.f32 -1.442695, %v2887_v38  ;;  %v3274_v38 = vld [vmem:[#allocation15 + $0x50] sm:$0xff] }
 0x9d1   :  { %v3642_v58 = vpop.eup %3641 }
 0x9d2   :  { %v3644_v6 = vpop.eup %3643  ;;  %v2895_v54 = vadd.f32 1.0, %v3642_v58  ;;  %3645 = vpow2.f32 %v3396_v59 }
 0x9d3   :  { %v2914_v30 = vadd.f32 1.0, %v3644_v6  ;;  %v3273_v6 = vld [vmem:[#allocation15 + $0x48] sm:$0xff] }
 0x9d4   :  { %3647 = vrcp.f32 %v2895_v54  ;;  %v2907_v16 = vand.u32 2147483648, %v2895_v54  ;;  %v2905_v12 = vand.u32 2147483647, %v2895_v54  ;;  %vm2901_vm14 = vweird.f32 %v2895_v54 }
 0x9d5   :  { %3649 = vrcp.f32 %v2914_v30  ;;  %v2926_v43 = vand.u32 2147483648, %v2914_v30  ;;  %v2924_v10 = vand.u32 2147483647, %v2914_v30  ;;  %vm2920_vm15 = vweird.f32 %v2914_v30 }
 0x9d6   :  { %v2908_v44 = vor.u32 1.1754944e-38, %v2907_v16  ;;  %vm2906_vm2 = vcmp.eq.f32.partialorder %v2905_v12, 8.507059e+37  ;;  %v3266_v12 = vld [vmem:[#allocation15 + $0x10] sm:$0xff] }
 0x9d7   :  { %v2927_v19 = vor.u32 1.1754944e-38, %v2926_v43  ;;  %vm2925_vm3 = vcmp.eq.f32.partialorder %v2924_v10, 8.507059e+37 }
 0x9d8   :  { %v3646_v18 = vpop.eup %3645 }
 0x9d9   :  { %v2934_v40 = vadd.f32 1.0, %v3646_v18  ;;  %v3271_v18 = vld [vmem:[#allocation15 + $0x38] sm:$0xff] }
 0x9da   :  { %v3648_v56 = vpop.eup %3647 }
 0x9db   :  { %v3650_v51 = vpop.eup %3649  ;;  %v2897_v11 = vmul.f32 %v3648_v56, %v2895_v54  ;;  %3651 = vrcp.f32 %v2934_v40  ;;  %vm2902_vm12 = vweird.f32 %v3648_v56  ;;  %v2946_v27 = vand.u32 2147483648, %v2934_v40 }
 0x9dc   :  { %v2916_v47 = vmul.f32 %v3650_v51, %v2914_v30  ;;  %3653 = vtanh.f32 %v2886_v20  ;;  %vm2921_vm13 = vweird.f32 %v3650_v51  ;;  %vm2903_vm0 = vmor %vm2901_vm14, %vm2902_vm12  ;;  %vm2940_vm5 = vweird.f32 %v2934_v40 }
 0x9dd   :  { %v2898_v23 = vsub.f32 1.0, %v2897_v11  ;;  %vm2922_vm1 = vmor %vm2920_vm15, %vm2921_vm13  ;;  %v2944_v28 = vand.u32 2147483647, %v2934_v40  ;;  %v2947_v42 = vor.u32 1.1754944e-38, %v2946_v27 }
 0x9de   :  { %v2917_v8 = vsub.f32 1.0, %v2916_v47  ;;  %v3268_v47 = vld [vmem:[#allocation15 + $0x20] sm:$0xff] }
 0x9df   :  { %v2899_v2 = vmul.f32 %v3648_v56, %v2898_v23  ;;  %vm2945_vm7 = vcmp.eq.f32.partialorder %v2944_v28, 8.507059e+37 }
 0x9e0   :  { %v2918_v9 = vmul.f32 %v3650_v51, %v2917_v8 }
 0x9e1   :  { %v3652_v63 = vpop.eup %3651  ;;  %v2900_v4 = vadd.f32 %v3648_v56, %v2899_v2  ;;  %v3267_v2 = vld [vmem:[#allocation15 + $0x18] sm:$0xff] }
 0x9e2   :  { %v2919_v55 = vadd.f32 %v3650_v51, %v2918_v9  ;;  %v2936_v25 = vmul.f32 %v3652_v63, %v2934_v40  ;;  %v3654_v62 = vpop.eup %3653  ;;  %vm2941_vm4 = vweird.f32 %v3652_v63  ;;  %v3270_v40 = vld [vmem:[#allocation15 + $0x30] sm:$0xff]  ;;  %v3265_v9 = vld [vmem:[#allocation15 + $0x8] sm:$0xff] }
 0x9e3   :  { %v2904_v37 = vsel %vm2903_vm0, %v3648_v56, %v2900_v4  ;;  %vm2942_vm6 = vmor %vm2940_vm5, %vm2941_vm4  ;;  %v6878_v4 = vld [vmem:[#allocation75_spill] sm:$0xff] }
 0x9e4   :  { %v2909_v1 = vsel %vm2906_vm2, %v2908_v44, %v2904_v37  ;;  %v2923_v53 = vsel %vm2922_vm1, %v3650_v51, %v2919_v55  ;;  %v2937_v22 = vsub.f32 1.0, %v2936_v25  ;;  %v3269_v51 = vld [vmem:[#allocation15 + $0x28] sm:$0xff]  ;;  %v1962_v44 = vadd.f32 %v6878_v4, %v6873_v35  ;;  %v3264_v55 = vld [vmem:[#allocation15] sm:$0xff] }
 0x9e5   :  { %v2928_v13 = vsel %vm2925_vm3, %v2927_v19, %v2923_v53  ;;  %v2951_v26 = vmul.f32 %v3654_v62, %v2909_v1 }
 0x9e6   :  { %v2950_v5 = vmul.f32 %v2928_v13, %v6048_v49  ;;  %v2938_v0 = vmul.f32 %v3652_v63, %v2937_v22  ;;  %v3279_v49 = vld [vmem:[#allocation15 + $0x78] sm:$0xff] }
 0x9e8   :  { %v6130_v57 = vadd.f32 %v2951_v26, %v2950_v5  ;;  %v2939_v34 = vadd.f32 %v3652_v63, %v2938_v0 }
 0x9ea   :  { %3655 = vtanh.f32 %v6130_v57  ;;  %v2943_v50 = vsel %vm2942_vm6, %v3652_v63, %v2939_v34 }
 0x9eb   :  { %v2948_v60 = vsel %vm2945_vm7, %v2947_v42, %v2943_v50 }
 0x9f0   :  { %v3656_v61 = vpop.eup %3655 }
 0x9f1   :  { %v6133_v32 = vmul.f32 %v3656_v61, %v2948_v60 }
 0x9f3   :  { %2972 = vmatmul.f32.vlgmr.msrb.gmra.mxu0 %v6133_v32  ;;  %2992 = vmatmul.f32.vlgmr.msrb.gmra.mxu1 %v6133_v32 }
 0x9f4   :  { %3012 = vmatmul.f32.vlgmr.msrb.gmra.mxu2 %v6133_v32  ;;  %3032 = vmatmul.f32.vlgmr.msra.gmra.mxu3 %v6133_v32 }
 0x9f5   :  { %3284 = vmatpush.msrb.mxu0 %v3279_v49 }
 0x9f7   :  { %3285 = vmatpush.msrb.mxu0 %v3278_v41 }
 0x9f9   :  { %3286 = vmatpush.msrb.mxu0 %v3277_v52 }
 0x9fb   :  { %3287 = vmatpush.msrb.mxu0 %v3276_v46 }
 0x9fd   :  { %3288 = vmatpush.msrb.mxu0 %v3275_v33 }
 0x9ff   :  { %3289 = vmatpush.msrb.mxu0 %v3274_v38 }
 0xa01   :  { %3290 = vmatpush.msrb.mxu0 %v3273_v6 }
 0xa03   :  { %3291 = vmatpush.msrb.mxu0 %v3272_v21 }
 0xa05   :  { %3292 = vmatpush.msrb.mxu0 %v3271_v18 }
 0xa07   :  { %3293 = vmatpush.msrb.mxu0 %v3270_v40  ;;  %v6881_v40 = vld [vmem:[#allocation74_spill] sm:$0xff] }
 0xa09   :  { %3294 = vmatpush.msrb.mxu0 %v3269_v51 }
 0xa0b   :  { %3295 = vmatpush.msrb.mxu0 %v3268_v47 }
 0xa0d   :  { %3296 = vmatpush.msrb.mxu0 %v3267_v2 }
 0xa0f   :  { %3297 = vmatpush.msrb.mxu0 %v3266_v12 }
 0xa11   :  { %3298 = vmatpush.msrb.mxu0 %v3265_v9 }
 0xa13   :  { %3299 = vmatpush.msrb.mxu0 %v3264_v55 }
 0xa70   :  { %v2973_v31 = vpop.f32.mrf.mxu0  ;;  %v2993_v45 = vpop.f32.mrf.mxu1 }
 0xa71   :  { %v3036_v59 = vadd.f32 %v2973_v31, %v1880_v7  ;;  %v3037_v58 = vadd.f32 %v2993_v45, %v1921_v17 }
 0xa73   :  { %v3397_v54 = vmul.f32 -1.442695, %v3036_v59  ;;  %v3398_v30 = vmul.f32 -1.442695, %v3037_v58 }
 0xa75   :  { %3657 = vpow2.f32 %v3397_v54 }
 0xa76   :  { %3659 = vpow2.f32 %v3398_v30 }
 0xa77   :  { %v3033_v56 = vpop.f32.mrf.mxu3  ;;  %v3013_v10 = vpop.f32.mrf.mxu2 }
 0xa78   :  { %v3039_v20 = vadd.f32 %v3033_v56, %v2003_v3  ;;  %v3038_v37 = vadd.f32 %v3013_v10, %v1962_v44  ;;  %v6880_v3 = vld [vmem:[#allocation69_spill] sm:$0xff]  ;;  %v6882_v56 = vld [vmem:[#allocation24_spill] sm:$0xff] }
 0xa7a   :  { %v3399_v11 = vmul.f32 -1.442695, %v3039_v20  ;;  %v6883_v20 = vld [vmem:[#allocation35_spill] sm:$0xff] }
 0xa7b   :  { %v3658_v23 = vpop.eup %3657  ;;  %v1883_v51 = vadd.f32 %v6883_v20, %v6867_v39 }
 0xa7c   :  { %v3660_v8 = vpop.eup %3659  ;;  %v3047_v16 = vadd.f32 1.0, %v3658_v23  ;;  %3661 = vpow2.f32 %v3399_v11  ;;  %v6884_v11 = vld [vmem:[#allocation51_spill] sm:$0xff] }
 0xa7d   :  { %v3066_v43 = vadd.f32 1.0, %v3660_v8  ;;  %v1924_v47 = vadd.f32 %v6884_v11, %v6869_v48 }
 0xa7e   :  { %3663 = vrcp.f32 %v3047_v16  ;;  %v3059_v26 = vand.u32 2147483648, %v3047_v16  ;;  %v3057_v34 = vand.u32 2147483647, %v3047_v16  ;;  %vm3053_vm10 = vweird.f32 %v3047_v16 }
 0xa7f   :  { %3665 = vrcp.f32 %v3066_v43  ;;  %v3078_v5 = vand.u32 2147483648, %v3066_v43  ;;  %v3076_v28 = vand.u32 2147483647, %v3066_v43  ;;  %vm3072_vm11 = vweird.f32 %v3066_v43 }
 0xa80   :  { %v3060_v61 = vor.u32 1.1754944e-38, %v3059_v26  ;;  %vm3058_vm14 = vcmp.eq.f32.partialorder %v3057_v34, 8.507059e+37 }
 0xa81   :  { %v3079_v41 = vor.u32 1.1754944e-38, %v3078_v5  ;;  %vm3077_vm15 = vcmp.eq.f32.partialorder %v3076_v28, 8.507059e+37 }
 0xa82   :  { %v3662_v63 = vpop.eup %3661 }
 0xa83   :  { %v3086_v25 = vadd.f32 1.0, %v3662_v63 }
 0xa84   :  { %v3664_v19 = vpop.eup %3663 }
 0xa85   :  { %v3666_v62 = vpop.eup %3665  ;;  %v3049_v1 = vmul.f32 %v3664_v19, %v3047_v16  ;;  %3667 = vrcp.f32 %v3086_v25  ;;  %vm3054_vm8 = vweird.f32 %v3664_v19  ;;  %v3098_v58 = vand.u32 2147483648, %v3086_v25 }
 0xa86   :  { %v3068_v53 = vmul.f32 %v3666_v62, %v3066_v43  ;;  %3669 = vtanh.f32 %v3038_v37  ;;  %vm3073_vm9 = vweird.f32 %v3666_v62  ;;  %vm3055_vm12 = vmor %vm3053_vm10, %vm3054_vm8  ;;  %vm3092_vm1 = vweird.f32 %v3086_v25 }
 0xa87   :  { %v3050_v22 = vsub.f32 1.0, %v3049_v1  ;;  %vm3074_vm13 = vmor %vm3072_vm11, %vm3073_vm9  ;;  %v3096_v6 = vand.u32 2147483647, %v3086_v25  ;;  %v3099_v30 = vor.u32 1.1754944e-38, %v3098_v58 }
 0xa88   :  { %v3069_v13 = vsub.f32 1.0, %v3068_v53  ;;  %v6886_v53 = vld [vmem:[#allocation78_spill] sm:$0xff] }
 0xa89   :  { %v3051_v0 = vmul.f32 %v3664_v19, %v3050_v22  ;;  %vm3097_vm3 = vcmp.eq.f32.partialorder %v3096_v6, 8.507059e+37  ;;  %v1965_v22 = vadd.f32 %v6886_v53, %v6873_v35 }
 0xa8a   :  { %v3070_v27 = vmul.f32 %v3666_v62, %v3069_v13 }
 0xa8b   :  { %v3668_v50 = vpop.eup %3667  ;;  %v3052_v42 = vadd.f32 %v3664_v19, %v3051_v0 }
 0xa8c   :  { %v3071_v60 = vadd.f32 %v3666_v62, %v3070_v27  ;;  %v3088_v49 = vmul.f32 %v3668_v50, %v3086_v25  ;;  %v3670_v46 = vpop.eup %3669  ;;  %vm3093_vm0 = vweird.f32 %v3668_v50 }
 0xa8d   :  { %v3056_v52 = vsel %vm3055_vm12, %v3664_v19, %v3052_v42  ;;  %vm3094_vm2 = vmor %vm3092_vm1, %vm3093_vm0 }
 0xa8e   :  { %v3061_v33 = vsel %vm3058_vm14, %v3060_v61, %v3056_v52  ;;  %v3075_v24 = vsel %vm3074_vm13, %v3666_v62, %v3071_v60  ;;  %v3089_v7 = vsub.f32 1.0, %v3088_v49 }
 0xa8f   :  { %v3080_v15 = vsel %vm3077_vm15, %v3079_v41, %v3075_v24  ;;  %v3103_v17 = vmul.f32 %v3670_v46, %v3061_v33 }
 0xa90   :  { %v3102_v31 = vmul.f32 %v3080_v15, %v6130_v57  ;;  %v3090_v45 = vmul.f32 %v3668_v50, %v3089_v7  ;;  %v6879_v57 = vld [vmem:[#allocation80_spill] sm:$0xff] }
 0xa92   :  { %v6148_v38 = vadd.f32 %v3103_v17, %v3102_v31  ;;  %v3091_v59 = vadd.f32 %v3668_v50, %v3090_v45 }
 0xa94   :  { %3671 = vtanh.f32 %v6148_v38  ;;  %v3095_v54 = vsel %vm3094_vm2, %v3668_v50, %v3091_v59 }
 0xa95   :  { %v3100_v18 = vsel %vm3097_vm3, %v3099_v30, %v3095_v54 }
 0xa9a   :  { %v3672_v21 = vpop.eup %3671 }
 0xa9b   :  { %v3106_v29 = vmul.f32 %v3672_v21, %v3100_v18 }
 0xa9d   :  { %3124 = vmatmul.f32.vlgmr.msra.gmra.mxu0 %v3106_v29  ;;  %3144 = vmatmul.f32.vlgmr.msra.gmra.mxu1 %v3106_v29 }
 0xa9e   :  { %3164 = vmatmul.f32.vlgmr.msra.gmra.mxu2 %v3106_v29  ;;  %3184 = vmatmul.f32.vlgmr.msrb.gmra.mxu3 %v3106_v29 }
 0xaa5   :  { %3300 = vmatmul.f32.vlgmr.msrb.gmra.mxu0 %v6879_v57 }
 0xaad   :  { %3303 = vmatmul.f32.gmra.mxu0 %v6880_v3 }
 0xab5   :  { %3306 = vmatmul.f32.gmra.mxu0 %v6881_v40 }
 0xabd   :  { %3309 = vmatmul.f32.gmra.mxu0 %v6882_v56 }
 0xac5   :  { %3312 = vmatmul.f32.gmra.mxu0 %v6051_v36  ;;  %v6164_v36 = vld [vmem:[%s6193_s8] ss:$0 sm:$0xff]  ;;  %s4046_s8 = smov [#allocation16]  }
 0xac6   :  { %s3337_s18 = sshll.u32 %s4046_s8, 4  ;;  %s3338_s18 = int_to_ptr.vmem [resolvable:$true] %s3337_s18 }
 0xacd   :  { %3315 = vmatmul.f32.gmra.mxu0 %v6133_v32  ;;  %v6885_v32 = vld [vmem:[#allocation76_spill] sm:$0xff] }
 0xace   :  { %v2006_v9 = vadd.f32 %v6885_v32, %v6871_v14 }
 0xad5   :  { %3318 = vmatmul.f32.gmra.mxu0 %v3106_v29 }
 0xb1a   :  { %v3125_v23 = vpop.f32.mrf.mxu0  ;;  %v3145_v8 = vpop.f32.mrf.mxu1 }
 0xb1b   :  { %v3188_v16 = vadd.f32 %v3125_v23, %v1883_v51  ;;  %v3189_v43 = vadd.f32 %v3145_v8, %v1924_v47 }
 0xb1d   :  { %v3400_v2 = vmul.f32 -1.442695, %v3188_v16  ;;  %v3401_v12 = vmul.f32 -1.442695, %v3189_v43 }
 0xb1f   :  { %3673 = vpow2.f32 %v3400_v2 }
 0xb20   :  { %3675 = vpow2.f32 %v3401_v12 }
 0xb21   :  { %v3185_v39 = vpop.f32.mrf.mxu3  ;;  %v3165_v62 = vpop.f32.mrf.mxu2 }
 0xb22   :  { %v3191_v10 = vadd.f32 %v3185_v39, %v2006_v9  ;;  %v3301_v63 = vpop.f32.mrf.mxu0  ;;  %v3190_v5 = vadd.f32 %v3165_v62, %v1965_v22 }
 0xb23   :  { %v3302_v48 = vadd.f32 %v6164_v36, %v3301_v63 }
 0xb24   :  { %v3402_v4 = vmul.f32 -1.442695, %v3191_v10 }
 0xb25   :  { %v3674_v44 = vpop.eup %3673  ;;  %3325 = vst [vmem:[#allocation16] sm:$0xff] %v3302_v48 }
 0xb26   :  { %v3676_v55 = vpop.eup %3675  ;;  %v3195_v25 = vadd.f32 1.0, %v3674_v44  ;;  %3677 = vpow2.f32 %v3402_v4 }
 0xb27   :  { %v3214_v19 = vadd.f32 1.0, %v3676_v55 }
 0xb28   :  { %3679 = vrcp.f32 %v3195_v25  ;;  %v3205_v42 = vand.u32 2147483647, %v3195_v25  ;;  %v3207_v61 = vand.u32 2147483648, %v3195_v25  ;;  %vm3201_vm6 = vweird.f32 %v3195_v25 }
 0xb29   :  { %3681 = vrcp.f32 %v3214_v19  ;;  %v3226_v49 = vand.u32 2147483648, %v3214_v19  ;;  %v3224_v46 = vand.u32 2147483647, %v3214_v19  ;;  %vm3220_vm7 = vweird.f32 %v3214_v19 }
 0xb2a   :  { %v3304_v37 = vpop.f32.mrf.mxu0  ;;  %v3208_v7 = vor.u32 1.1754944e-38, %v3207_v61  ;;  %vm3206_vm10 = vcmp.eq.f32.partialorder %v3205_v42, 8.507059e+37 }
 0xb2b   :  { %v3305_v1 = vadd.f32 %v6164_v36, %v3304_v37  ;;  %v3227_v31 = vor.u32 1.1754944e-38, %v3226_v49  ;;  %vm3225_vm11 = vcmp.eq.f32.partialorder %v3224_v46, 8.507059e+37 }
 0xb2c   :  { %v3678_v14 = vpop.eup %3677 }
 0xb2d   :  { %v3234_v13 = vadd.f32 1.0, %v3678_v14  ;;  %3326 = vst [vmem:[#allocation16 + $0x8] sm:$0xff] %v3305_v1 }
 0xb2e   :  { %v3680_v26 = vpop.eup %3679 }
 0xb2f   :  { %v3682_v0 = vpop.eup %3681  ;;  %v3197_v34 = vmul.f32 %v3680_v26, %v3195_v25  ;;  %3683 = vrcp.f32 %v3234_v13  ;;  %vm3202_vm4 = vweird.f32 %v3680_v26  ;;  %v3246_v20 = vand.u32 2147483648, %v3234_v13 }
 0xb30   :  { %v3216_v27 = vmul.f32 %v3682_v0, %v3214_v19  ;;  %3685 = vtanh.f32 %v3190_v5  ;;  %vm3221_vm5 = vweird.f32 %v3682_v0  ;;  %vm3203_vm8 = vmor %vm3201_vm6, %vm3202_vm4  ;;  %vm3240_vm13 = vweird.f32 %v3234_v13 }
 0xb31   :  { %v3198_v28 = vsub.f32 1.0, %v3197_v34  ;;  %vm3222_vm9 = vmor %vm3220_vm7, %vm3221_vm5  ;;  %v3244_v51 = vand.u32 2147483647, %v3234_v13  ;;  %v3247_v23 = vor.u32 1.1754944e-38, %v3246_v20 }
 0xb32   :  { %v3217_v50 = vsub.f32 1.0, %v3216_v27  ;;  %v3307_v60 = vpop.f32.mrf.mxu0 }
 0xb33   :  { %v3199_v41 = vmul.f32 %v3680_v26, %v3198_v28  ;;  %v3308_v52 = vadd.f32 %v6164_v36, %v3307_v60  ;;  %vm3245_vm15 = vcmp.eq.f32.partialorder %v3244_v51, 8.507059e+37 }
 0xb34   :  { %v3218_v35 = vmul.f32 %v3682_v0, %v3217_v50 }
 0xb35   :  { %v3684_v33 = vpop.eup %3683  ;;  %v3200_v24 = vadd.f32 %v3680_v26, %v3199_v41  ;;  %3327 = vst [vmem:[#allocation16 + $0x10] sm:$0xff] %v3308_v52 }
 0xb36   :  { %v3219_v15 = vadd.f32 %v3682_v0, %v3218_v35  ;;  %v3236_v17 = vmul.f32 %v3684_v33, %v3234_v13  ;;  %v3686_v59 = vpop.eup %3685  ;;  %vm3241_vm12 = vweird.f32 %v3684_v33 }
 0xb37   :  { %v3204_v45 = vsel %vm3203_vm8, %v3680_v26, %v3200_v24  ;;  %vm3242_vm14 = vmor %vm3240_vm13, %vm3241_vm12 }
 0xb38   :  { %v3209_v58 = vsel %vm3206_vm10, %v3208_v7, %v3204_v45  ;;  %v3223_v6 = vsel %vm3222_vm9, %v3682_v0, %v3219_v15  ;;  %v3237_v54 = vsub.f32 1.0, %v3236_v17 }
 0xb39   :  { %v3228_v30 = vsel %vm3225_vm11, %v3227_v31, %v3223_v6  ;;  %v3251_v21 = vmul.f32 %v3686_v59, %v3209_v58 }
 0xb3a   :  { %v3250_v18 = vmul.f32 %v3228_v30, %v6148_v38  ;;  %v3310_v29 = vpop.f32.mrf.mxu0  ;;  %v3238_v57 = vmul.f32 %v3684_v33, %v3237_v54 }
 0xb3b   :  { %v3311_v3 = vadd.f32 %v6164_v36, %v3310_v29 }
 0xb3c   :  { %v3252_v40 = vadd.f32 %v3251_v21, %v3250_v18  ;;  %v3239_v56 = vadd.f32 %v3684_v33, %v3238_v57 }
 0xb3d   :  { %3328 = vst [vmem:[#allocation16 + $0x18] sm:$0xff] %v3311_v3 }
 0xb3e   :  { %3687 = vtanh.f32 %v3252_v40  ;;  %v3243_v11 = vsel %vm3242_vm14, %v3684_v33, %v3239_v56 }
 0xb3f   :  { %v3248_v16 = vsel %vm3245_vm15, %v3247_v23, %v3243_v11 }
 0xb42   :  { %v3313_v47 = vpop.f32.mrf.mxu0 }
 0xb43   :  { %v3314_v8 = vadd.f32 %v6164_v36, %v3313_v47 }
 0xb44   :  { %v3688_v38 = vpop.eup %3687 }
 0xb45   :  { %3329 = vst [vmem:[#allocation16 + $0x20] sm:$0xff] %v3314_v8  ;;  %v3254_v43 = vmul.f32 %v3688_v38, %v3248_v16 }
 0xb47   :  { %3321 = vmatmul.f32.gmra.mxu0 %v3254_v43 }
 0xb4a   :  { %v3316_v2 = vpop.f32.mrf.mxu0 }
 0xb4b   :  { %v3317_v12 = vadd.f32 %v6164_v36, %v3316_v2 }
 0xb4d   :  { %3330 = vst [vmem:[#allocation16 + $0x28] sm:$0xff] %v3317_v12 }
 0xb52   :  { %v3319_v32 = vpop.f32.mrf.mxu0 }
 0xb53   :  { %v3320_v9 = vadd.f32 %v6164_v36, %v3319_v32 }
 0xb55   :  { %3331 = vst [vmem:[#allocation16 + $0x30] sm:$0xff] %v3320_v9 }
 0xbc4   :  { %v3322_v39 = vpop.f32.mrf.mxu0 }
 0xbc5   :  { %v3323_v10 = vadd.f32 %v6164_v36, %v3322_v39 }
 0xbc7   :  { %3332 = vst [vmem:[#allocation16 + $0x38] sm:$0xff] %v3323_v10 }
 0xbc8   :  { %3345 = dma.vmem_to_hbm [thread:$0]  %s3338_s18, 1024, %s3340_s3, [#allocation6], %s4040_s29, %s4040_s29, %s4041_s5  }
 0xbc9   :  { %4032 = dma.done.wait [#allocation6], 1024  }
 0xbca   :  { %4033 = vsyncadd [#allocation6], 4294966272 }
 0xbcb   :  { %3350 = vsyncpa [#allocation5], 1 }
 0xbcc   :  { %3351 = vsyncpa [#allocation8], 1 }
 0xbcd   :  { %3352 = vsyncpa [#allocation11], 1 }
 0xbce   :  { %3353 = vsyncpa [#allocation14], 1 }
 0xbcf   :  { %3354 = vsyncpa [#allocation6], 1 }

</bundles_post_ra>
